<compile_context>
chip_gen: v7x
topology: tpu7x:2x2x1
jax: 0.10.0
libtpu: 0.0.40
codegen_flags: <defaults>
</compile_context>

<pallas_src>
import numpy as np
import jax
import jax.numpy as jnp
from jax.experimental import pallas as pl
from jax.experimental.pallas import tpu as pltpu

FINAL_DIM = 768        # final_dim in the module
ROI_DIM = 2048         # roi_aligned_feats feature dim
BOX_DIM = 4            # bbox feature dim
LN_EPS = 1e-12         # layer_norm_epsilon


def _round_up(x, m):
    return ((x + m - 1) // m) * m


def _pick_row_tile(n_rows):
    """Mem-bound kernel: use the biggest row tile up to 512, but keep >= 2
    row tiles whenever the row count allows so v7x's two TensorCores both
    get work from the 'parallel' leading grid axis."""
    n8 = _round_up(max(n_rows, 1), 8)
    if n8 >= 16:
        half = _round_up((n8 + 1) // 2, 8)
        return min(512, half)
    return n8


def _detector_kernel(roi_ref, box_ref, w1_ref, p_ref, out_ref):
    # roi_ref : [TM, 2048] f32   (cast to bf16 here, right before the MXU)
    # box_ref : [TM, 4]    f32
    # w1_ref  : [2048, 768] bf16 (grid-invariant -> stays resident in VMEM)
    # p_ref   : [8, 768]   f32   rows: b1, b2, gamma, beta, W2[0:4]
    roi_bf16 = roi_ref[...].astype(jnp.bfloat16)

    # obj_downsample Linear(2048, 768): bf16 x bf16 -> f32 on the MXU (full K).
    acc = jnp.dot(roi_bf16, w1_ref[...], preferred_element_type=jnp.float32)

    b1 = p_ref[0:1, :]
    b2 = p_ref[1:2, :]
    gamma = p_ref[2:3, :]
    beta = p_ref[3:4, :]
    w2 = p_ref[4:8, :]                                         # [4, 768]

    # obj_downsample: Dropout(0.1) -> Linear -> ReLU
    # TODO(synk): Dropout(p=0.1) implemented as eval-mode identity (no RNG drop).
    h1 = jnp.maximum(acc + b1, 0.0)                            # [TM, 768]

    # ln_f: LayerNorm(768, eps=1e-12) (biased variance, like torch)
    mean = jnp.mean(h1, axis=-1, keepdims=True)
    var = jnp.mean(jnp.square(h1 - mean), axis=-1, keepdims=True)
    ln = (h1 - mean) * jax.lax.rsqrt(var + LN_EPS) * gamma + beta

    # bbox_upsample: Linear(4, 768) -> ReLU on the VPU (K=4, no MXU/padding).
    # (the LayerNorm'ed bbox branch is discarded in the reference code)
    box = box_ref[...]                                         # [TM, 4] f32
    h2 = b2 + box[:, 0:1] * w2[0:1, :]
    for kk in range(1, BOX_DIM):
        h2 = h2 + box[:, kk:kk + 1] * w2[kk:kk + 1, :]
    h2 = jnp.maximum(h2, 0.0)

    out_ref[...] = (ln + h2).astype(out_ref.dtype)


def simple_detector_forward(roi_feats, boxes, box_mask, params):
    """Returns the packed [B, M, FINAL_DIM] tensor (rows beyond each batch's
    number of valid boxes are zero, matching pad_sequence before the final
    max-length truncation)."""
    B, M, _ = roi_feats.shape
    N = B * M

    w1 = params["w1"].astype(jnp.bfloat16)                     # [2048, 768]
    # Pack all small per-feature params into one (8, 768) f32 slab:
    # rows 0..3 = b1, b2, gamma, beta ; rows 4..7 = W2.
    packed = jnp.concatenate([
        params["b1"].reshape(1, FINAL_DIM),
        params["b2"].reshape(1, FINAL_DIM),
        params["gamma"].reshape(1, FINAL_DIM),
        params["beta"].reshape(1, FINAL_DIM),
        params["w2"].reshape(BOX_DIM, FINAL_DIM),
    ], axis=0).astype(jnp.float32)                             # [8, 768]

    # --- flatten batch x objects into one row axis, pad to the row tile ---
    TM = _pick_row_tile(N)
    Npad = _round_up(N, TM)
    roi_flat = roi_feats.reshape(N, ROI_DIM).astype(jnp.float32)   # native f32
    box_flat = boxes.reshape(N, BOX_DIM).astype(jnp.float32)
    if Npad > N:
        roi_flat = jnp.pad(roi_flat, ((0, Npad - N), (0, 0)))
        box_flat = jnp.pad(box_flat, ((0, Npad - N), (0, 0)))

    y = pl.pallas_call(
        _detector_kernel,
        out_shape=jax.ShapeDtypeStruct((Npad, FINAL_DIM), jnp.float32),
        grid_spec=pltpu.PrefetchScalarGridSpec(
            num_scalar_prefetch=0,
            grid=(Npad // TM,),
            in_specs=[
                pl.BlockSpec((TM, ROI_DIM), lambda i: (i, 0)),       # roi (f32)
                pl.BlockSpec((TM, BOX_DIM), lambda i: (i, 0)),       # boxes (f32)
                pl.BlockSpec((ROI_DIM, FINAL_DIM), lambda i: (0, 0)),  # W1 (bf16, resident)
                pl.BlockSpec((8, FINAL_DIM), lambda i: (0, 0)),      # packed params
            ],
            out_specs=pl.BlockSpec((TM, FINAL_DIM), lambda i: (i, 0)),
        ),
        compiler_params=pltpu.CompilerParams(
            dimension_semantics=("parallel",),
            vmem_limit_bytes=32 * 1024 * 1024,
        ),
    )(roi_flat, box_flat, w1, packed)

    # --- pad_sequence compaction as a plain-JAX gather (no M x M matmul) ---
    y = y[:N].reshape(B, M, FINAL_DIM)
    mask = box_mask.astype(jnp.int32)
    lengths = mask.sum(axis=1)                                     # [B]
    order = jnp.argsort(-mask, axis=1, stable=True)                # valid rows first, order kept
    gathered = jnp.take_along_axis(y, order[:, :, None], axis=1)   # [B, M, 768]
    valid = (jnp.arange(M, dtype=jnp.int32)[None, :] < lengths[:, None])[:, :, None]
    return jnp.where(valid, gathered, 0.0)


def _reference_numpy(roi_feats, boxes, box_mask, params, quantize_matmul_inputs=False):
    """Pure numpy reference following the PyTorch code path exactly.
    If quantize_matmul_inputs, roi/W1 are rounded through bf16 (to match the
    kernel's MXU inputs) but all arithmetic stays f32."""
    roi = np.asarray(roi_feats, np.float32)
    box = np.asarray(boxes, np.float32)
    mask = np.asarray(box_mask)
    w1 = np.asarray(params["w1"], np.float32)
    b1 = np.asarray(params["b1"], np.float32)
    w2 = np.asarray(params["w2"], np.float32)
    b2 = np.asarray(params["b2"], np.float32)
    g, bta = np.asarray(params["gamma"], np.float32), np.asarray(params["beta"], np.float32)

    if quantize_matmul_inputs:
        roi = np.asarray(jnp.asarray(roi).astype(jnp.bfloat16).astype(jnp.float32))
        w1 = np.asarray(jnp.asarray(w1).astype(jnp.bfloat16).astype(jnp.float32))

    B, M, _ = roi.shape
    h1 = np.maximum(roi @ w1 + b1, 0.0)
    mean = h1.mean(-1, keepdims=True)
    var = ((h1 - mean) ** 2).mean(-1, keepdims=True)
    ln = (h1 - mean) / np.sqrt(var + LN_EPS) * g + bta
    h2 = np.maximum(box @ w2 + b2, 0.0)
    y = ln + h2

    out = np.zeros((B, M, FINAL_DIM), np.float32)
    for i in range(B):
        vals = y[i][mask[i] > 0]
        out[i, :len(vals)] = vals
    return out


if __name__ == "__main__":
    B, M = 2, 8  # batch=2, max_num_objects=8 (6 in JSL; 8 chosen for tiling)

    key = jax.random.PRNGKey(0)
    k_roi, k_box, k_w1, k_b1, k_w2, k_b2, k_g, k_bt = jax.random.split(key, 8)

    roi_feats = jax.random.normal(k_roi, (B, M, ROI_DIM), dtype=jnp.float32)
    boxes = jax.random.uniform(k_box, (B, M, BOX_DIM), dtype=jnp.float32)
    # deterministic, non-contiguous mask to exercise the pad_sequence packing
    box_mask = jnp.array([[1, 0, 1, 1, 0, 1, 0, 0],
                          [1, 1, 1, 0, 0, 0, 1, 1]], dtype=jnp.int32)

    params = {
        "w1": jax.random.normal(k_w1, (ROI_DIM, FINAL_DIM), dtype=jnp.float32) * 0.02,
        "b1": jax.random.normal(k_b1, (FINAL_DIM,), dtype=jnp.float32) * 0.02,
        "w2": jax.random.normal(k_w2, (BOX_DIM, FINAL_DIM), dtype=jnp.float32) * 0.02,
        "b2": jax.random.normal(k_b2, (FINAL_DIM,), dtype=jnp.float32) * 0.02,
        "gamma": 1.0 + jax.random.normal(k_g, (FINAL_DIM,), dtype=jnp.float32) * 0.01,
        "beta": jax.random.normal(k_bt, (FINAL_DIM,), dtype=jnp.float32) * 0.01,
    }

    out_full = simple_detector_forward(roi_feats, boxes, box_mask, params)
    out_full = jax.block_until_ready(out_full)
    out_np = np.asarray(out_full)

    # pad_sequence truncates to max(lengths) along the object axis
    lengths = np.asarray(box_mask).sum(1)
    maxlen = int(lengths.max())
    obj_reps = out_np[:, :maxlen]                        # [B, max(lengths), 768]

    # tight check: same bf16 matmul inputs as the kernel, f32 math everywhere else
    ref_tight = _reference_numpy(roi_feats, boxes, box_mask, params,
                                 quantize_matmul_inputs=True)
    np.testing.assert_allclose(out_np, ref_tight, rtol=2e-3, atol=2e-3)

    # loose check against the exact f32 module semantics (bf16 MXU quantization only)
    ref_f32 = _reference_numpy(roi_feats, boxes, box_mask, params,
                               quantize_matmul_inputs=False)
    np.testing.assert_allclose(out_np, ref_f32, rtol=5e-2, atol=5e-2)

    assert obj_reps.shape == (B, maxlen, FINAL_DIM)

    print("KERNEL_OK")
</pallas_src>

<mosaic_0001>
module attributes {stable_mosaic.version = 11 : i64} {
  func.func @_detector_kernel(%arg0: i32, %arg1: memref<8x2048xf32, #tpu.memory_space<vmem>>, %arg2: memref<8x4xf32, #tpu.memory_space<vmem>>, %arg3: memref<2048x768xbf16, #tpu.memory_space<vmem>>, %arg4: memref<8x768xf32, #tpu.memory_space<vmem>>, %arg5: memref<8x768xf32, #tpu.memory_space<vmem>>) attributes {dimension_semantics = [#tpu.dimension_semantics<parallel>], iteration_bounds = array<i64: 2>, scalar_prefetch = 0 : i64, scratch_operands = 0 : i64, tpu.core_type = #tpu.core_type<tc>, window_params = [{transform_indices = @transform_0, window_bounds = array<i64: 8, 2048>}, {transform_indices = @transform_1, window_bounds = array<i64: 8, 4>}, {pipeline_mode = #tpu.pipeline_mode<synchronous>, transform_indices = @transform_2, window_bounds = array<i64: 2048, 768>}, {pipeline_mode = #tpu.pipeline_mode<synchronous>, transform_indices = @transform_3, window_bounds = array<i64: 8, 768>}, {transform_indices = @transform_4, window_bounds = array<i64: 8, 768>}]} {
    %c0 = arith.constant 0 : index
    %c0_0 = arith.constant 0 : index
    %0 = vector.load %arg1[%c0, %c0_0] : memref<8x2048xf32, #tpu.memory_space<vmem>>, vector<8x2048xf32>
    %1 = arith.truncf %0 : vector<8x2048xf32> to vector<8x2048xbf16>
    %c0_1 = arith.constant 0 : index
    %c0_2 = arith.constant 0 : index
    %2 = vector.load %arg3[%c0_1, %c0_2] : memref<2048x768xbf16, #tpu.memory_space<vmem>>, vector<2048x768xbf16>
    %cst = arith.constant dense<0.000000e+00> : vector<8x768xf32>
    %3 = tpu.matmul %1, %2, %cst {dimension_numbers = #tpu.dot_dimension_numbers<[1], [0], [0], [1], [0, 0, 1, 1], [], []>} : vector<8x2048xbf16>, vector<2048x768xbf16>, vector<8x768xf32> -> vector<8x768xf32>
    %c0_3 = arith.constant 0 : index
    %c0_4 = arith.constant 0 : index
    %4 = vector.load %arg4[%c0_3, %c0_4] : memref<8x768xf32, #tpu.memory_space<vmem>>, vector<1x768xf32>
    %c1 = arith.constant 1 : index
    %c0_5 = arith.constant 0 : index
    %5 = vector.load %arg4[%c1, %c0_5] : memref<8x768xf32, #tpu.memory_space<vmem>>, vector<1x768xf32>
    %c2 = arith.constant 2 : index
    %c0_6 = arith.constant 0 : index
    %6 = vector.load %arg4[%c2, %c0_6] : memref<8x768xf32, #tpu.memory_space<vmem>>, vector<1x768xf32>
    %c3 = arith.constant 3 : index
    %c0_7 = arith.constant 0 : index
    %7 = vector.load %arg4[%c3, %c0_7] : memref<8x768xf32, #tpu.memory_space<vmem>>, vector<1x768xf32>
    %c4 = arith.constant 4 : index
    %c0_8 = arith.constant 0 : index
    %8 = vector.load %arg4[%c4, %c0_8] : memref<8x768xf32, #tpu.memory_space<vmem>>, vector<4x768xf32>
    %9 = vector.broadcast %4 : vector<1x768xf32> to vector<8x768xf32>
    %10 = arith.addf %3, %9 : vector<8x768xf32>
    %cst_9 = arith.constant 0.000000e+00 : f32
    %11 = vector.broadcast %cst_9 : f32 to vector<8x768xf32>
    %12 = arith.maximumf %10, %11 : vector<8x768xf32>
    %cst_10 = arith.constant dense<0.000000e+00> : vector<8xf32>
    %13 = vector.multi_reduction <add>, %12, %cst_10 [1] : vector<8x768xf32> to vector<8xf32>
    %14 = vector.shape_cast %13 : vector<8xf32> to vector<8x1xf32>
    %cst_11 = arith.constant 7.680000e+02 : f32
    %15 = vector.broadcast %cst_11 : f32 to vector<8x1xf32>
    %16 = arith.divf %14, %15 : vector<8x1xf32>
    %17 = vector.broadcast %16 : vector<8x1xf32> to vector<8x768xf32>
    %18 = arith.subf %12, %17 : vector<8x768xf32>
    %19 = arith.mulf %18, %18 : vector<8x768xf32>
    %cst_12 = arith.constant dense<0.000000e+00> : vector<8xf32>
    %20 = vector.multi_reduction <add>, %19, %cst_12 [1] : vector<8x768xf32> to vector<8xf32>
    %21 = vector.shape_cast %20 : vector<8xf32> to vector<8x1xf32>
    %cst_13 = arith.constant 7.680000e+02 : f32
    %22 = vector.broadcast %cst_13 : f32 to vector<8x1xf32>
    %23 = arith.divf %21, %22 : vector<8x1xf32>
    %24 = vector.broadcast %16 : vector<8x1xf32> to vector<8x768xf32>
    %25 = arith.subf %12, %24 : vector<8x768xf32>
    %cst_14 = arith.constant 9.99999996E-13 : f32
    %26 = vector.broadcast %cst_14 : f32 to vector<8x1xf32>
    %27 = arith.addf %23, %26 : vector<8x1xf32>
    %28 = math.rsqrt %27 : vector<8x1xf32>
    %29 = vector.broadcast %28 : vector<8x1xf32> to vector<8x768xf32>
    %30 = arith.mulf %25, %29 : vector<8x768xf32>
    %31 = vector.broadcast %6 : vector<1x768xf32> to vector<8x768xf32>
    %32 = arith.mulf %30, %31 : vector<8x768xf32>
    %33 = vector.broadcast %7 : vector<1x768xf32> to vector<8x768xf32>
    %34 = arith.addf %32, %33 : vector<8x768xf32>
    %c0_15 = arith.constant 0 : index
    %c0_16 = arith.constant 0 : index
    %35 = vector.load %arg2[%c0_15, %c0_16] : memref<8x4xf32, #tpu.memory_space<vmem>>, vector<8x4xf32>
    %36 = vector.extract_strided_slice %35 {offsets = [0, 0], sizes = [8, 1], strides = [1, 1]} : vector<8x4xf32> to vector<8x1xf32>
    %37 = vector.extract_strided_slice %8 {offsets = [0, 0], sizes = [1, 768], strides = [1, 1]} : vector<4x768xf32> to vector<1x768xf32>
    %38 = vector.broadcast %36 : vector<8x1xf32> to vector<8x768xf32>
    %39 = vector.broadcast %37 : vector<1x768xf32> to vector<8x768xf32>
    %40 = arith.mulf %38, %39 : vector<8x768xf32>
    %41 = vector.broadcast %5 : vector<1x768xf32> to vector<8x768xf32>
    %42 = arith.addf %41, %40 : vector<8x768xf32>
    %43 = vector.extract_strided_slice %35 {offsets = [0, 1], sizes = [8, 1], strides = [1, 1]} : vector<8x4xf32> to vector<8x1xf32>
    %44 = vector.extract_strided_slice %8 {offsets = [1, 0], sizes = [1, 768], strides = [1, 1]} : vector<4x768xf32> to vector<1x768xf32>
    %45 = vector.broadcast %43 : vector<8x1xf32> to vector<8x768xf32>
    %46 = vector.broadcast %44 : vector<1x768xf32> to vector<8x768xf32>
    %47 = arith.mulf %45, %46 : vector<8x768xf32>
    %48 = arith.addf %42, %47 : vector<8x768xf32>
    %49 = vector.extract_strided_slice %35 {offsets = [0, 2], sizes = [8, 1], strides = [1, 1]} : vector<8x4xf32> to vector<8x1xf32>
    %50 = vector.extract_strided_slice %8 {offsets = [2, 0], sizes = [1, 768], strides = [1, 1]} : vector<4x768xf32> to vector<1x768xf32>
    %51 = vector.broadcast %49 : vector<8x1xf32> to vector<8x768xf32>
    %52 = vector.broadcast %50 : vector<1x768xf32> to vector<8x768xf32>
    %53 = arith.mulf %51, %52 : vector<8x768xf32>
    %54 = arith.addf %48, %53 : vector<8x768xf32>
    %55 = vector.extract_strided_slice %35 {offsets = [0, 3], sizes = [8, 1], strides = [1, 1]} : vector<8x4xf32> to vector<8x1xf32>
    %56 = vector.extract_strided_slice %8 {offsets = [3, 0], sizes = [1, 768], strides = [1, 1]} : vector<4x768xf32> to vector<1x768xf32>
    %57 = vector.broadcast %55 : vector<8x1xf32> to vector<8x768xf32>
    %58 = vector.broadcast %56 : vector<1x768xf32> to vector<8x768xf32>
    %59 = arith.mulf %57, %58 : vector<8x768xf32>
    %60 = arith.addf %54, %59 : vector<8x768xf32>
    %cst_17 = arith.constant 0.000000e+00 : f32
    %61 = vector.broadcast %cst_17 : f32 to vector<8x768xf32>
    %62 = arith.maximumf %60, %61 : vector<8x768xf32>
    %63 = arith.addf %34, %62 : vector<8x768xf32>
    %c0_18 = arith.constant 0 : index
    %c0_19 = arith.constant 0 : index
    %64 = vector.load %arg5[%c0_18, %c0_19] : memref<8x768xf32, #tpu.memory_space<vmem>>, vector<8x768xf32>
    tpu.vector_store %arg5[%c0_18, %c0_19], %63 {strides = array<i32>} : memref<8x768xf32, #tpu.memory_space<vmem>>, vector<8x768xf32>,
    return
  }
  func.func @transform_0(%arg0: i32) -> (i32, i32) {
    %c0_i32 = arith.constant 0 : i32
    %c0_i32_0 = arith.constant 0 : i32
    return %arg0, %c0_i32 : i32, i32
  }
  func.func @transform_1(%arg0: i32) -> (i32, i32) {
    %c0_i32 = arith.constant 0 : i32
    %c0_i32_0 = arith.constant 0 : i32
    return %arg0, %c0_i32 : i32, i32
  }
  func.func @transform_2(%arg0: i32) -> (i32, i32) {
    %c0_i32 = arith.constant 0 : i32
    %c0_i32_0 = arith.constant 0 : i32
    %c0_i32_1 = arith.constant 0 : i32
    return %c0_i32, %c0_i32_0 : i32, i32
  }
  func.func @transform_3(%arg0: i32) -> (i32, i32) {
    %c0_i32 = arith.constant 0 : i32
    %c0_i32_0 = arith.constant 0 : i32
    %c0_i32_1 = arith.constant 0 : i32
    return %c0_i32, %c0_i32_0 : i32, i32
  }
  func.func @transform_4(%arg0: i32) -> (i32, i32) {
    %c0_i32 = arith.constant 0 : i32
    %c0_i32_0 = arith.constant 0 : i32
    return %arg0, %c0_i32 : i32, i32
  }
}

</mosaic_0001>

<bundles_post_ra>
// kernel: tpu_custom_call.1
= control target key start
LH: loop header
LB: loop body
LE: loop exit
PB: predicated region body
PF: predicated region fallthrough
CT: control target
= control target key end

     0   :  { %9 = vsyncpa [#allocation3], 0  ;;  %s9171_s0 = inlined_call_operand.hbm [shape: f32[16,2048], index: 0, kind: input, shape index: {}]   ;;  %s9172_s1 = inlined_call_operand.vmem [shape: f32[16,4], index: 1, kind: input, shape index: {}]   ;;  %s9173_s2 = inlined_call_operand.hbm [shape: bf16[2048,768], index: 2, kind: input, shape index: {}]   ;;  %s9174_s3 = inlined_call_operand.hbm [shape: f32[8,768], index: 3, kind: input, shape index: {}]   ;;  %s9175_s4 = inlined_call_operand.hbm [shape: f32[16,768], index: 4, kind: output, shape index: {}]  }
   0x1   :  { %11 = vsyncpa [#allocation3 + $0x1], 0 }
   0x2   :  { %12 = vsyncpa [#allocation6], 0 }
   0x3   :  { %13 = vsyncpa [#allocation4], 0 }
   0x4   :  { %15 = vsyncpa [#allocation4 + $0x1], 0  ;;  %s8678_s15 = smov 0   ;;  %s8680_s16 = smov 0  }
   0x5   :  { %s8682_s17 = smov 0   ;;  %s8684_s18 = smov 0  }
   0x6 LB: > { %s8699_s19 = sadd.s32 4294967295, %s8641_s18   ;;  %s6378_s20 = sadd.s32 4294967294, %s8641_s18   ;;  %s8641_s18 = sphi %s8684_s18, %s9195_s18   ;;  %s8637_s17 = sphi %s8682_s17, %s9194_s17   ;;  %s8633_s16 = sphi %s8680_s16, %s9193_s16   ;;  %s8629_s15 = sphi %s8678_s15, %s9192_s15  }
   0x7   : > { %p41_p0 = scmp.ne.s32.totalorder %s8633_s16, %s8629_s15  ;;  %p9176_p1 = scmp.eq.s32.totalorder %s8699_s19, 0 }
   0x8   : > { %p139_p3 = scmp.eq.s32.totalorder %s6378_s20, 1  ;;  %p6379_p5 = scmp.ge.s32.totalorder %s8641_s18, 1 }
   0x9   : > { %p8708_p4 = por %p9176_p1, %p41_p0  ;;  %p146_p7 = scmp.lt.s32.totalorder %s8641_s18, 3 }
   0xa   : > { %p8713_p6 = por %p139_p3, %p41_p0  ;;  %s8643_s24 = smov [#allocation5]  }
   0xb   : > { %s9179_s21 = scalar_select %p8708_p4, 1, 0 }
   0xc   : > { %s9180_s22 = scalar_select %p8713_p6, 1, 0 }
   0xd   : > { %p8718_p8 = pnand %p6379_p5, %p146_p7  ;;  %s158_s25 = sshll.u32 %s8643_s24, 4  ;;  %s8722_s25 = int_to_ptr.vmem [resolvable:$true] %s158_s25 }
   0xe   : > { %s8644_s27 = smov [#allocation7]   ;;  %s8485_s5 = scalar_lea.hbm %s9173_s2, 98304 }
   0xf   : > { %p7265_p9 = pneg %p8718_p8  ;;  %s172_s28 = sshll.u32 %s8644_s27, 4  ;;  %s8733_s28 = int_to_ptr.vmem [resolvable:$true] %s172_s28 }
  0x10   : > { %p8486_p12 = scmp.ne.s32.totalorder %s9173_s2, %s8485_s5  ;;  %p8492_p5 = scmp.lt.u32.totalorder %s8485_s5, %s9173_s2 }
  0x11   : > { %p8729_p11 = pnand %p7265_p9, %p9176_p1 }
  0x13   : > { %p8487_p13 = pneg %p8729_p11 }
  0x15   : > { %p8488_p0 = pnand %p8487_p13, %p8486_p12 }
  0x17   : > { %p8489_p3 = pneg %p8488_p0 }
  0x19   : > { %p8494_p7 = pnand %p8492_p5, %p8489_p3 }
  0x1b   : > { %8497 = shalt.err (!%p8494_p7)
}
  0x1c   : > { %s8498_s10 = scalar_lea.vmem %s8722_s25, 98304  ;;  %p8506_p2 = scmp.lt.s32.totalorder %s8722_s25, %s8722_s25 }
  0x1d   : > { %p8499_p9 = scmp.ne.s32.totalorder %s8722_s25, %s8498_s10  ;;  %p8507_p12 = scmp.lt.s32.totalorder %s8498_s10, %s8498_s10 }
  0x1f   : > { %p8501_p10 = pnand %p8499_p9, %p8487_p13  ;;  %p8508_p0 = por %p8507_p12, %p8506_p2 }
  0x21   : > { %p8502_p1 = pneg %p8501_p10 }
  0x23   : > { %p8509_p6 = pnand %p8508_p0, %p8502_p1 }
  0x25   : > { %8512 = shalt.err (!%p8509_p6)
}
  0x26   : > { %s8645_s11 = smov 384   ;;  %s8646_s12 = smov 24  }
  0x27   : > { %7268 = dma.hbm_to_vmem [thread:$0]  (!%p8729_p11), %s9173_s2, 98304, %s8722_s25, [#allocation6], %s8645_s11, %s8645_s11, %s8646_s12  }
  0x28   : > { %s8513_s27 = scalar_lea.hbm %s9174_s3, 768 }
  0x29   : > { %p8514_p2 = scmp.ne.s32.totalorder %s9174_s3, %s8513_s27  ;;  %p8520_p10 = scmp.lt.u32.totalorder %s8513_s27, %s9174_s3 }
  0x2b   : > { %p8516_p1 = pnand %p8514_p2, %p8487_p13 }
  0x2d   : > { %p8517_p6 = pneg %p8516_p1 }
  0x2f   : > { %p8522_p3 = pnand %p8520_p10, %p8517_p6 }
  0x31   : > { %8525 = shalt.err (!%p8522_p3)
}
  0x32   : > { %s8526_s25 = scalar_lea.vmem %s8733_s28, 768  ;;  %p8534_p12 = scmp.lt.s32.totalorder %s8733_s28, %s8733_s28 }
  0x33   : > { %p8527_p5 = scmp.ne.s32.totalorder %s8733_s28, %s8526_s25  ;;  %p8535_p0 = scmp.lt.s32.totalorder %s8526_s25, %s8526_s25 }
  0x35   : > { %p8529_p7 = pnand %p8527_p5, %p8487_p13  ;;  %p8536_p2 = por %p8535_p0, %p8534_p12 }
  0x37   : > { %p8530_p9 = pneg %p8529_p7 }
  0x39   : > { %p8537_p1 = pnand %p8536_p2, %p8530_p9 }
  0x3b   : > { %8540 = shalt.err (!%p8537_p1)
}
  0x3c   : > { %7271 = dma.hbm_to_vmem [thread:$0]  (!%p8729_p11), %s9174_s3, 768, %s8733_s28, [#allocation6]  }
  0x3d   : > { %s8788_s9 = sadd.s32 1, %s8641_s18   ;;  %s28_s26 = sadd.s32 1, %s8637_s17 }
  0x3e   : > { %s25_s10 = ssub.s32 %s8641_s18, %s8788_s9  ;;  %p35_p13 = scmp.ne.s32.totalorder %s8637_s17, %s8633_s16 }
  0x3f   : > { %p26_p6 = scmp.eq.s32.totalorder %s25_s10, 0  ;;  %p36_p10 = scmp.eq.s32.totalorder %s8641_s18, 0 }
  0x40   : > { %p9183_p3 = scmp.eq.s32.totalorder %s8699_s19, 1  ;;  %p7282_p7 = scmp.lt.s32.totalorder %s8641_s18, 2 }
  0x41   : > { %s8804_s12 = scalar_select %p26_p6, %s8637_s17, %s28_s26  }
  0x42   : > { %p8798_p5 = por %p9183_p3, %p35_p13  ;;  %p37_p9 = por %p36_p10, %p35_p13 }
  0x43   : > { %s183_s13 = sand.u32 1, %s8637_s17   ;;  %s7162_s28 = sshll.u32 %s8641_s18, 11 }
  0x44   : > { %s9184_s11 = scalar_select %p8798_p5, 1, 0 }
  0x45   : > { %s6383_s14 = sshll.u32 %s183_s13, 7  ;;  %s8811_s27 = scalar_lea.hbm %s9171_s0, %s7162_s28 }
  0x46   : > { %s187_s29 = scalar_lea.vmem [#allocation2], %s6383_s14  ;;  %p8815_p11 = pnand %p7282_p7, %p37_p9 }
  0x47   : > { %s195_s30 = sshll.u32 %s187_s29, 4  ;;  %s184_s6 = scalar_lea.sflag [#allocation3], %s183_s13  ;;  %s8813_s30 = int_to_ptr.vmem [resolvable:$true] %s195_s30 }
  0x48   : > { %s8541_s25 = scalar_lea.hbm %s8811_s27, 2048  ;;  %p8543_p0 = pneg %p8815_p11 }
  0x49   : > { %p8542_p12 = scmp.ne.s32.totalorder %s8811_s27, %s8541_s25  ;;  %s8546_s26 = scalar_lea.hbm %s9171_s0, 4096 }
  0x4a   : > { %p8547_p13 = scmp.lt.u32.totalorder %s8811_s27, %s9171_s0  ;;  %p8548_p6 = scmp.lt.u32.totalorder %s8546_s26, %s8541_s25 }
  0x4b   : > { %p8544_p2 = pnand %p8543_p0, %p8542_p12  ;;  %p8550_p3 = scmp.lt.u32.totalorder %s8541_s25, %s8811_s27 }
  0x4c   : > { %p8549_p10 = por %p8548_p6, %p8547_p13 }
  0x4d   : > { %p8545_p1 = pneg %p8544_p2 }
  0x4e   : > { %p8551_p7 = por %p8550_p3, %p8549_p10 }
  0x50   : > { %p8552_p9 = pnand %p8551_p7, %p8545_p1 }
  0x52   : > { %8555 = shalt.err (!%p8552_p9)
}
  0x53   : > { %s8556_s13 = scalar_lea.vmem %s8813_s30, 2048  ;;  %s8647_s28 = smov [#allocation2]  }
  0x54   : > { %p8557_p12 = scmp.ne.s32.totalorder %s8813_s30, %s8556_s13  ;;  %s8561_s20 = sshll.u32 %s8647_s28, 4  ;;  %s8562_s20 = int_to_ptr.vmem [resolvable:$false] %s8561_s20 }
  0x55   : > { %s8563_s24 = scalar_lea.vmem %s8562_s20, 4096  ;;  %p8564_p4 = scmp.lt.s32.totalorder %s8813_s30, %s8562_s20 }
  0x56   : > { %p8559_p2 = pnand %p8557_p12, %p8543_p0  ;;  %p8565_p13 = scmp.lt.s32.totalorder %s8563_s24, %s8556_s13 }
  0x58   : > { %p8560_p5 = pneg %p8559_p2  ;;  %p8566_p6 = por %p8565_p13, %p8564_p4 }
  0x5a   : > { %p8567_p10 = pnand %p8566_p6, %p8560_p5 }
  0x5c   : > { %8570 = shalt.err (!%p8567_p10)
}
  0x5d   : > { %7275 = dma.hbm_to_vmem [thread:$0]  (!%p8815_p11), %s8811_s27, 2048, %s8813_s30, %s184_s6  }
  0x5e   : > { %211 = sbr.rel (%p8718_p8) target bundleno = 1437 (0x59d), region = 36  ;;  %s8847_s29 = sand.u32 (!%p8718_p8), 1, %s8633_s16  }
  0x5f   : > { %s6387_s25 = sshll.u32 (!%p8718_p8), %s8847_s29, 7  ;;  %s214_s7 = scalar_lea.sflag (!%p8718_p8), [#allocation3], %s8847_s29 }
  0x60   : > { %s8851_s8 = scalar_lea.vmem (!%p8718_p8), [#allocation2], %s6387_s25  ;;  %p9186_p4 = scmp.ne.s32.totalorder (!%p8718_p8), %s9179_s21, 0 }
  0x65   : > { %8616 = dma.done.wait (%p9186_p4), %s214_s7, 2048  }
  0x66   : > { %8618 = vsyncadd (%p9186_p4), %s214_s7, 4294965248  ;;  %p9187_p5 = scmp.eq.s32.totalorder %s8699_s19, 0 }
  0x68   : > { %8620 = dma.done.wait (%p9187_p5), [#allocation6], 99072   ;;  %p9188_p8 = pmov %p9187_p5 }
  0x69   : > { %v7331_v0 = vld [vmem:[#allocation5 + $0x4] ss:$24 sps:$4 sm:$0xff]   ;;  %v7335_v2 = vld [vmem:[#allocation5] ss:$24 sps:$4 sm:$0xff]   ;;  %v7337_v4 = vld [vmem:[#allocation5 + $0x34] ss:$24 sps:$4 sm:$0xff]  }
  0x6a   : > { %8622 = vsyncadd (%p9188_p8), [#allocation6], 4294868224  ;;  %v7333_v1 = vld [vmem:[#allocation5 + $0xc04] ss:$24 sps:$4 sm:$0xff]   ;;  %4950 = vmatprep.subr.bf16.mxu1 %v7331_v0  ;;  %v7336_v3 = vld [vmem:[#allocation5 + $0xc00] ss:$24 sps:$4 sm:$0xff]  }
  0x6b   : > { %5114 = vmatprep.subr.bf16.mxu0 %v7333_v1  ;;  %4951 = vmatpush1.bf16.msra.mxu1 %v7335_v2  ;;  %v7339_v5 = vld [vmem:[#allocation5 + $0xc34] ss:$24 sps:$4 sm:$0xff]   ;;  %v7341_v6 = vld [vmem:[#allocation5 + $0x30] ss:$24 sps:$4 sm:$0xff]   ;;  %v7343_v8 = vld [vmem:[#allocation5 + $0x64] ss:$24 sps:$4 sm:$0xff]  }
  0x6c   : > { %5115 = vmatpush1.bf16.msra.mxu0 %v7336_v3  ;;  %4952 = vmatprep.subr.bf16.mxu1 %v7337_v4  ;;  %v7342_v7 = vld [vmem:[#allocation5 + $0xc30] ss:$24 sps:$4 sm:$0xff]   ;;  %v7345_v9 = vld [vmem:[#allocation5 + $0xc64] ss:$24 sps:$4 sm:$0xff]   ;;  %v7347_v10 = vld [vmem:[#allocation5 + $0x60] ss:$24 sps:$4 sm:$0xff]  }
  0x6d   : > { %5116 = vmatprep.subr.bf16.mxu0 %v7339_v5  ;;  %v7348_v11 = vld [vmem:[#allocation5 + $0xc60] ss:$24 sps:$4 sm:$0xff]   ;;  %v7349_v12 = vld [vmem:[#allocation5 + $0x94] ss:$24 sps:$4 sm:$0xff]   ;;  %v7353_v14 = vld [vmem:[#allocation5 + $0x90] ss:$24 sps:$4 sm:$0xff]  }
  0x6e   : > { %v7351_v13 = vld [vmem:[#allocation5 + $0xc94] ss:$24 sps:$4 sm:$0xff]   ;;  %v7354_v15 = vld [vmem:[#allocation5 + $0xc90] ss:$24 sps:$4 sm:$0xff]   ;;  %v7355_v16 = vld [vmem:[#allocation5 + $0xc4] ss:$24 sps:$4 sm:$0xff]  }
  0x6f   : > { %4953 = vmatpush1.bf16.msra.mxu1 %v7341_v6  ;;  %v7357_v17 = vld [vmem:[#allocation5 + $0xcc4] ss:$24 sps:$4 sm:$0xff]   ;;  %v7359_v18 = vld [vmem:[#allocation5 + $0xc0] ss:$24 sps:$4 sm:$0xff]   ;;  %v7361_v20 = vld [vmem:[#allocation5 + $0xf4] ss:$24 sps:$4 sm:$0xff]  }
  0x70   : > { %5117 = vmatpush1.bf16.msra.mxu0 %v7342_v7  ;;  %4954 = vmatprep.subr.bf16.mxu1 %v7343_v8  ;;  %v7360_v19 = vld [vmem:[#allocation5 + $0xcc0] ss:$24 sps:$4 sm:$0xff]   ;;  %v7363_v21 = vld [vmem:[#allocation5 + $0xcf4] ss:$24 sps:$4 sm:$0xff]   ;;  %v7365_v22 = vld [vmem:[#allocation5 + $0xf0] ss:$24 sps:$4 sm:$0xff]  }
  0x71   : > { %5118 = vmatprep.subr.bf16.mxu0 %v7345_v9  ;;  %v7366_v23 = vld [vmem:[#allocation5 + $0xcf0] ss:$24 sps:$4 sm:$0xff]   ;;  %v7367_v24 = vld [vmem:[#allocation5 + $0x124] ss:$24 sps:$4 sm:$0xff]   ;;  %v7371_v26 = vld [vmem:[#allocation5 + $0x120] ss:$24 sps:$4 sm:$0xff]  }
  0x72   : > { %v7369_v25 = vld [vmem:[#allocation5 + $0xd24] ss:$24 sps:$4 sm:$0xff]   ;;  %v7372_v27 = vld [vmem:[#allocation5 + $0xd20] ss:$24 sps:$4 sm:$0xff]   ;;  %v7373_v28 = vld [vmem:[#allocation5 + $0x154] ss:$24 sps:$4 sm:$0xff]  }
  0x73   : > { %4955 = vmatpush1.bf16.msra.mxu1 %v7347_v10  ;;  %v7375_v29 = vld [vmem:[#allocation5 + $0xd54] ss:$24 sps:$4 sm:$0xff]   ;;  %v7377_v30 = vld [vmem:[#allocation5 + $0x150] ss:$24 sps:$4 sm:$0xff]   ;;  %v7379_v32 = vld [vmem:[#allocation5 + $0x184] ss:$24 sps:$4 sm:$0xff]  }
  0x74   : > { %5119 = vmatpush1.bf16.msra.mxu0 %v7348_v11  ;;  %4956 = vmatprep.subr.bf16.mxu1 %v7349_v12  ;;  %v7378_v31 = vld [vmem:[#allocation5 + $0xd50] ss:$24 sps:$4 sm:$0xff]   ;;  %v7381_v33 = vld [vmem:[#allocation5 + $0xd84] ss:$24 sps:$4 sm:$0xff]   ;;  %v7383_v34 = vld [vmem:[#allocation5 + $0x180] ss:$24 sps:$4 sm:$0xff]  }
  0x75   : > { %5120 = vmatprep.subr.bf16.mxu0 %v7351_v13  ;;  %v7384_v35 = vld [vmem:[#allocation5 + $0xd80] ss:$24 sps:$4 sm:$0xff]   ;;  %v7385_v36 = vld [vmem:[#allocation5 + $0x1b4] ss:$24 sps:$4 sm:$0xff]   ;;  %v7389_v38 = vld [vmem:[#allocation5 + $0x1b0] ss:$24 sps:$4 sm:$0xff]  }
  0x76   : > { %v7387_v37 = vld [vmem:[#allocation5 + $0xdb4] ss:$24 sps:$4 sm:$0xff]   ;;  %v7390_v39 = vld [vmem:[#allocation5 + $0xdb0] ss:$24 sps:$4 sm:$0xff]   ;;  %v7391_v40 = vld [vmem:[#allocation5 + $0x1e4] ss:$24 sps:$4 sm:$0xff]  }
  0x77   : > { %4957 = vmatpush1.bf16.msra.mxu1 %v7353_v14  ;;  %v7393_v41 = vld [vmem:[#allocation5 + $0xde4] ss:$24 sps:$4 sm:$0xff]   ;;  %v7395_v42 = vld [vmem:[#allocation5 + $0x1e0] ss:$24 sps:$4 sm:$0xff]   ;;  %v7397_v44 = vld [vmem:[#allocation5 + $0x214] ss:$24 sps:$4 sm:$0xff]  }
  0x78   : > { %5121 = vmatpush1.bf16.msra.mxu0 %v7354_v15  ;;  %4958 = vmatprep.subr.bf16.mxu1 %v7355_v16  ;;  %v7396_v43 = vld [vmem:[#allocation5 + $0xde0] ss:$24 sps:$4 sm:$0xff]   ;;  %v7399_v45 = vld [vmem:[#allocation5 + $0xe14] ss:$24 sps:$4 sm:$0xff]   ;;  %v7401_v47 = vld [vmem:[#allocation5 + $0x210] ss:$24 sps:$4 sm:$0xff]  }
  0x79   : > { %5122 = vmatprep.subr.bf16.mxu0 %v7357_v17  ;;  %v259_v46 = vld [vmem:[%s8851_s8 + $0x8] sm:$0xff]  ;;  %v7403_v51 = vld [vmem:[#allocation5 + $0x244] ss:$24 sps:$4 sm:$0xff]   ;;  %v7407_v54 = vld [vmem:[#allocation5 + $0x240] ss:$24 sps:$4 sm:$0xff]   ;;  %p254_p11 = scmp.lt.s32.totalorder %s8699_s19, 1 }
  0x7a   : > { %v8862_v48 = vpack.c.bf16 %v259_v46, %v259_v46  ;;  %v7402_v49 = vld [vmem:[#allocation5 + $0xe10] ss:$24 sps:$4 sm:$0xff]   ;;  %v7405_v52 = vld [vmem:[#allocation5 + $0xe44] ss:$24 sps:$4 sm:$0xff]   ;;  %v7408_v55 = vld [vmem:[#allocation5 + $0xe40] ss:$24 sps:$4 sm:$0xff]  }
  0x7b   : > { %4959 = vmatpush1.bf16.msra.mxu1 %v7359_v18  ;;  %v267_v50 = vld [vmem:[%s8851_s8 + $0x48] sm:$0xff]  ;;  %v7415_v60 = vld [vmem:[#allocation5 + $0x2a4] ss:$24 sps:$4 sm:$0xff]   ;;  %v7419_v62 = vld [vmem:[#allocation5 + $0x2a0] ss:$24 sps:$4 sm:$0xff]   ;;  %s255_s21 = scalar_select %p254_p11, %s8699_s19, 1 }
  0x7c   : > { %5123 = vmatpush1.bf16.msra.mxu0 %v7360_v19  ;;  %4960 = vmatprep.subr.bf16.mxu1 %v7361_v20  ;;  %v8865_v53 = vpack.c.bf16 %v267_v50, %v267_v50  ;;  %v7409_v56 = vld [vmem:[#allocation5 + $0x274] ss:$24 sps:$4 sm:$0xff]   ;;  %v7413_v58 = vld [vmem:[#allocation5 + $0x270] ss:$24 sps:$4 sm:$0xff]   ;;  %v7417_v61 = vld [vmem:[#allocation5 + $0xea4] ss:$24 sps:$4 sm:$0xff]  }
  0x7d   : > { %5124 = vmatprep.subr.bf16.mxu0 %v7363_v21  ;;  %4982 = vmatprep.mubr.bf16.mxu1 %v8862_v48  ;;  %v7411_v57 = vld [vmem:[#allocation5 + $0xe74] ss:$24 sps:$4 sm:$0xff]   ;;  %v7414_v59 = vld [vmem:[#allocation5 + $0xe70] ss:$24 sps:$4 sm:$0xff]   ;;  %v7420_v63 = vld [vmem:[#allocation5 + $0xea0] ss:$24 sps:$4 sm:$0xff]  }
  0x7e   : > { %5146 = vmatprep.mubr.bf16.mxu0 %v8865_v53  ;;  %v7421_v0 = vld [vmem:[#allocation5 + $0x2d4] ss:$24 sps:$4 sm:$0xff]   ;;  %v7425_v2 = vld [vmem:[#allocation5 + $0x2d0] ss:$24 sps:$4 sm:$0xff]   ;;  %v7429_v4 = vld [vmem:[#allocation5 + $0x304] ss:$24 sps:$4 sm:$0xff]  }
  0x7f   : > { %4961 = vmatpush1.bf16.msra.mxu1 %v7365_v22  ;;  %v7423_v1 = vld [vmem:[#allocation5 + $0xed4] ss:$24 sps:$4 sm:$0xff]   ;;  %v7426_v3 = vld [vmem:[#allocation5 + $0xed0] ss:$24 sps:$4 sm:$0xff]   ;;  %v258_v5 = vld [vmem:[%s8851_s8] sm:$0xff]  ;;  %s6390_s23 = sshll.u32 %s255_s21, 3 }
  0x80   : > { %5125 = vmatpush1.bf16.msra.mxu0 %v7366_v23  ;;  %4962 = vmatprep.subr.bf16.mxu1 %v7367_v24  ;;  %v266_v6 = vld [vmem:[%s8851_s8 + $0x40] sm:$0xff]  ;;  %v8871_v10 = vpack.c.bf16 %v258_v5, %v258_v5  ;;  %v7435_v12 = vld [vmem:[#allocation5 + $0x334] ss:$24 sps:$4 sm:$0xff]   ;;  %v7433_v14 = vld [vmem:[#allocation5 + $0x330] ss:$24 sps:$4 sm:$0xff]   ;;  %s257_s5 = scalar_lea.vmem %s9172_s1, %s6390_s23  ;;  %s7251_s6 = smul.u32 48, %s8847_s29 }
  0x81   : > { %5126 = vmatprep.subr.bf16.mxu0 %v7369_v25  ;;  %v7432_v7 = vld [vmem:[#allocation5 + $0xf04] ss:$24 sps:$4 sm:$0xff]   ;;  %v7427_v8 = vld [vmem:[#allocation5 + $0x300] ss:$24 sps:$4 sm:$0xff]   ;;  %v8873_v11 = vpack.c.bf16 %v266_v6, %v266_v6  ;;  %v7438_v13 = vld [vmem:[#allocation5 + $0xf34] ss:$24 sps:$4 sm:$0xff]  }
  0x82   : > { %v7430_v9 = vld [vmem:[#allocation5 + $0xf00] ss:$24 sps:$4 sm:$0xff]   ;;  %v7436_v15 = vld [vmem:[#allocation5 + $0xf30] ss:$24 sps:$4 sm:$0xff]   ;;  %v7441_v16 = vld [vmem:[#allocation5 + $0x364] ss:$24 sps:$4 sm:$0xff]  }
  0x83   : > { %4963 = vmatpush1.bf16.msra.mxu1 %v7371_v26  ;;  %v7444_v17 = vld [vmem:[#allocation5 + $0xf64] ss:$24 sps:$4 sm:$0xff]   ;;  %v7439_v18 = vld [vmem:[#allocation5 + $0x360] ss:$24 sps:$4 sm:$0xff]   ;;  %v7447_v20 = vld [vmem:[#allocation5 + $0x394] ss:$24 sps:$4 sm:$0xff]  }
  0x84   : > { %5127 = vmatpush1.bf16.msra.mxu0 %v7372_v27  ;;  %4964 = vmatprep.subr.bf16.mxu1 %v7373_v28  ;;  %v7442_v19 = vld [vmem:[#allocation5 + $0xf60] ss:$24 sps:$4 sm:$0xff]   ;;  %v7450_v21 = vld [vmem:[#allocation5 + $0xf94] ss:$24 sps:$4 sm:$0xff]   ;;  %v7445_v22 = vld [vmem:[#allocation5 + $0x390] ss:$24 sps:$4 sm:$0xff]  }
  0x85   : > { %5128 = vmatprep.subr.bf16.mxu0 %v7375_v29  ;;  %v7448_v23 = vld [vmem:[#allocation5 + $0xf90] ss:$24 sps:$4 sm:$0xff]   ;;  %v7453_v24 = vld [vmem:[#allocation5 + $0x3c4] ss:$24 sps:$4 sm:$0xff]   ;;  %v7451_v26 = vld [vmem:[#allocation5 + $0x3c0] ss:$24 sps:$4 sm:$0xff]  }
  0x86   : > { %v7456_v25 = vld [vmem:[#allocation5 + $0xfc4] ss:$24 sps:$4 sm:$0xff]   ;;  %v7454_v27 = vld [vmem:[#allocation5 + $0xfc0] ss:$24 sps:$4 sm:$0xff]   ;;  %v7459_v28 = vld [vmem:[#allocation5 + $0x3f4] ss:$24 sps:$4 sm:$0xff]  }
  0x87   : > { %4965 = vmatpush1.bf16.msra.mxu1 %v7377_v30  ;;  %v7462_v29 = vld [vmem:[#allocation5 + $0xff4] ss:$24 sps:$4 sm:$0xff]   ;;  %v7457_v30 = vld [vmem:[#allocation5 + $0x3f0] ss:$24 sps:$4 sm:$0xff]   ;;  %v7475_v46 = vld [vmem:[#allocation5 + $0x480] ss:$24 sps:$4 sm:$0xff]  }
  0x88   : > { %5129 = vmatpush1.bf16.msra.mxu0 %v7378_v31  ;;  %4966 = vmatprep.subr.bf16.mxu1 %v7379_v32  ;;  %v7460_v31 = vld [vmem:[#allocation5 + $0xff0] ss:$24 sps:$4 sm:$0xff]   ;;  %v7465_v32 = vld [vmem:[#allocation5 + $0x424] ss:$24 sps:$4 sm:$0xff]   ;;  %v7486_v50 = vld [vmem:[#allocation5 + $0x10b4] ss:$24 sps:$4 sm:$0xff]  }
  0x89   : > { %5130 = vmatprep.subr.bf16.mxu0 %v7381_v33  ;;  %v7468_v33 = vld [vmem:[#allocation5 + $0x1024] ss:$24 sps:$4 sm:$0xff]   ;;  %v7508_v5 = vld [vmem:[#allocation5 + $0x1170] ss:$24 sps:$4 sm:$0xff]   ;;  %s7252_s26 = smul.u32 768, %s8699_s19  ;;  %s253_s10 = scalar_lea.vmem [#allocation8], %s7251_s6 }
  0x8a   : > { %v7513_v6 = vld [vmem:[#allocation5 + $0x5a4] ss:$24 sps:$4 sm:$0xff]   ;;  %s6277_s14 = sshll.u32 %s253_s10, 4  ;;  %s6263_s20 = scalar_lea.sflag [#allocation4], %s8847_s29  ;;  %s9129_s14 = int_to_ptr.vmem [resolvable:$true] %s6277_s14 }
  0x8b   : > { %4967 = vmatpush1.bf16.msra.mxu1 %v7383_v34  ;;  %v261_v34 = vld [vmem:[%s8851_s8 + $0x18] sm:$0xff]  ;;  %s9127_s28 = scalar_lea.hbm %s9175_s4, %s7252_s26  ;;  %s8571_s24 = scalar_lea.vmem %s9129_s14, 768 }
  0x8c   : > { %5131 = vmatpush1.bf16.msra.mxu0 %v7384_v35  ;;  %4968 = vmatprep.subr.bf16.mxu1 %v7385_v36  ;;  %v7463_v35 = vld [vmem:[#allocation5 + $0x420] ss:$24 sps:$4 sm:$0xff]   ;;  %v8878_v36 = vpack.c.bf16 %v261_v34, %v261_v34  ;;  %p8572_p0 = scmp.ne.s32.totalorder %s9129_s14, %s8571_s24  ;;  %p9189_p1 = scmp.ne.s32.totalorder %s9184_s11, 0 }
  0x8d   : > { %5132 = vmatprep.subr.bf16.mxu0 %v7387_v37  ;;  %v7466_v37 = vld [vmem:[#allocation5 + $0x1020] ss:$24 sps:$4 sm:$0xff]   ;;  %s8652_s25 = smov [#allocation8]  }
  0x8e   : > { %v7535_v34 = vld [vmem:[#allocation5 + $0x660] ss:$24 sps:$4 sm:$0xff]   ;;  %p8573_p3 = pnand %p8572_p0, %p9189_p1  ;;  %s8575_s7 = sshll.u32 %s8652_s25, 4  ;;  %s8576_s7 = int_to_ptr.vmem [resolvable:$false] %s8575_s7 }
  0x8f   : > { %4969 = vmatpush1.bf16.msra.mxu1 %v7389_v38  ;;  %v269_v38 = vld [vmem:[%s8851_s8 + $0x58] sm:$0xff]  ;;  %p8578_p9 = scmp.lt.s32.totalorder %s9129_s14, %s8576_s7 }
  0x90   : > { %5133 = vmatpush1.bf16.msra.mxu0 %v7390_v39  ;;  %4970 = vmatprep.subr.bf16.mxu1 %v7391_v40  ;;  %v7471_v39 = vld [vmem:[#allocation5 + $0x454] ss:$24 sps:$4 sm:$0xff]   ;;  %p8574_p7 = pneg %p8573_p3 }
  0x91   : > { %5134 = vmatprep.subr.bf16.mxu0 %v7393_v41  ;;  %v7474_v40 = vld [vmem:[#allocation5 + $0x1054] ss:$24 sps:$4 sm:$0xff]   ;;  %v8881_v41 = vpack.c.bf16 %v269_v38, %v269_v38 }
  0x92   : > { %v7546_v38 = vld [vmem:[#allocation5 + $0x1294] ss:$24 sps:$4 sm:$0xff]  }
  0x93   : > { %4971 = vmatpush1.bf16.msra.mxu1 %v7395_v42  ;;  %v7469_v42 = vld [vmem:[#allocation5 + $0x450] ss:$24 sps:$4 sm:$0xff]  }
  0x94   : > { %5135 = vmatpush1.bf16.msra.mxu0 %v7396_v43  ;;  %4972 = vmatprep.subr.bf16.mxu1 %v7397_v44  ;;  %v7472_v43 = vld [vmem:[#allocation5 + $0x1050] ss:$24 sps:$4 sm:$0xff]   ;;  %v7477_v44 = vld [vmem:[#allocation5 + $0x484] ss:$24 sps:$4 sm:$0xff]  }
  0x95   : > { %5136 = vmatprep.subr.bf16.mxu0 %v7399_v45  ;;  %v7480_v45 = vld [vmem:[#allocation5 + $0x1084] ss:$24 sps:$4 sm:$0xff]  }
  0x97   : > { %4973 = vmatpush1.bf16.msra.mxu1 %v7401_v47  ;;  %v7478_v47 = vld [vmem:[#allocation5 + $0x1080] ss:$24 sps:$4 sm:$0xff]  }
  0x98   : > { %5137 = vmatpush1.bf16.msra.mxu0 %v7402_v49  ;;  %4974 = vmatprep.subr.bf16.mxu1 %v7403_v51  ;;  %v7483_v49 = vld [vmem:[#allocation5 + $0x4b4] ss:$24 sps:$4 sm:$0xff]   ;;  %v7481_v51 = vld [vmem:[#allocation5 + $0x4b0] ss:$24 sps:$4 sm:$0xff]  }
  0x99   : > { %5138 = vmatprep.subr.bf16.mxu0 %v7405_v52  ;;  %v7484_v52 = vld [vmem:[#allocation5 + $0x10b0] ss:$24 sps:$4 sm:$0xff]  }
  0x9b   : > { %4975 = vmatpush1.bf16.msra.mxu1 %v7407_v54  ;;  %v7489_v54 = vld [vmem:[#allocation5 + $0x4e4] ss:$24 sps:$4 sm:$0xff]  }
  0x9c   : > { %5139 = vmatpush1.bf16.msra.mxu0 %v7408_v55  ;;  %4976 = vmatprep.subr.bf16.mxu1 %v7409_v56  ;;  %v7492_v55 = vld [vmem:[#allocation5 + $0x10e4] ss:$24 sps:$4 sm:$0xff]   ;;  %v7487_v56 = vld [vmem:[#allocation5 + $0x4e0] ss:$24 sps:$4 sm:$0xff]  }
  0x9d   : > { %5140 = vmatprep.subr.bf16.mxu0 %v7411_v57  ;;  %v7490_v57 = vld [vmem:[#allocation5 + $0x10e0] ss:$24 sps:$4 sm:$0xff]  }
  0x9f   : > { %4977 = vmatpush1.bf16.msra.mxu1 %v7413_v58  ;;  %v7495_v58 = vld [vmem:[#allocation5 + $0x514] ss:$24 sps:$4 sm:$0xff]  }
  0xa0   : > { %5141 = vmatpush1.bf16.msra.mxu0 %v7414_v59  ;;  %4978 = vmatprep.subr.bf16.mxu1 %v7415_v60  ;;  %v7498_v59 = vld [vmem:[#allocation5 + $0x1114] ss:$24 sps:$4 sm:$0xff]   ;;  %v7493_v60 = vld [vmem:[#allocation5 + $0x510] ss:$24 sps:$4 sm:$0xff]  }
  0xa1   : > { %5142 = vmatprep.subr.bf16.mxu0 %v7417_v61  ;;  %v7496_v61 = vld [vmem:[#allocation5 + $0x1110] ss:$24 sps:$4 sm:$0xff]  }
  0xa3   : > { %4979 = vmatpush1.bf16.msra.mxu1 %v7419_v62  ;;  %v7501_v62 = vld [vmem:[#allocation5 + $0x544] ss:$24 sps:$4 sm:$0xff]  }
  0xa4   : > { %5143 = vmatpush1.bf16.msra.mxu0 %v7420_v63  ;;  %4980 = vmatprep.subr.bf16.mxu1 %v7421_v0  ;;  %v7504_v63 = vld [vmem:[#allocation5 + $0x1144] ss:$24 sps:$4 sm:$0xff]   ;;  %v7499_v0 = vld [vmem:[#allocation5 + $0x540] ss:$24 sps:$4 sm:$0xff]  }
  0xa5   : > { %5144 = vmatprep.subr.bf16.mxu0 %v7423_v1  ;;  %v7502_v1 = vld [vmem:[#allocation5 + $0x1140] ss:$24 sps:$4 sm:$0xff]  }
  0xa7   : > { %4981 = vmatpush1.bf16.msra.mxu1 %v7425_v2  ;;  %v7507_v2 = vld [vmem:[#allocation5 + $0x574] ss:$24 sps:$4 sm:$0xff]  }
  0xa8   : > { %5145 = vmatpush1.bf16.msra.mxu0 %v7426_v3  ;;  %4991 = vmatprep.subr.bf16.mxu1 %v7429_v4  ;;  %v7510_v3 = vld [vmem:[#allocation5 + $0x1174] ss:$24 sps:$4 sm:$0xff]   ;;  %v7505_v4 = vld [vmem:[#allocation5 + $0x570] ss:$24 sps:$4 sm:$0xff]  }
  0xa9   : > { %5155 = vmatprep.subr.bf16.mxu0 %v7432_v7  ;;  %v7516_v7 = vld [vmem:[#allocation5 + $0x11a4] ss:$24 sps:$4 sm:$0xff]  }
  0xaa   : > { %4983 = vmatmul.mubr.bf16.vlgmr.msra.gmra.mrb[0].mxu1 %v8871_v10 }
  0xab   : > { %5147 = vmatmul.mubr.bf16.vlgmr.msra.gmra.mrb[0].mxu0 %v8873_v11  ;;  %4992 = vmatpush1.bf16.msra.mxu1 %v7427_v8  ;;  %v7511_v8 = vld [vmem:[#allocation5 + $0x5a0] ss:$24 sps:$4 sm:$0xff]  }
  0xac   : > { %5156 = vmatpush1.bf16.msra.mxu0 %v7430_v9  ;;  %4993 = vmatprep.subr.bf16.mxu1 %v7435_v12  ;;  %v7514_v9 = vld [vmem:[#allocation5 + $0x11a0] ss:$24 sps:$4 sm:$0xff]   ;;  %v7519_v12 = vld [vmem:[#allocation5 + $0x5d4] ss:$24 sps:$4 sm:$0xff]  }
  0xad   : > { %5157 = vmatprep.subr.bf16.mxu0 %v7438_v13  ;;  %5023 = vmatprep.mubr.bf16.mxu1 %v8878_v36  ;;  %v7522_v13 = vld [vmem:[#allocation5 + $0x11d4] ss:$24 sps:$4 sm:$0xff]  }
  0xae   : > { %5187 = vmatprep.mubr.bf16.mxu0 %v8881_v41 }
  0xaf   : > { %4994 = vmatpush1.bf16.msra.mxu1 %v7433_v14  ;;  %v7517_v14 = vld [vmem:[#allocation5 + $0x5d0] ss:$24 sps:$4 sm:$0xff]  }
  0xb0   : > { %5158 = vmatpush1.bf16.msra.mxu0 %v7436_v15  ;;  %4995 = vmatprep.subr.bf16.mxu1 %v7441_v16  ;;  %v7520_v15 = vld [vmem:[#allocation5 + $0x11d0] ss:$24 sps:$4 sm:$0xff]   ;;  %v7525_v16 = vld [vmem:[#allocation5 + $0x604] ss:$24 sps:$4 sm:$0xff]  }
  0xb1   : > { %5159 = vmatprep.subr.bf16.mxu0 %v7444_v17  ;;  %v260_v17 = vld [vmem:[%s8851_s8 + $0x10] sm:$0xff] }
  0xb3   : > { %4996 = vmatpush1.bf16.msra.mxu1 %v7439_v18  ;;  %v268_v18 = vld [vmem:[%s8851_s8 + $0x50] sm:$0xff] }
  0xb4   : > { %5160 = vmatpush1.bf16.msra.mxu0 %v7442_v19  ;;  %4997 = vmatprep.subr.bf16.mxu1 %v7447_v20  ;;  %v7528_v19 = vld [vmem:[#allocation5 + $0x1204] ss:$24 sps:$4 sm:$0xff]   ;;  %v7523_v20 = vld [vmem:[#allocation5 + $0x600] ss:$24 sps:$4 sm:$0xff]  }
  0xb5   : > { %5161 = vmatprep.subr.bf16.mxu0 %v7450_v21  ;;  %v7526_v21 = vld [vmem:[#allocation5 + $0x1200] ss:$24 sps:$4 sm:$0xff]  }
  0xb7   : > { %4998 = vmatpush1.bf16.msra.mxu1 %v7445_v22  ;;  %v8887_v22 = vpack.c.bf16 %v260_v17, %v260_v17  ;;  %v7598_v17 = vld [vmem:[#allocation5 + $0x1440] ss:$24 sps:$4 sm:$0xff]  }
  0xb8   : > { %5162 = vmatpush1.bf16.msra.mxu0 %v7448_v23  ;;  %4999 = vmatprep.subr.bf16.mxu1 %v7453_v24  ;;  %v8889_v23 = vpack.c.bf16 %v268_v18, %v268_v18  ;;  %v7531_v24 = vld [vmem:[#allocation5 + $0x634] ss:$24 sps:$4 sm:$0xff]  }
  0xb9   : > { %5163 = vmatprep.subr.bf16.mxu0 %v7456_v25  ;;  %v7534_v25 = vld [vmem:[#allocation5 + $0x1234] ss:$24 sps:$4 sm:$0xff]  }
  0xba   : > { %v7603_v18 = vld [vmem:[#allocation5 + $0x874] ss:$24 sps:$4 sm:$0xff]  }
  0xbb   : > { %5000 = vmatpush1.bf16.msra.mxu1 %v7451_v26  ;;  %v263_v26 = vld [vmem:[%s8851_s8 + $0x28] sm:$0xff] }
  0xbc   : > { %5164 = vmatpush1.bf16.msra.mxu0 %v7454_v27  ;;  %5001 = vmatprep.subr.bf16.mxu1 %v7459_v28  ;;  %v7529_v27 = vld [vmem:[#allocation5 + $0x630] ss:$24 sps:$4 sm:$0xff]   ;;  %v8894_v28 = vpack.c.bf16 %v263_v26, %v263_v26  ;;  %v7607_v26 = vld [vmem:[#allocation5 + $0x8a0] ss:$24 sps:$4 sm:$0xff]  }
  0xbd   : > { %5165 = vmatprep.subr.bf16.mxu0 %v7462_v29  ;;  %v7532_v29 = vld [vmem:[#allocation5 + $0x1230] ss:$24 sps:$4 sm:$0xff]  }
  0xbf   : > { %5002 = vmatpush1.bf16.msra.mxu1 %v7457_v30  ;;  %v271_v30 = vld [vmem:[%s8851_s8 + $0x68] sm:$0xff] }
  0xc0   : > { %5166 = vmatpush1.bf16.msra.mxu0 %v7460_v31  ;;  %5003 = vmatprep.subr.bf16.mxu1 %v7465_v32  ;;  %v7537_v31 = vld [vmem:[#allocation5 + $0x664] ss:$24 sps:$4 sm:$0xff]  }
  0xc1   : > { %5167 = vmatprep.subr.bf16.mxu0 %v7468_v33  ;;  %v7540_v32 = vld [vmem:[#allocation5 + $0x1264] ss:$24 sps:$4 sm:$0xff]   ;;  %v8897_v33 = vpack.c.bf16 %v271_v30, %v271_v30  ;;  %v7618_v30 = vld [vmem:[#allocation5 + $0x14d4] ss:$24 sps:$4 sm:$0xff]  }
  0xc3   : > { %5004 = vmatpush1.bf16.msra.mxu1 %v7463_v35  ;;  %v7538_v35 = vld [vmem:[#allocation5 + $0x1260] ss:$24 sps:$4 sm:$0xff]  }
  0xc4   : > { %5168 = vmatpush1.bf16.msra.mxu0 %v7466_v37  ;;  %5005 = vmatprep.subr.bf16.mxu1 %v7471_v39  ;;  %v7543_v37 = vld [vmem:[#allocation5 + $0x694] ss:$24 sps:$4 sm:$0xff]   ;;  %v7541_v39 = vld [vmem:[#allocation5 + $0x690] ss:$24 sps:$4 sm:$0xff]  }
  0xc5   : > { %5169 = vmatprep.subr.bf16.mxu0 %v7474_v40  ;;  %v7544_v40 = vld [vmem:[#allocation5 + $0x1290] ss:$24 sps:$4 sm:$0xff]  }
  0xc7   : > { %5006 = vmatpush1.bf16.msra.mxu1 %v7469_v42  ;;  %v7549_v42 = vld [vmem:[#allocation5 + $0x6c4] ss:$24 sps:$4 sm:$0xff]  }
  0xc8   : > { %5170 = vmatpush1.bf16.msra.mxu0 %v7472_v43  ;;  %5007 = vmatprep.subr.bf16.mxu1 %v7477_v44  ;;  %v7552_v43 = vld [vmem:[#allocation5 + $0x12c4] ss:$24 sps:$4 sm:$0xff]   ;;  %v7547_v44 = vld [vmem:[#allocation5 + $0x6c0] ss:$24 sps:$4 sm:$0xff]  }
  0xc9   : > { %5171 = vmatprep.subr.bf16.mxu0 %v7480_v45  ;;  %v7550_v45 = vld [vmem:[#allocation5 + $0x12c0] ss:$24 sps:$4 sm:$0xff]  }
  0xcb   : > { %5008 = vmatpush1.bf16.msra.mxu1 %v7475_v46  ;;  %v7555_v46 = vld [vmem:[#allocation5 + $0x6f4] ss:$24 sps:$4 sm:$0xff]  }
  0xcc   : > { %5172 = vmatpush1.bf16.msra.mxu0 %v7478_v47  ;;  %5009 = vmatprep.subr.bf16.mxu1 %v7483_v49  ;;  %v7558_v47 = vld [vmem:[#allocation5 + $0x12f4] ss:$24 sps:$4 sm:$0xff]   ;;  %v7553_v49 = vld [vmem:[#allocation5 + $0x6f0] ss:$24 sps:$4 sm:$0xff]  }
  0xcd   : > { %5173 = vmatprep.subr.bf16.mxu0 %v7486_v50  ;;  %v7556_v50 = vld [vmem:[#allocation5 + $0x12f0] ss:$24 sps:$4 sm:$0xff]  }
  0xcf   : > { %5010 = vmatpush1.bf16.msra.mxu1 %v7481_v51  ;;  %v7561_v51 = vld [vmem:[#allocation5 + $0x724] ss:$24 sps:$4 sm:$0xff]  }
  0xd0   : > { %5174 = vmatpush1.bf16.msra.mxu0 %v7484_v52  ;;  %5011 = vmatprep.subr.bf16.mxu1 %v7489_v54  ;;  %v7564_v52 = vld [vmem:[#allocation5 + $0x1324] ss:$24 sps:$4 sm:$0xff]   ;;  %v7559_v54 = vld [vmem:[#allocation5 + $0x720] ss:$24 sps:$4 sm:$0xff]  }
  0xd1   : > { %5175 = vmatprep.subr.bf16.mxu0 %v7492_v55  ;;  %v7562_v55 = vld [vmem:[#allocation5 + $0x1320] ss:$24 sps:$4 sm:$0xff]  }
  0xd3   : > { %5012 = vmatpush1.bf16.msra.mxu1 %v7487_v56  ;;  %v7567_v56 = vld [vmem:[#allocation5 + $0x754] ss:$24 sps:$4 sm:$0xff]  }
  0xd4   : > { %5176 = vmatpush1.bf16.msra.mxu0 %v7490_v57  ;;  %5013 = vmatprep.subr.bf16.mxu1 %v7495_v58  ;;  %v7570_v57 = vld [vmem:[#allocation5 + $0x1354] ss:$24 sps:$4 sm:$0xff]   ;;  %v7565_v58 = vld [vmem:[#allocation5 + $0x750] ss:$24 sps:$4 sm:$0xff]  }
  0xd5   : > { %5177 = vmatprep.subr.bf16.mxu0 %v7498_v59  ;;  %v7568_v59 = vld [vmem:[#allocation5 + $0x1350] ss:$24 sps:$4 sm:$0xff]  }
  0xd7   : > { %5014 = vmatpush1.bf16.msra.mxu1 %v7493_v60  ;;  %v7573_v60 = vld [vmem:[#allocation5 + $0x784] ss:$24 sps:$4 sm:$0xff]  }
  0xd8   : > { %5178 = vmatpush1.bf16.msra.mxu0 %v7496_v61  ;;  %5015 = vmatprep.subr.bf16.mxu1 %v7501_v62  ;;  %v7576_v61 = vld [vmem:[#allocation5 + $0x1384] ss:$24 sps:$4 sm:$0xff]   ;;  %v7571_v62 = vld [vmem:[#allocation5 + $0x780] ss:$24 sps:$4 sm:$0xff]  }
  0xd9   : > { %5179 = vmatprep.subr.bf16.mxu0 %v7504_v63  ;;  %v7574_v63 = vld [vmem:[#allocation5 + $0x1380] ss:$24 sps:$4 sm:$0xff]  }
  0xdb   : > { %5016 = vmatpush1.bf16.msra.mxu1 %v7499_v0  ;;  %v7579_v0 = vld [vmem:[#allocation5 + $0x7b4] ss:$24 sps:$4 sm:$0xff]  }
  0xdc   : > { %5180 = vmatpush1.bf16.msra.mxu0 %v7502_v1  ;;  %5017 = vmatprep.subr.bf16.mxu1 %v7507_v2  ;;  %v7582_v1 = vld [vmem:[#allocation5 + $0x13b4] ss:$24 sps:$4 sm:$0xff]   ;;  %v7577_v2 = vld [vmem:[#allocation5 + $0x7b0] ss:$24 sps:$4 sm:$0xff]  }
  0xdd   : > { %5181 = vmatprep.subr.bf16.mxu0 %v7510_v3  ;;  %v7580_v3 = vld [vmem:[#allocation5 + $0x13b0] ss:$24 sps:$4 sm:$0xff]  }
  0xdf   : > { %5018 = vmatpush1.bf16.msra.mxu1 %v7505_v4  ;;  %v7585_v4 = vld [vmem:[#allocation5 + $0x7e4] ss:$24 sps:$4 sm:$0xff]  }
  0xe0   : > { %5182 = vmatpush1.bf16.msra.mxu0 %v7508_v5  ;;  %5019 = vmatprep.subr.bf16.mxu1 %v7513_v6  ;;  %v7588_v5 = vld [vmem:[#allocation5 + $0x13e4] ss:$24 sps:$4 sm:$0xff]   ;;  %v7583_v6 = vld [vmem:[#allocation5 + $0x7e0] ss:$24 sps:$4 sm:$0xff]  }
  0xe1   : > { %5183 = vmatprep.subr.bf16.mxu0 %v7516_v7  ;;  %v7586_v7 = vld [vmem:[#allocation5 + $0x13e0] ss:$24 sps:$4 sm:$0xff]  }
  0xe3   : > { %5020 = vmatpush1.bf16.msra.mxu1 %v7511_v8  ;;  %v7591_v8 = vld [vmem:[#allocation5 + $0x814] ss:$24 sps:$4 sm:$0xff]  }
  0xe4   : > { %5184 = vmatpush1.bf16.msra.mxu0 %v7514_v9  ;;  %5021 = vmatprep.subr.bf16.mxu1 %v7519_v12  ;;  %v7594_v9 = vld [vmem:[#allocation5 + $0x1414] ss:$24 sps:$4 sm:$0xff]   ;;  %v7589_v12 = vld [vmem:[#allocation5 + $0x810] ss:$24 sps:$4 sm:$0xff]  }
  0xe5   : > { %5185 = vmatprep.subr.bf16.mxu0 %v7522_v13  ;;  %v7592_v13 = vld [vmem:[#allocation5 + $0x1410] ss:$24 sps:$4 sm:$0xff]  }
  0xe7   : > { %5022 = vmatpush1.bf16.msra.mxu1 %v7517_v14  ;;  %v7597_v14 = vld [vmem:[#allocation5 + $0x844] ss:$24 sps:$4 sm:$0xff]  }
  0xe8   : > { %5186 = vmatpush1.bf16.msra.mxu0 %v7520_v15  ;;  %5032 = vmatprep.subr.bf16.mxu1 %v7525_v16  ;;  %v7600_v15 = vld [vmem:[#allocation5 + $0x1444] ss:$24 sps:$4 sm:$0xff]   ;;  %v7595_v16 = vld [vmem:[#allocation5 + $0x840] ss:$24 sps:$4 sm:$0xff]  }
  0xe9   : > { %5196 = vmatprep.subr.bf16.mxu0 %v7528_v19  ;;  %v7606_v19 = vld [vmem:[#allocation5 + $0x1474] ss:$24 sps:$4 sm:$0xff]  }
  0xea   : > { %5024 = vmatmul.mubr.bf16.vlgmr.msra.gmra.mrb[0].mxu1 %v8887_v22 }
  0xeb   : > { %5188 = vmatmul.mubr.bf16.vlgmr.msra.gmra.mrb[0].mxu0 %v8889_v23  ;;  %5033 = vmatpush1.bf16.msra.mxu1 %v7523_v20  ;;  %v7601_v20 = vld [vmem:[#allocation5 + $0x870] ss:$24 sps:$4 sm:$0xff]  }
  0xec   : > { %5197 = vmatpush1.bf16.msra.mxu0 %v7526_v21  ;;  %5034 = vmatprep.subr.bf16.mxu1 %v7531_v24  ;;  %v7604_v21 = vld [vmem:[#allocation5 + $0x1470] ss:$24 sps:$4 sm:$0xff]   ;;  %v7609_v24 = vld [vmem:[#allocation5 + $0x8a4] ss:$24 sps:$4 sm:$0xff]  }
  0xed   : > { %5198 = vmatprep.subr.bf16.mxu0 %v7534_v25  ;;  %5064 = vmatprep.mubr.bf16.mxu1 %v8894_v28  ;;  %v7612_v25 = vld [vmem:[#allocation5 + $0x14a4] ss:$24 sps:$4 sm:$0xff]  }
  0xee   : > { %5228 = vmatprep.mubr.bf16.mxu0 %v8897_v33 }
  0xef   : > { %5035 = vmatpush1.bf16.msra.mxu1 %v7529_v27  ;;  %v7610_v27 = vld [vmem:[#allocation5 + $0x14a0] ss:$24 sps:$4 sm:$0xff]  }
  0xf0   : > { %5199 = vmatpush1.bf16.msra.mxu0 %v7532_v29  ;;  %5036 = vmatprep.subr.bf16.mxu1 %v7537_v31  ;;  %v7615_v29 = vld [vmem:[#allocation5 + $0x8d4] ss:$24 sps:$4 sm:$0xff]   ;;  %v7613_v31 = vld [vmem:[#allocation5 + $0x8d0] ss:$24 sps:$4 sm:$0xff]  }
  0xf1   : > { %5200 = vmatprep.subr.bf16.mxu0 %v7540_v32  ;;  %v7616_v32 = vld [vmem:[#allocation5 + $0x14d0] ss:$24 sps:$4 sm:$0xff]  }
  0xf3   : > { %5037 = vmatpush1.bf16.msra.mxu1 %v7535_v34  ;;  %v7621_v34 = vld [vmem:[#allocation5 + $0x904] ss:$24 sps:$4 sm:$0xff]  }
  0xf4   : > { %5201 = vmatpush1.bf16.msra.mxu0 %v7538_v35  ;;  %5038 = vmatprep.subr.bf16.mxu1 %v7543_v37  ;;  %v262_v35 = vld [vmem:[%s8851_s8 + $0x20] sm:$0xff] }
  0xf5   : > { %5202 = vmatprep.subr.bf16.mxu0 %v7546_v38  ;;  %v270_v37 = vld [vmem:[%s8851_s8 + $0x60] sm:$0xff] }
  0xf6   : > { %v7624_v38 = vld [vmem:[#allocation5 + $0x1504] ss:$24 sps:$4 sm:$0xff]  }
  0xf7   : > { %5039 = vmatpush1.bf16.msra.mxu1 %v7541_v39  ;;  %v7619_v39 = vld [vmem:[#allocation5 + $0x900] ss:$24 sps:$4 sm:$0xff]  }
  0xf8   : > { %5203 = vmatpush1.bf16.msra.mxu0 %v7544_v40  ;;  %5040 = vmatprep.subr.bf16.mxu1 %v7549_v42  ;;  %v7622_v40 = vld [vmem:[#allocation5 + $0x1500] ss:$24 sps:$4 sm:$0xff]   ;;  %v8903_v42 = vpack.c.bf16 %v262_v35, %v262_v35  ;;  %v7688_v35 = vld [vmem:[#allocation5 + $0x1710] ss:$24 sps:$4 sm:$0xff]  }
  0xf9   : > { %5204 = vmatprep.subr.bf16.mxu0 %v7552_v43  ;;  %v8905_v43 = vpack.c.bf16 %v270_v37, %v270_v37  ;;  %v7693_v37 = vld [vmem:[#allocation5 + $0xb44] ss:$24 sps:$4 sm:$0xff]  }
  0xfb   : > { %5041 = vmatpush1.bf16.msra.mxu1 %v7547_v44  ;;  %v265_v44 = vld [vmem:[%s8851_s8 + $0x38] sm:$0xff] }
  0xfc   : > { %5205 = vmatpush1.bf16.msra.mxu0 %v7550_v45  ;;  %5042 = vmatprep.subr.bf16.mxu1 %v7555_v46  ;;  %v273_v45 = vld [vmem:[%s8851_s8 + $0x78] sm:$0xff]  ;;  %v7627_v46 = vld [vmem:[#allocation5 + $0x934] ss:$24 sps:$4 sm:$0xff]  }
  0xfd   : > { %5206 = vmatprep.subr.bf16.mxu0 %v7558_v47  ;;  %v7630_v47 = vld [vmem:[#allocation5 + $0x1534] ss:$24 sps:$4 sm:$0xff]  }
  0xff   : > { %5043 = vmatpush1.bf16.msra.mxu1 %v7553_v49  ;;  %v8909_v49 = vpack.c.bf16 %v265_v44, %v265_v44  ;;  %v7699_v44 = vld [vmem:[#allocation5 + $0xb74] ss:$24 sps:$4 sm:$0xff]  }
 0x100   : > { %5207 = vmatpush1.bf16.msra.mxu0 %v7556_v50  ;;  %5044 = vmatprep.subr.bf16.mxu1 %v7561_v51  ;;  %v8911_v50 = vpack.c.bf16 %v273_v45, %v273_v45  ;;  %v7625_v51 = vld [vmem:[#allocation5 + $0x930] ss:$24 sps:$4 sm:$0xff]   ;;  %v7702_v45 = vld [vmem:[#allocation5 + $0x1774] ss:$24 sps:$4 sm:$0xff]  }
 0x101   : > { %5208 = vmatprep.subr.bf16.mxu0 %v7564_v52  ;;  %v7628_v52 = vld [vmem:[#allocation5 + $0x1530] ss:$24 sps:$4 sm:$0xff]  }
 0x103   : > { %5045 = vmatpush1.bf16.msra.mxu1 %v7559_v54  ;;  %v7633_v54 = vld [vmem:[#allocation5 + $0x964] ss:$24 sps:$4 sm:$0xff]  }
 0x104   : > { %5209 = vmatpush1.bf16.msra.mxu0 %v7562_v55  ;;  %5046 = vmatprep.subr.bf16.mxu1 %v7567_v56  ;;  %v7636_v55 = vld [vmem:[#allocation5 + $0x1564] ss:$24 sps:$4 sm:$0xff]   ;;  %v7631_v56 = vld [vmem:[#allocation5 + $0x960] ss:$24 sps:$4 sm:$0xff]  }
 0x105   : > { %5210 = vmatprep.subr.bf16.mxu0 %v7570_v57  ;;  %v7634_v57 = vld [vmem:[#allocation5 + $0x1560] ss:$24 sps:$4 sm:$0xff]  }
 0x107   : > { %5047 = vmatpush1.bf16.msra.mxu1 %v7565_v58  ;;  %v7639_v58 = vld [vmem:[#allocation5 + $0x994] ss:$24 sps:$4 sm:$0xff]  }
 0x108   : > { %5211 = vmatpush1.bf16.msra.mxu0 %v7568_v59  ;;  %5048 = vmatprep.subr.bf16.mxu1 %v7573_v60  ;;  %v7642_v59 = vld [vmem:[#allocation5 + $0x1594] ss:$24 sps:$4 sm:$0xff]   ;;  %v7637_v60 = vld [vmem:[#allocation5 + $0x990] ss:$24 sps:$4 sm:$0xff]  }
 0x109   : > { %5212 = vmatprep.subr.bf16.mxu0 %v7576_v61  ;;  %v7640_v61 = vld [vmem:[#allocation5 + $0x1590] ss:$24 sps:$4 sm:$0xff]  }
 0x10b   : > { %5049 = vmatpush1.bf16.msra.mxu1 %v7571_v62  ;;  %v7645_v62 = vld [vmem:[#allocation5 + $0x9c4] ss:$24 sps:$4 sm:$0xff]  }
 0x10c   : > { %5213 = vmatpush1.bf16.msra.mxu0 %v7574_v63  ;;  %5050 = vmatprep.subr.bf16.mxu1 %v7579_v0  ;;  %v7648_v63 = vld [vmem:[#allocation5 + $0x15c4] ss:$24 sps:$4 sm:$0xff]   ;;  %v7643_v0 = vld [vmem:[#allocation5 + $0x9c0] ss:$24 sps:$4 sm:$0xff]  }
 0x10d   : > { %5214 = vmatprep.subr.bf16.mxu0 %v7582_v1  ;;  %v7646_v1 = vld [vmem:[#allocation5 + $0x15c0] ss:$24 sps:$4 sm:$0xff]  }
 0x10f   : > { %5051 = vmatpush1.bf16.msra.mxu1 %v7577_v2  ;;  %v7651_v2 = vld [vmem:[#allocation5 + $0x9f4] ss:$24 sps:$4 sm:$0xff]  }
 0x110   : > { %5215 = vmatpush1.bf16.msra.mxu0 %v7580_v3  ;;  %5052 = vmatprep.subr.bf16.mxu1 %v7585_v4  ;;  %v7654_v3 = vld [vmem:[#allocation5 + $0x15f4] ss:$24 sps:$4 sm:$0xff]   ;;  %v7649_v4 = vld [vmem:[#allocation5 + $0x9f0] ss:$24 sps:$4 sm:$0xff]  }
 0x111   : > { %5216 = vmatprep.subr.bf16.mxu0 %v7588_v5  ;;  %v7652_v5 = vld [vmem:[#allocation5 + $0x15f0] ss:$24 sps:$4 sm:$0xff]  }
 0x113   : > { %5053 = vmatpush1.bf16.msra.mxu1 %v7583_v6  ;;  %v7657_v6 = vld [vmem:[#allocation5 + $0xa24] ss:$24 sps:$4 sm:$0xff]  }
 0x114   : > { %5217 = vmatpush1.bf16.msra.mxu0 %v7586_v7  ;;  %5054 = vmatprep.subr.bf16.mxu1 %v7591_v8  ;;  %v7660_v7 = vld [vmem:[#allocation5 + $0x1624] ss:$24 sps:$4 sm:$0xff]   ;;  %v7655_v8 = vld [vmem:[#allocation5 + $0xa20] ss:$24 sps:$4 sm:$0xff]  }
 0x115   : > { %5218 = vmatprep.subr.bf16.mxu0 %v7594_v9  ;;  %v7658_v9 = vld [vmem:[#allocation5 + $0x1620] ss:$24 sps:$4 sm:$0xff]  }
 0x117   : > { %5055 = vmatpush1.bf16.msra.mxu1 %v7589_v12  ;;  %v7663_v12 = vld [vmem:[#allocation5 + $0xa54] ss:$24 sps:$4 sm:$0xff]  }
 0x118   : > { %5219 = vmatpush1.bf16.msra.mxu0 %v7592_v13  ;;  %5056 = vmatprep.subr.bf16.mxu1 %v7597_v14  ;;  %v7666_v13 = vld [vmem:[#allocation5 + $0x1654] ss:$24 sps:$4 sm:$0xff]   ;;  %v7661_v14 = vld [vmem:[#allocation5 + $0xa50] ss:$24 sps:$4 sm:$0xff]  }
 0x119   : > { %5220 = vmatprep.subr.bf16.mxu0 %v7600_v15  ;;  %v7664_v15 = vld [vmem:[#allocation5 + $0x1650] ss:$24 sps:$4 sm:$0xff]  }
 0x11b   : > { %5057 = vmatpush1.bf16.msra.mxu1 %v7595_v16  ;;  %v7669_v16 = vld [vmem:[#allocation5 + $0xa84] ss:$24 sps:$4 sm:$0xff]  }
 0x11c   : > { %5221 = vmatpush1.bf16.msra.mxu0 %v7598_v17  ;;  %5058 = vmatprep.subr.bf16.mxu1 %v7603_v18  ;;  %v7672_v17 = vld [vmem:[#allocation5 + $0x1684] ss:$24 sps:$4 sm:$0xff]   ;;  %v7667_v18 = vld [vmem:[#allocation5 + $0xa80] ss:$24 sps:$4 sm:$0xff]  }
 0x11d   : > { %5222 = vmatprep.subr.bf16.mxu0 %v7606_v19  ;;  %v7670_v19 = vld [vmem:[#allocation5 + $0x1680] ss:$24 sps:$4 sm:$0xff]  }
 0x11f   : > { %5059 = vmatpush1.bf16.msra.mxu1 %v7601_v20  ;;  %v7675_v20 = vld [vmem:[#allocation5 + $0xab4] ss:$24 sps:$4 sm:$0xff]  }
 0x120   : > { %5223 = vmatpush1.bf16.msra.mxu0 %v7604_v21  ;;  %5060 = vmatprep.subr.bf16.mxu1 %v7609_v24  ;;  %v7678_v21 = vld [vmem:[#allocation5 + $0x16b4] ss:$24 sps:$4 sm:$0xff]   ;;  %v7673_v24 = vld [vmem:[#allocation5 + $0xab0] ss:$24 sps:$4 sm:$0xff]  }
 0x121   : > { %5224 = vmatprep.subr.bf16.mxu0 %v7612_v25  ;;  %v7676_v25 = vld [vmem:[#allocation5 + $0x16b0] ss:$24 sps:$4 sm:$0xff]  }
 0x123   : > { %5061 = vmatpush1.bf16.msra.mxu1 %v7607_v26  ;;  %v7681_v26 = vld [vmem:[#allocation5 + $0xae4] ss:$24 sps:$4 sm:$0xff]  }
 0x124   : > { %5225 = vmatpush1.bf16.msra.mxu0 %v7610_v27  ;;  %5062 = vmatprep.subr.bf16.mxu1 %v7615_v29  ;;  %v7684_v27 = vld [vmem:[#allocation5 + $0x16e4] ss:$24 sps:$4 sm:$0xff]   ;;  %v7679_v29 = vld [vmem:[#allocation5 + $0xae0] ss:$24 sps:$4 sm:$0xff]  }
 0x125   : > { %5226 = vmatprep.subr.bf16.mxu0 %v7618_v30  ;;  %v7682_v30 = vld [vmem:[#allocation5 + $0x16e0] ss:$24 sps:$4 sm:$0xff]  }
 0x127   : > { %5063 = vmatpush1.bf16.msra.mxu1 %v7613_v31  ;;  %v7687_v31 = vld [vmem:[#allocation5 + $0xb14] ss:$24 sps:$4 sm:$0xff]  }
 0x128   : > { %5227 = vmatpush1.bf16.msra.mxu0 %v7616_v32  ;;  %5073 = vmatprep.subr.bf16.mxu1 %v7621_v34  ;;  %v7690_v32 = vld [vmem:[#allocation5 + $0x1714] ss:$24 sps:$4 sm:$0xff]   ;;  %v7685_v34 = vld [vmem:[#allocation5 + $0xb10] ss:$24 sps:$4 sm:$0xff]  }
 0x129   : > { %5237 = vmatprep.subr.bf16.mxu0 %v7624_v38  ;;  %v7696_v38 = vld [vmem:[#allocation5 + $0x1744] ss:$24 sps:$4 sm:$0xff]  }
 0x12a   : > { %5065 = vmatmul.mubr.bf16.vlgmr.msra.gmra.mrb[0].mxu1 %v8903_v42 }
 0x12b   : > { %5229 = vmatmul.mubr.bf16.vlgmr.msra.gmra.mrb[0].mxu0 %v8905_v43  ;;  %5074 = vmatpush1.bf16.msra.mxu1 %v7619_v39  ;;  %v7691_v39 = vld [vmem:[#allocation5 + $0xb40] ss:$24 sps:$4 sm:$0xff]  }
 0x12c   : > { %5238 = vmatpush1.bf16.msra.mxu0 %v7622_v40  ;;  %5075 = vmatprep.subr.bf16.mxu1 %v7627_v46  ;;  %v7694_v40 = vld [vmem:[#allocation5 + $0x1740] ss:$24 sps:$4 sm:$0xff]   ;;  %v7697_v46 = vld [vmem:[#allocation5 + $0xb70] ss:$24 sps:$4 sm:$0xff]  }
 0x12d   : > { %5239 = vmatprep.subr.bf16.mxu0 %v7630_v47  ;;  %5105 = vmatprep.mubr.bf16.mxu1 %v8909_v49  ;;  %v7700_v47 = vld [vmem:[#allocation5 + $0x1770] ss:$24 sps:$4 sm:$0xff]  }
 0x12e   : > { %5269 = vmatprep.mubr.bf16.mxu0 %v8911_v50 }
 0x12f   : > { %5076 = vmatpush1.bf16.msra.mxu1 %v7625_v51  ;;  %v7705_v51 = vld [vmem:[#allocation5 + $0xba4] ss:$24 sps:$4 sm:$0xff]  }
 0x130   : > { %5240 = vmatpush1.bf16.msra.mxu0 %v7628_v52  ;;  %5077 = vmatprep.subr.bf16.mxu1 %v7633_v54  ;;  %v7708_v52 = vld [vmem:[#allocation5 + $0x17a4] ss:$24 sps:$4 sm:$0xff]   ;;  %v7703_v54 = vld [vmem:[#allocation5 + $0xba0] ss:$24 sps:$4 sm:$0xff]  }
 0x131   : > { %5241 = vmatprep.subr.bf16.mxu0 %v7636_v55  ;;  %v7706_v55 = vld [vmem:[#allocation5 + $0x17a0] ss:$24 sps:$4 sm:$0xff]  }
 0x133   : > { %5078 = vmatpush1.bf16.msra.mxu1 %v7631_v56  ;;  %v7711_v56 = vld [vmem:[#allocation5 + $0xbd4] ss:$24 sps:$4 sm:$0xff]  }
 0x134   : > { %5242 = vmatpush1.bf16.msra.mxu0 %v7634_v57  ;;  %5079 = vmatprep.subr.bf16.mxu1 %v7639_v58  ;;  %v7714_v57 = vld [vmem:[#allocation5 + $0x17d4] ss:$24 sps:$4 sm:$0xff]   ;;  %v7709_v58 = vld [vmem:[#allocation5 + $0xbd0] ss:$24 sps:$4 sm:$0xff]  }
 0x135   : > { %5243 = vmatprep.subr.bf16.mxu0 %v7642_v59  ;;  %v7712_v59 = vld [vmem:[#allocation5 + $0x17d0] ss:$24 sps:$4 sm:$0xff]  }
 0x137   : > { %5080 = vmatpush1.bf16.msra.mxu1 %v7637_v60  ;;  %v264_v60 = vld [vmem:[%s8851_s8 + $0x30] sm:$0xff] }
 0x138   : > { %5244 = vmatpush1.bf16.msra.mxu0 %v7640_v61  ;;  %5081 = vmatprep.subr.bf16.mxu1 %v7645_v62  ;;  %v272_v61 = vld [vmem:[%s8851_s8 + $0x70] sm:$0xff]  ;;  %v7717_v62 = vld [vmem:[#allocation5 + $0xc] ss:$24 sps:$4 sm:$0xff]   ;;  %s8577_s8 = scalar_lea.vmem %s8576_s7, 1536 }
 0x139   : > { %5245 = vmatprep.subr.bf16.mxu0 %v7648_v63  ;;  %v7720_v63 = vld [vmem:[#allocation5 + $0x14] ss:$24 sps:$4 sm:$0xff]   ;;  %p8579_p12 = scmp.lt.s32.totalorder %s8577_s8, %s8571_s24 }
 0x13b   : > { %5082 = vmatpush1.bf16.msra.mxu1 %v7643_v0  ;;  %v8919_v0 = vpack.c.bf16 %v264_v60, %v264_v60  ;;  %v7784_v60 = vld [vmem:[#allocation5 + $0x220] ss:$24 sps:$4 sm:$0xff]   ;;  %p8580_p2 = por %p8579_p12, %p8578_p9 }
 0x13c   : > { %5246 = vmatpush1.bf16.msra.mxu0 %v7646_v1  ;;  %5083 = vmatprep.subr.bf16.mxu1 %v7651_v2  ;;  %v8921_v1 = vpack.c.bf16 %v272_v61, %v272_v61  ;;  %v7715_v2 = vld [vmem:[#allocation5 + $0x8] ss:$24 sps:$4 sm:$0xff]   ;;  %v7789_v61 = vld [vmem:[#allocation5 + $0x24c] ss:$24 sps:$4 sm:$0xff]  }
 0x13d   : > { %5247 = vmatprep.subr.bf16.mxu0 %v7654_v3  ;;  %v7718_v3 = vld [vmem:[#allocation5 + $0x10] ss:$24 sps:$4 sm:$0xff]   ;;  %p8581_p13 = pnand %p8580_p2, %p8574_p7 }
 0x13f   : > { %5084 = vmatpush1.bf16.msra.mxu1 %v7649_v4  ;;  %v7723_v4 = vld [vmem:[#allocation5 + $0x3c] ss:$24 sps:$4 sm:$0xff]  }
 0x140   : > { %5248 = vmatpush1.bf16.msra.mxu0 %v7652_v5  ;;  %5085 = vmatprep.subr.bf16.mxu1 %v7657_v6  ;;  %v7726_v5 = vld [vmem:[#allocation5 + $0x44] ss:$24 sps:$4 sm:$0xff]   ;;  %v7721_v6 = vld [vmem:[#allocation5 + $0x38] ss:$24 sps:$4 sm:$0xff]  }
 0x141   : > { %5249 = vmatprep.subr.bf16.mxu0 %v7660_v7  ;;  %v7724_v7 = vld [vmem:[#allocation5 + $0x40] ss:$24 sps:$4 sm:$0xff]  }
 0x143   : > { %5086 = vmatpush1.bf16.msra.mxu1 %v7655_v8  ;;  %v7729_v8 = vld [vmem:[#allocation5 + $0x6c] ss:$24 sps:$4 sm:$0xff]  }
 0x144   : > { %5250 = vmatpush1.bf16.msra.mxu0 %v7658_v9  ;;  %5087 = vmatprep.subr.bf16.mxu1 %v7663_v12  ;;  %v7732_v9 = vld [vmem:[#allocation5 + $0x74] ss:$24 sps:$4 sm:$0xff]   ;;  %v7727_v12 = vld [vmem:[#allocation5 + $0x68] ss:$24 sps:$4 sm:$0xff]  }
 0x145   : > { %5251 = vmatprep.subr.bf16.mxu0 %v7666_v13  ;;  %v7730_v13 = vld [vmem:[#allocation5 + $0x70] ss:$24 sps:$4 sm:$0xff]  }
 0x147   : > { %5088 = vmatpush1.bf16.msra.mxu1 %v7661_v14  ;;  %v7735_v14 = vld [vmem:[#allocation5 + $0x9c] ss:$24 sps:$4 sm:$0xff]  }
 0x148   : > { %5252 = vmatpush1.bf16.msra.mxu0 %v7664_v15  ;;  %5089 = vmatprep.subr.bf16.mxu1 %v7669_v16  ;;  %v7738_v15 = vld [vmem:[#allocation5 + $0xa4] ss:$24 sps:$4 sm:$0xff]   ;;  %v7733_v16 = vld [vmem:[#allocation5 + $0x98] ss:$24 sps:$4 sm:$0xff]  }
 0x149   : > { %5253 = vmatprep.subr.bf16.mxu0 %v7672_v17  ;;  %v7736_v17 = vld [vmem:[#allocation5 + $0xa0] ss:$24 sps:$4 sm:$0xff]  }
 0x14b   : > { %5090 = vmatpush1.bf16.msra.mxu1 %v7667_v18  ;;  %v7741_v18 = vld [vmem:[#allocation5 + $0xcc] ss:$24 sps:$4 sm:$0xff]  }
 0x14c   : > { %5254 = vmatpush1.bf16.msra.mxu0 %v7670_v19  ;;  %5091 = vmatprep.subr.bf16.mxu1 %v7675_v20  ;;  %v7744_v19 = vld [vmem:[#allocation5 + $0xd4] ss:$24 sps:$4 sm:$0xff]   ;;  %v7739_v20 = vld [vmem:[#allocation5 + $0xc8] ss:$24 sps:$4 sm:$0xff]  }
 0x14d   : > { %5255 = vmatprep.subr.bf16.mxu0 %v7678_v21  ;;  %v7742_v21 = vld [vmem:[#allocation5 + $0xd0] ss:$24 sps:$4 sm:$0xff]  }
 0x14f   : > { %5092 = vmatpush1.bf16.msra.mxu1 %v7673_v24  ;;  %v7750_v24 = vld [vmem:[#allocation5 + $0x104] ss:$24 sps:$4 sm:$0xff]  }
 0x150   : > { %5256 = vmatpush1.bf16.msra.mxu0 %v7676_v25  ;;  %5093 = vmatprep.subr.bf16.mxu1 %v7681_v26  ;;  %v7745_v25 = vld [vmem:[#allocation5 + $0xf8] ss:$24 sps:$4 sm:$0xff]  }
 0x151   : > { %5257 = vmatprep.subr.bf16.mxu0 %v7684_v27  ;;  %v7748_v26 = vld [vmem:[#allocation5 + $0x100] ss:$24 sps:$4 sm:$0xff]   ;;  %v7753_v27 = vld [vmem:[#allocation5 + $0x12c] ss:$24 sps:$4 sm:$0xff]  }
 0x153   : > { %5094 = vmatpush1.bf16.msra.mxu1 %v7679_v29  ;;  %v7756_v29 = vld [vmem:[#allocation5 + $0x134] ss:$24 sps:$4 sm:$0xff]  }
 0x154   : > { %5258 = vmatpush1.bf16.msra.mxu0 %v7682_v30  ;;  %5095 = vmatprep.subr.bf16.mxu1 %v7687_v31  ;;  %v7751_v30 = vld [vmem:[#allocation5 + $0x128] ss:$24 sps:$4 sm:$0xff]  }
 0x155   : > { %5259 = vmatprep.subr.bf16.mxu0 %v7690_v32  ;;  %v7754_v31 = vld [vmem:[#allocation5 + $0x130] ss:$24 sps:$4 sm:$0xff]   ;;  %v7759_v32 = vld [vmem:[#allocation5 + $0x15c] ss:$24 sps:$4 sm:$0xff]  }
 0x157   : > { %5096 = vmatpush1.bf16.msra.mxu1 %v7685_v34  ;;  %v7762_v34 = vld [vmem:[#allocation5 + $0x164] ss:$24 sps:$4 sm:$0xff]  }
 0x158   : > { %5260 = vmatpush1.bf16.msra.mxu0 %v7688_v35  ;;  %5097 = vmatprep.subr.bf16.mxu1 %v7693_v37  ;;  %v7757_v35 = vld [vmem:[#allocation5 + $0x158] ss:$24 sps:$4 sm:$0xff]  }
 0x159   : > { %5261 = vmatprep.subr.bf16.mxu0 %v7696_v38  ;;  %v7760_v37 = vld [vmem:[#allocation5 + $0x160] ss:$24 sps:$4 sm:$0xff]   ;;  %v7765_v38 = vld [vmem:[#allocation5 + $0x18c] ss:$24 sps:$4 sm:$0xff]  }
 0x15b   : > { %5098 = vmatpush1.bf16.msra.mxu1 %v7691_v39  ;;  %v7768_v39 = vld [vmem:[#allocation5 + $0x194] ss:$24 sps:$4 sm:$0xff]  }
 0x15c   : > { %5262 = vmatpush1.bf16.msra.mxu0 %v7694_v40  ;;  %5099 = vmatprep.subr.bf16.mxu1 %v7699_v44  ;;  %v7763_v40 = vld [vmem:[#allocation5 + $0x188] ss:$24 sps:$4 sm:$0xff]  }
 0x15d   : > { %5263 = vmatprep.subr.bf16.mxu0 %v7702_v45  ;;  %v7766_v44 = vld [vmem:[#allocation5 + $0x190] ss:$24 sps:$4 sm:$0xff]   ;;  %v7771_v45 = vld [vmem:[#allocation5 + $0x1bc] ss:$24 sps:$4 sm:$0xff]  }
 0x15f   : > { %5100 = vmatpush1.bf16.msra.mxu1 %v7697_v46  ;;  %v7774_v46 = vld [vmem:[#allocation5 + $0x1c4] ss:$24 sps:$4 sm:$0xff]  }
 0x160   : > { %5264 = vmatpush1.bf16.msra.mxu0 %v7700_v47  ;;  %5101 = vmatprep.subr.bf16.mxu1 %v7705_v51  ;;  %v7769_v47 = vld [vmem:[#allocation5 + $0x1b8] ss:$24 sps:$4 sm:$0xff]  }
 0x161   : > { %5265 = vmatprep.subr.bf16.mxu0 %v7708_v52  ;;  %v7772_v51 = vld [vmem:[#allocation5 + $0x1c0] ss:$24 sps:$4 sm:$0xff]   ;;  %v7777_v52 = vld [vmem:[#allocation5 + $0x1ec] ss:$24 sps:$4 sm:$0xff]  }
 0x163   : > { %5102 = vmatpush1.bf16.msra.mxu1 %v7703_v54  ;;  %v7780_v54 = vld [vmem:[#allocation5 + $0x1f4] ss:$24 sps:$4 sm:$0xff]  }
 0x164   : > { %5266 = vmatpush1.bf16.msra.mxu0 %v7706_v55  ;;  %5103 = vmatprep.subr.bf16.mxu1 %v7711_v56  ;;  %v7775_v55 = vld [vmem:[#allocation5 + $0x1e8] ss:$24 sps:$4 sm:$0xff]  }
 0x165   : > { %5267 = vmatprep.subr.bf16.mxu0 %v7714_v57  ;;  %v7778_v56 = vld [vmem:[#allocation5 + $0x1f0] ss:$24 sps:$4 sm:$0xff]   ;;  %v7783_v57 = vld [vmem:[#allocation5 + $0x21c] ss:$24 sps:$4 sm:$0xff]  }
 0x167   : > { %5104 = vmatpush1.bf16.msra.mxu1 %v7709_v58  ;;  %v7786_v58 = vld [vmem:[#allocation5 + $0x224] ss:$24 sps:$4 sm:$0xff]  }
 0x168   : > { %5268 = vmatpush1.bf16.msra.mxu0 %v7712_v59  ;;  %5278 = vmatprep.subr.bf16.mxu1 %v7717_v62  ;;  %v7781_v59 = vld [vmem:[#allocation5 + $0x218] ss:$24 sps:$4 sm:$0xff]   ;;  %v7792_v62 = vld [vmem:[#allocation5 + $0x254] ss:$24 sps:$4 sm:$0xff]  }
 0x169   : > { %5606 = vmatprep.subr.bf16.mxu0 %v7720_v63  ;;  %v7787_v63 = vld [vmem:[#allocation5 + $0x248] ss:$24 sps:$4 sm:$0xff]  }
 0x16a   : > { %5106 = vmatmul.mubr.bf16.vlgmr.msra.gmra.mrb[0].mxu1 %v8919_v0 }
 0x16b   : > { %5270 = vmatmul.mubr.bf16.vlgmr.msra.gmra.mrb[0].mxu0 %v8921_v1  ;;  %5279 = vmatpush1.bf16.msra.mxu1 %v7715_v2  ;;  %v7790_v2 = vld [vmem:[#allocation5 + $0x250] ss:$24 sps:$4 sm:$0xff]  }
 0x16c   : > { %5607 = vmatpush1.bf16.msra.mxu0 %v7718_v3  ;;  %5280 = vmatprep.subr.bf16.mxu1 %v7723_v4  ;;  %v7795_v3 = vld [vmem:[#allocation5 + $0x27c] ss:$24 sps:$4 sm:$0xff]  }
 0x16d   : > { %5608 = vmatprep.subr.bf16.mxu0 %v7726_v5  ;;  %5310 = vmatprep.mubr.bf16.mxu1 %v8862_v48  ;;  %v7798_v4 = vld [vmem:[#allocation5 + $0x284] ss:$24 sps:$4 sm:$0xff]   ;;  %v7793_v5 = vld [vmem:[#allocation5 + $0x278] ss:$24 sps:$4 sm:$0xff]  }
 0x16e   : > { %5638 = vmatprep.mubr.bf16.mxu0 %v8862_v48  ;;  %v7747_v48 = vld [vmem:[#allocation5 + $0xfc] ss:$24 sps:$4 sm:$0xff]  }
 0x16f   : > { %5281 = vmatpush1.bf16.msra.mxu1 %v7721_v6  ;;  %v7796_v6 = vld [vmem:[#allocation5 + $0x280] ss:$24 sps:$4 sm:$0xff]  }
 0x170   : > { %5609 = vmatpush1.bf16.msra.mxu0 %v7724_v7  ;;  %5282 = vmatprep.subr.bf16.mxu1 %v7729_v8  ;;  %v7801_v7 = vld [vmem:[#allocation5 + $0x2ac] ss:$24 sps:$4 sm:$0xff]  }
 0x171   : > { %5610 = vmatprep.subr.bf16.mxu0 %v7732_v9  ;;  %v7804_v8 = vld [vmem:[#allocation5 + $0x2b4] ss:$24 sps:$4 sm:$0xff]   ;;  %v7799_v9 = vld [vmem:[#allocation5 + $0x2a8] ss:$24 sps:$4 sm:$0xff]  }
 0x173   : > { %5283 = vmatpush1.bf16.msra.mxu1 %v7727_v12  ;;  %v7802_v12 = vld [vmem:[#allocation5 + $0x2b0] ss:$24 sps:$4 sm:$0xff]  }
 0x174   : > { %5611 = vmatpush1.bf16.msra.mxu0 %v7730_v13  ;;  %5284 = vmatprep.subr.bf16.mxu1 %v7735_v14  ;;  %v7807_v13 = vld [vmem:[#allocation5 + $0x2dc] ss:$24 sps:$4 sm:$0xff]  }
 0x175   : > { %5612 = vmatprep.subr.bf16.mxu0 %v7738_v15  ;;  %v7810_v14 = vld [vmem:[#allocation5 + $0x2e4] ss:$24 sps:$4 sm:$0xff]   ;;  %v7805_v15 = vld [vmem:[#allocation5 + $0x2d8] ss:$24 sps:$4 sm:$0xff]  }
 0x177   : > { %5285 = vmatpush1.bf16.msra.mxu1 %v7733_v16  ;;  %v7808_v16 = vld [vmem:[#allocation5 + $0x2e0] ss:$24 sps:$4 sm:$0xff]  }
 0x178   : > { %5613 = vmatpush1.bf16.msra.mxu0 %v7736_v17  ;;  %5286 = vmatprep.subr.bf16.mxu1 %v7741_v18  ;;  %v7813_v17 = vld [vmem:[#allocation5 + $0x30c] ss:$24 sps:$4 sm:$0xff]  }
 0x179   : > { %5614 = vmatprep.subr.bf16.mxu0 %v7744_v19  ;;  %v7816_v18 = vld [vmem:[#allocation5 + $0x314] ss:$24 sps:$4 sm:$0xff]   ;;  %v7811_v19 = vld [vmem:[#allocation5 + $0x308] ss:$24 sps:$4 sm:$0xff]  }
 0x17b   : > { %5287 = vmatpush1.bf16.msra.mxu1 %v7739_v20  ;;  %v7814_v20 = vld [vmem:[#allocation5 + $0x310] ss:$24 sps:$4 sm:$0xff]  }
 0x17c   : > { %5615 = vmatpush1.bf16.msra.mxu0 %v7742_v21  ;;  %5288 = vmatprep.subr.bf16.mxu1 %v7747_v48  ;;  %v7819_v21 = vld [vmem:[#allocation5 + $0x33c] ss:$24 sps:$4 sm:$0xff]  }
 0x17d   : > { %5616 = vmatprep.subr.bf16.mxu0 %v7750_v24  ;;  %v7822_v48 = vld [vmem:[#allocation5 + $0x344] ss:$24 sps:$4 sm:$0xff]   ;;  %v7817_v24 = vld [vmem:[#allocation5 + $0x338] ss:$24 sps:$4 sm:$0xff]  }
 0x17f   : > { %5289 = vmatpush1.bf16.msra.mxu1 %v7745_v25  ;;  %v7820_v25 = vld [vmem:[#allocation5 + $0x340] ss:$24 sps:$4 sm:$0xff]  }
 0x180   : > { %5617 = vmatpush1.bf16.msra.mxu0 %v7748_v26  ;;  %5290 = vmatprep.subr.bf16.mxu1 %v7753_v27  ;;  %v7825_v26 = vld [vmem:[#allocation5 + $0x36c] ss:$24 sps:$4 sm:$0xff]  }
 0x181   : > { %5618 = vmatprep.subr.bf16.mxu0 %v7756_v29  ;;  %v7828_v27 = vld [vmem:[#allocation5 + $0x374] ss:$24 sps:$4 sm:$0xff]   ;;  %v7823_v29 = vld [vmem:[#allocation5 + $0x368] ss:$24 sps:$4 sm:$0xff]  }
 0x183   : > { %5291 = vmatpush1.bf16.msra.mxu1 %v7751_v30  ;;  %v7826_v30 = vld [vmem:[#allocation5 + $0x370] ss:$24 sps:$4 sm:$0xff]  }
 0x184   : > { %5619 = vmatpush1.bf16.msra.mxu0 %v7754_v31  ;;  %5292 = vmatprep.subr.bf16.mxu1 %v7759_v32  ;;  %v7831_v31 = vld [vmem:[#allocation5 + $0x39c] ss:$24 sps:$4 sm:$0xff]   ;;  %v7829_v32 = vld [vmem:[#allocation5 + $0x398] ss:$24 sps:$4 sm:$0xff]  }
 0x185   : > { %5620 = vmatprep.subr.bf16.mxu0 %v7762_v34  ;;  %v7832_v34 = vld [vmem:[#allocation5 + $0x3a0] ss:$24 sps:$4 sm:$0xff]  }
 0x187   : > { %5293 = vmatpush1.bf16.msra.mxu1 %v7757_v35  ;;  %v7837_v35 = vld [vmem:[#allocation5 + $0x3cc] ss:$24 sps:$4 sm:$0xff]  }
 0x188   : > { %5621 = vmatpush1.bf16.msra.mxu0 %v7760_v37  ;;  %5294 = vmatprep.subr.bf16.mxu1 %v7765_v38  ;;  %v7840_v37 = vld [vmem:[#allocation5 + $0x3d4] ss:$24 sps:$4 sm:$0xff]   ;;  %v7835_v38 = vld [vmem:[#allocation5 + $0x3c8] ss:$24 sps:$4 sm:$0xff]  }
 0x189   : > { %5622 = vmatprep.subr.bf16.mxu0 %v7768_v39  ;;  %v7843_v39 = vld [vmem:[#allocation5 + $0x3fc] ss:$24 sps:$4 sm:$0xff]  }
 0x18b   : > { %5295 = vmatpush1.bf16.msra.mxu1 %v7763_v40  ;;  %v7846_v40 = vld [vmem:[#allocation5 + $0x404] ss:$24 sps:$4 sm:$0xff]  }
 0x18c   : > { %5623 = vmatpush1.bf16.msra.mxu0 %v7766_v44  ;;  %5296 = vmatprep.subr.bf16.mxu1 %v7771_v45  ;;  %v7841_v44 = vld [vmem:[#allocation5 + $0x3f8] ss:$24 sps:$4 sm:$0xff]  }
 0x18d   : > { %5624 = vmatprep.subr.bf16.mxu0 %v7774_v46  ;;  %v7844_v45 = vld [vmem:[#allocation5 + $0x400] ss:$24 sps:$4 sm:$0xff]   ;;  %v7849_v46 = vld [vmem:[#allocation5 + $0x42c] ss:$24 sps:$4 sm:$0xff]  }
 0x18f   : > { %5297 = vmatpush1.bf16.msra.mxu1 %v7769_v47  ;;  %v7852_v47 = vld [vmem:[#allocation5 + $0x434] ss:$24 sps:$4 sm:$0xff]  }
 0x190   : > { %5625 = vmatpush1.bf16.msra.mxu0 %v7772_v51  ;;  %5298 = vmatprep.subr.bf16.mxu1 %v7777_v52  ;;  %v7847_v51 = vld [vmem:[#allocation5 + $0x428] ss:$24 sps:$4 sm:$0xff]  }
 0x191   : > { %5626 = vmatprep.subr.bf16.mxu0 %v7780_v54  ;;  %v7850_v52 = vld [vmem:[#allocation5 + $0x430] ss:$24 sps:$4 sm:$0xff]   ;;  %v7855_v54 = vld [vmem:[#allocation5 + $0x45c] ss:$24 sps:$4 sm:$0xff]  }
 0x193   : > { %5299 = vmatpush1.bf16.msra.mxu1 %v7775_v55  ;;  %v7858_v55 = vld [vmem:[#allocation5 + $0x464] ss:$24 sps:$4 sm:$0xff]  }
 0x194   : > { %5627 = vmatpush1.bf16.msra.mxu0 %v7778_v56  ;;  %5300 = vmatprep.subr.bf16.mxu1 %v7783_v57  ;;  %v7853_v56 = vld [vmem:[#allocation5 + $0x458] ss:$24 sps:$4 sm:$0xff]  }
 0x195   : > { %5628 = vmatprep.subr.bf16.mxu0 %v7786_v58  ;;  %v7856_v57 = vld [vmem:[#allocation5 + $0x460] ss:$24 sps:$4 sm:$0xff]   ;;  %v7861_v58 = vld [vmem:[#allocation5 + $0x48c] ss:$24 sps:$4 sm:$0xff]  }
 0x197   : > { %5301 = vmatpush1.bf16.msra.mxu1 %v7781_v59  ;;  %v7864_v59 = vld [vmem:[#allocation5 + $0x494] ss:$24 sps:$4 sm:$0xff]  }
 0x198   : > { %5629 = vmatpush1.bf16.msra.mxu0 %v7784_v60  ;;  %5302 = vmatprep.subr.bf16.mxu1 %v7789_v61  ;;  %v7859_v60 = vld [vmem:[#allocation5 + $0x488] ss:$24 sps:$4 sm:$0xff]  }
 0x199   : > { %5630 = vmatprep.subr.bf16.mxu0 %v7792_v62  ;;  %v7862_v61 = vld [vmem:[#allocation5 + $0x490] ss:$24 sps:$4 sm:$0xff]   ;;  %v7867_v62 = vld [vmem:[#allocation5 + $0x4bc] ss:$24 sps:$4 sm:$0xff]  }
 0x19b   : > { %5303 = vmatpush1.bf16.msra.mxu1 %v7787_v63  ;;  %v7870_v63 = vld [vmem:[#allocation5 + $0x4c4] ss:$24 sps:$4 sm:$0xff]  }
 0x19c   : > { %5631 = vmatpush1.bf16.msra.mxu0 %v7790_v2  ;;  %5304 = vmatprep.subr.bf16.mxu1 %v7795_v3  ;;  %v7865_v2 = vld [vmem:[#allocation5 + $0x4b8] ss:$24 sps:$4 sm:$0xff]  }
 0x19d   : > { %5632 = vmatprep.subr.bf16.mxu0 %v7798_v4  ;;  %v7868_v3 = vld [vmem:[#allocation5 + $0x4c0] ss:$24 sps:$4 sm:$0xff]   ;;  %v7873_v4 = vld [vmem:[#allocation5 + $0x4ec] ss:$24 sps:$4 sm:$0xff]  }
 0x19f   : > { %5305 = vmatpush1.bf16.msra.mxu1 %v7793_v5  ;;  %v7876_v5 = vld [vmem:[#allocation5 + $0x4f4] ss:$24 sps:$4 sm:$0xff]  }
 0x1a0   : > { %5633 = vmatpush1.bf16.msra.mxu0 %v7796_v6  ;;  %5306 = vmatprep.subr.bf16.mxu1 %v7801_v7  ;;  %v7871_v6 = vld [vmem:[#allocation5 + $0x4e8] ss:$24 sps:$4 sm:$0xff]  }
 0x1a1   : > { %5634 = vmatprep.subr.bf16.mxu0 %v7804_v8  ;;  %v7874_v7 = vld [vmem:[#allocation5 + $0x4f0] ss:$24 sps:$4 sm:$0xff]   ;;  %v7879_v8 = vld [vmem:[#allocation5 + $0x51c] ss:$24 sps:$4 sm:$0xff]  }
 0x1a3   : > { %5307 = vmatpush1.bf16.msra.mxu1 %v7799_v9  ;;  %v7882_v9 = vld [vmem:[#allocation5 + $0x524] ss:$24 sps:$4 sm:$0xff]  }
 0x1a4   : > { %5635 = vmatpush1.bf16.msra.mxu0 %v7802_v12  ;;  %5308 = vmatprep.subr.bf16.mxu1 %v7807_v13  ;;  %v7877_v12 = vld [vmem:[#allocation5 + $0x518] ss:$24 sps:$4 sm:$0xff]  }
 0x1a5   : > { %5636 = vmatprep.subr.bf16.mxu0 %v7810_v14  ;;  %v7880_v13 = vld [vmem:[#allocation5 + $0x520] ss:$24 sps:$4 sm:$0xff]   ;;  %v7885_v14 = vld [vmem:[#allocation5 + $0x54c] ss:$24 sps:$4 sm:$0xff]  }
 0x1a7   : > { %5309 = vmatpush1.bf16.msra.mxu1 %v7805_v15  ;;  %v7888_v15 = vld [vmem:[#allocation5 + $0x554] ss:$24 sps:$4 sm:$0xff]  }
 0x1a8   : > { %5637 = vmatpush1.bf16.msra.mxu0 %v7808_v16  ;;  %5319 = vmatprep.subr.bf16.mxu1 %v7813_v17  ;;  %v7883_v16 = vld [vmem:[#allocation5 + $0x548] ss:$24 sps:$4 sm:$0xff]  }
 0x1a9   : > { %5647 = vmatprep.subr.bf16.mxu0 %v7816_v18  ;;  %v7886_v17 = vld [vmem:[#allocation5 + $0x550] ss:$24 sps:$4 sm:$0xff]   ;;  %v7891_v18 = vld [vmem:[#allocation5 + $0x57c] ss:$24 sps:$4 sm:$0xff]  }
 0x1aa   : > { %5311 = vmatmul.mubr.bf16.vlgmr.msra.gmra.mrb[4].mxu1 %v8871_v10 }
 0x1ab   : > { %5639 = vmatmul.mubr.bf16.vlgmr.msra.gmra.mrb[4].mxu0 %v8871_v10  ;;  %5320 = vmatpush1.bf16.msra.mxu1 %v7811_v19  ;;  %v7834_v10 = vld [vmem:[#allocation5 + $0x3a4] ss:$24 sps:$4 sm:$0xff]  }
 0x1ac   : > { %5648 = vmatpush1.bf16.msra.mxu0 %v7814_v20  ;;  %5321 = vmatprep.subr.bf16.mxu1 %v7819_v21  ;;  %v7894_v19 = vld [vmem:[#allocation5 + $0x584] ss:$24 sps:$4 sm:$0xff]   ;;  %v7889_v20 = vld [vmem:[#allocation5 + $0x578] ss:$24 sps:$4 sm:$0xff]  }
 0x1ad   : > { %5649 = vmatprep.subr.bf16.mxu0 %v7822_v48  ;;  %5351 = vmatprep.mubr.bf16.mxu1 %v8878_v36  ;;  %v7892_v21 = vld [vmem:[#allocation5 + $0x580] ss:$24 sps:$4 sm:$0xff]   ;;  %v7897_v48 = vld [vmem:[#allocation5 + $0x5ac] ss:$24 sps:$4 sm:$0xff]  }
 0x1ae   : > { %5679 = vmatprep.mubr.bf16.mxu0 %v8878_v36  ;;  %v7838_v36 = vld [vmem:[#allocation5 + $0x3d0] ss:$24 sps:$4 sm:$0xff]  }
 0x1af   : > { %5322 = vmatpush1.bf16.msra.mxu1 %v7817_v24  ;;  %v7900_v24 = vld [vmem:[#allocation5 + $0x5b4] ss:$24 sps:$4 sm:$0xff]  }
 0x1b0   : > { %5650 = vmatpush1.bf16.msra.mxu0 %v7820_v25  ;;  %5323 = vmatprep.subr.bf16.mxu1 %v7825_v26  ;;  %v7895_v25 = vld [vmem:[#allocation5 + $0x5a8] ss:$24 sps:$4 sm:$0xff]  }
 0x1b1   : > { %5651 = vmatprep.subr.bf16.mxu0 %v7828_v27  ;;  %v7898_v26 = vld [vmem:[#allocation5 + $0x5b0] ss:$24 sps:$4 sm:$0xff]   ;;  %v7903_v27 = vld [vmem:[#allocation5 + $0x5dc] ss:$24 sps:$4 sm:$0xff]  }
 0x1b3   : > { %5324 = vmatpush1.bf16.msra.mxu1 %v7823_v29  ;;  %v7906_v29 = vld [vmem:[#allocation5 + $0x5e4] ss:$24 sps:$4 sm:$0xff]  }
 0x1b4   : > { %5652 = vmatpush1.bf16.msra.mxu0 %v7826_v30  ;;  %5325 = vmatprep.subr.bf16.mxu1 %v7831_v31  ;;  %v7901_v30 = vld [vmem:[#allocation5 + $0x5d8] ss:$24 sps:$4 sm:$0xff]  }
 0x1b5   : > { %5653 = vmatprep.subr.bf16.mxu0 %v7834_v10  ;;  %v7904_v31 = vld [vmem:[#allocation5 + $0x5e0] ss:$24 sps:$4 sm:$0xff]   ;;  %v7909_v10 = vld [vmem:[#allocation5 + $0x60c] ss:$24 sps:$4 sm:$0xff]  }
 0x1b7   : > { %5326 = vmatpush1.bf16.msra.mxu1 %v7829_v32  ;;  %v7912_v32 = vld [vmem:[#allocation5 + $0x614] ss:$24 sps:$4 sm:$0xff]  }
 0x1b8   : > { %5654 = vmatpush1.bf16.msra.mxu0 %v7832_v34  ;;  %5327 = vmatprep.subr.bf16.mxu1 %v7837_v35  ;;  %v7907_v34 = vld [vmem:[#allocation5 + $0x608] ss:$24 sps:$4 sm:$0xff]  }
 0x1b9   : > { %5655 = vmatprep.subr.bf16.mxu0 %v7840_v37  ;;  %v7910_v35 = vld [vmem:[#allocation5 + $0x610] ss:$24 sps:$4 sm:$0xff]   ;;  %v7915_v37 = vld [vmem:[#allocation5 + $0x63c] ss:$24 sps:$4 sm:$0xff]  }
 0x1bb   : > { %5328 = vmatpush1.bf16.msra.mxu1 %v7835_v38  ;;  %v7918_v38 = vld [vmem:[#allocation5 + $0x644] ss:$24 sps:$4 sm:$0xff]  }
 0x1bc   : > { %5656 = vmatpush1.bf16.msra.mxu0 %v7838_v36  ;;  %5329 = vmatprep.subr.bf16.mxu1 %v7843_v39  ;;  %v7913_v36 = vld [vmem:[#allocation5 + $0x638] ss:$24 sps:$4 sm:$0xff]  }
 0x1bd   : > { %5657 = vmatprep.subr.bf16.mxu0 %v7846_v40  ;;  %v7916_v39 = vld [vmem:[#allocation5 + $0x640] ss:$24 sps:$4 sm:$0xff]   ;;  %v7921_v40 = vld [vmem:[#allocation5 + $0x66c] ss:$24 sps:$4 sm:$0xff]  }
 0x1bf   : > { %5330 = vmatpush1.bf16.msra.mxu1 %v7841_v44  ;;  %v7924_v44 = vld [vmem:[#allocation5 + $0x674] ss:$24 sps:$4 sm:$0xff]  }
 0x1c0   : > { %5658 = vmatpush1.bf16.msra.mxu0 %v7844_v45  ;;  %5331 = vmatprep.subr.bf16.mxu1 %v7849_v46  ;;  %v7919_v45 = vld [vmem:[#allocation5 + $0x668] ss:$24 sps:$4 sm:$0xff]  }
 0x1c1   : > { %5659 = vmatprep.subr.bf16.mxu0 %v7852_v47  ;;  %v7922_v46 = vld [vmem:[#allocation5 + $0x670] ss:$24 sps:$4 sm:$0xff]   ;;  %v7927_v47 = vld [vmem:[#allocation5 + $0x69c] ss:$24 sps:$4 sm:$0xff]  }
 0x1c3   : > { %5332 = vmatpush1.bf16.msra.mxu1 %v7847_v51  ;;  %v7925_v51 = vld [vmem:[#allocation5 + $0x698] ss:$24 sps:$4 sm:$0xff]  }
 0x1c4   : > { %5660 = vmatpush1.bf16.msra.mxu0 %v7850_v52  ;;  %5333 = vmatprep.subr.bf16.mxu1 %v7855_v54  ;;  %v7928_v52 = vld [vmem:[#allocation5 + $0x6a0] ss:$24 sps:$4 sm:$0xff]   ;;  %v7933_v54 = vld [vmem:[#allocation5 + $0x6cc] ss:$24 sps:$4 sm:$0xff]  }
 0x1c5   : > { %5661 = vmatprep.subr.bf16.mxu0 %v7858_v55  ;;  %v7936_v55 = vld [vmem:[#allocation5 + $0x6d4] ss:$24 sps:$4 sm:$0xff]  }
 0x1c7   : > { %5334 = vmatpush1.bf16.msra.mxu1 %v7853_v56  ;;  %v7931_v56 = vld [vmem:[#allocation5 + $0x6c8] ss:$24 sps:$4 sm:$0xff]  }
 0x1c8   : > { %5662 = vmatpush1.bf16.msra.mxu0 %v7856_v57  ;;  %5335 = vmatprep.subr.bf16.mxu1 %v7861_v58  ;;  %v7939_v57 = vld [vmem:[#allocation5 + $0x6fc] ss:$24 sps:$4 sm:$0xff]  }
 0x1c9   : > { %5663 = vmatprep.subr.bf16.mxu0 %v7864_v59  ;;  %v7942_v58 = vld [vmem:[#allocation5 + $0x704] ss:$24 sps:$4 sm:$0xff]   ;;  %v7937_v59 = vld [vmem:[#allocation5 + $0x6f8] ss:$24 sps:$4 sm:$0xff]  }
 0x1cb   : > { %5336 = vmatpush1.bf16.msra.mxu1 %v7859_v60  ;;  %v7940_v60 = vld [vmem:[#allocation5 + $0x700] ss:$24 sps:$4 sm:$0xff]  }
 0x1cc   : > { %5664 = vmatpush1.bf16.msra.mxu0 %v7862_v61  ;;  %5337 = vmatprep.subr.bf16.mxu1 %v7867_v62  ;;  %v7945_v61 = vld [vmem:[#allocation5 + $0x72c] ss:$24 sps:$4 sm:$0xff]  }
 0x1cd   : > { %5665 = vmatprep.subr.bf16.mxu0 %v7870_v63  ;;  %v7948_v62 = vld [vmem:[#allocation5 + $0x734] ss:$24 sps:$4 sm:$0xff]   ;;  %v7943_v63 = vld [vmem:[#allocation5 + $0x728] ss:$24 sps:$4 sm:$0xff]  }
 0x1cf   : > { %5338 = vmatpush1.bf16.msra.mxu1 %v7865_v2  ;;  %v7946_v2 = vld [vmem:[#allocation5 + $0x730] ss:$24 sps:$4 sm:$0xff]  }
 0x1d0   : > { %5666 = vmatpush1.bf16.msra.mxu0 %v7868_v3  ;;  %5339 = vmatprep.subr.bf16.mxu1 %v7873_v4  ;;  %v7951_v3 = vld [vmem:[#allocation5 + $0x75c] ss:$24 sps:$4 sm:$0xff]  }
 0x1d1   : > { %5667 = vmatprep.subr.bf16.mxu0 %v7876_v5  ;;  %v7954_v4 = vld [vmem:[#allocation5 + $0x764] ss:$24 sps:$4 sm:$0xff]   ;;  %v7949_v5 = vld [vmem:[#allocation5 + $0x758] ss:$24 sps:$4 sm:$0xff]  }
 0x1d3   : > { %5340 = vmatpush1.bf16.msra.mxu1 %v7871_v6  ;;  %v7952_v6 = vld [vmem:[#allocation5 + $0x760] ss:$24 sps:$4 sm:$0xff]  }
 0x1d4   : > { %5668 = vmatpush1.bf16.msra.mxu0 %v7874_v7  ;;  %5341 = vmatprep.subr.bf16.mxu1 %v7879_v8  ;;  %v7957_v7 = vld [vmem:[#allocation5 + $0x78c] ss:$24 sps:$4 sm:$0xff]  }
 0x1d5   : > { %5669 = vmatprep.subr.bf16.mxu0 %v7882_v9  ;;  %v7960_v8 = vld [vmem:[#allocation5 + $0x794] ss:$24 sps:$4 sm:$0xff]   ;;  %v7955_v9 = vld [vmem:[#allocation5 + $0x788] ss:$24 sps:$4 sm:$0xff]  }
 0x1d7   : > { %5342 = vmatpush1.bf16.msra.mxu1 %v7877_v12  ;;  %v7958_v12 = vld [vmem:[#allocation5 + $0x790] ss:$24 sps:$4 sm:$0xff]  }
 0x1d8   : > { %5670 = vmatpush1.bf16.msra.mxu0 %v7880_v13  ;;  %5343 = vmatprep.subr.bf16.mxu1 %v7885_v14  ;;  %v7963_v13 = vld [vmem:[#allocation5 + $0x7bc] ss:$24 sps:$4 sm:$0xff]  }
 0x1d9   : > { %5671 = vmatprep.subr.bf16.mxu0 %v7888_v15  ;;  %v7966_v14 = vld [vmem:[#allocation5 + $0x7c4] ss:$24 sps:$4 sm:$0xff]   ;;  %v7961_v15 = vld [vmem:[#allocation5 + $0x7b8] ss:$24 sps:$4 sm:$0xff]  }
 0x1db   : > { %5344 = vmatpush1.bf16.msra.mxu1 %v7883_v16  ;;  %v7964_v16 = vld [vmem:[#allocation5 + $0x7c0] ss:$24 sps:$4 sm:$0xff]  }
 0x1dc   : > { %5672 = vmatpush1.bf16.msra.mxu0 %v7886_v17  ;;  %5345 = vmatprep.subr.bf16.mxu1 %v7891_v18  ;;  %v7969_v17 = vld [vmem:[#allocation5 + $0x7ec] ss:$24 sps:$4 sm:$0xff]  }
 0x1dd   : > { %5673 = vmatprep.subr.bf16.mxu0 %v7894_v19  ;;  %v7972_v18 = vld [vmem:[#allocation5 + $0x7f4] ss:$24 sps:$4 sm:$0xff]   ;;  %v7967_v19 = vld [vmem:[#allocation5 + $0x7e8] ss:$24 sps:$4 sm:$0xff]  }
 0x1df   : > { %5346 = vmatpush1.bf16.msra.mxu1 %v7889_v20  ;;  %v7970_v20 = vld [vmem:[#allocation5 + $0x7f0] ss:$24 sps:$4 sm:$0xff]  }
 0x1e0   : > { %5674 = vmatpush1.bf16.msra.mxu0 %v7892_v21  ;;  %5347 = vmatprep.subr.bf16.mxu1 %v7897_v48  ;;  %v7975_v21 = vld [vmem:[#allocation5 + $0x81c] ss:$24 sps:$4 sm:$0xff]  }
 0x1e1   : > { %5675 = vmatprep.subr.bf16.mxu0 %v7900_v24  ;;  %v7978_v48 = vld [vmem:[#allocation5 + $0x824] ss:$24 sps:$4 sm:$0xff]   ;;  %v7973_v24 = vld [vmem:[#allocation5 + $0x818] ss:$24 sps:$4 sm:$0xff]  }
 0x1e3   : > { %5348 = vmatpush1.bf16.msra.mxu1 %v7895_v25  ;;  %v7976_v25 = vld [vmem:[#allocation5 + $0x820] ss:$24 sps:$4 sm:$0xff]  }
 0x1e4   : > { %5676 = vmatpush1.bf16.msra.mxu0 %v7898_v26  ;;  %5349 = vmatprep.subr.bf16.mxu1 %v7903_v27  ;;  %v7981_v26 = vld [vmem:[#allocation5 + $0x84c] ss:$24 sps:$4 sm:$0xff]  }
 0x1e5   : > { %5677 = vmatprep.subr.bf16.mxu0 %v7906_v29  ;;  %v7984_v27 = vld [vmem:[#allocation5 + $0x854] ss:$24 sps:$4 sm:$0xff]   ;;  %v7979_v29 = vld [vmem:[#allocation5 + $0x848] ss:$24 sps:$4 sm:$0xff]  }
 0x1e7   : > { %5350 = vmatpush1.bf16.msra.mxu1 %v7901_v30  ;;  %v7982_v30 = vld [vmem:[#allocation5 + $0x850] ss:$24 sps:$4 sm:$0xff]  }
 0x1e8   : > { %5678 = vmatpush1.bf16.msra.mxu0 %v7904_v31  ;;  %5360 = vmatprep.subr.bf16.mxu1 %v7909_v10  ;;  %v7987_v31 = vld [vmem:[#allocation5 + $0x87c] ss:$24 sps:$4 sm:$0xff]  }
 0x1e9   : > { %5688 = vmatprep.subr.bf16.mxu0 %v7912_v32  ;;  %v7990_v10 = vld [vmem:[#allocation5 + $0x884] ss:$24 sps:$4 sm:$0xff]   ;;  %v7985_v32 = vld [vmem:[#allocation5 + $0x878] ss:$24 sps:$4 sm:$0xff]  }
 0x1ea   : > { %5352 = vmatmul.mubr.bf16.vlgmr.msra.gmra.mrb[4].mxu1 %v8887_v22 }
 0x1eb   : > { %5680 = vmatmul.mubr.bf16.vlgmr.msra.gmra.mrb[4].mxu0 %v8887_v22  ;;  %5361 = vmatpush1.bf16.msra.mxu1 %v7907_v34  ;;  %v7930_v22 = vld [vmem:[#allocation5 + $0x6a4] ss:$24 sps:$4 sm:$0xff]   ;;  %v7988_v34 = vld [vmem:[#allocation5 + $0x880] ss:$24 sps:$4 sm:$0xff]  }
 0x1ec   : > { %5689 = vmatpush1.bf16.msra.mxu0 %v7910_v35  ;;  %5362 = vmatprep.subr.bf16.mxu1 %v7915_v37  ;;  %v7993_v35 = vld [vmem:[#allocation5 + $0x8ac] ss:$24 sps:$4 sm:$0xff]  }
 0x1ed   : > { %5690 = vmatprep.subr.bf16.mxu0 %v7918_v38  ;;  %5392 = vmatprep.mubr.bf16.mxu1 %v8894_v28  ;;  %v7996_v37 = vld [vmem:[#allocation5 + $0x8b4] ss:$24 sps:$4 sm:$0xff]   ;;  %v7991_v38 = vld [vmem:[#allocation5 + $0x8a8] ss:$24 sps:$4 sm:$0xff]  }
 0x1ee   : > { %5720 = vmatprep.mubr.bf16.mxu0 %v8894_v28  ;;  %v7934_v28 = vld [vmem:[#allocation5 + $0x6d0] ss:$24 sps:$4 sm:$0xff]  }
 0x1ef   : > { %5363 = vmatpush1.bf16.msra.mxu1 %v7913_v36  ;;  %v7994_v36 = vld [vmem:[#allocation5 + $0x8b0] ss:$24 sps:$4 sm:$0xff]  }
 0x1f0   : > { %5691 = vmatpush1.bf16.msra.mxu0 %v7916_v39  ;;  %5364 = vmatprep.subr.bf16.mxu1 %v7921_v40  ;;  %v7999_v39 = vld [vmem:[#allocation5 + $0x8dc] ss:$24 sps:$4 sm:$0xff]  }
 0x1f1   : > { %5692 = vmatprep.subr.bf16.mxu0 %v7924_v44  ;;  %v8002_v40 = vld [vmem:[#allocation5 + $0x8e4] ss:$24 sps:$4 sm:$0xff]   ;;  %v7997_v44 = vld [vmem:[#allocation5 + $0x8d8] ss:$24 sps:$4 sm:$0xff]  }
 0x1f3   : > { %5365 = vmatpush1.bf16.msra.mxu1 %v7919_v45  ;;  %v8000_v45 = vld [vmem:[#allocation5 + $0x8e0] ss:$24 sps:$4 sm:$0xff]  }
 0x1f4   : > { %5693 = vmatpush1.bf16.msra.mxu0 %v7922_v46  ;;  %5366 = vmatprep.subr.bf16.mxu1 %v7927_v47  ;;  %v8005_v46 = vld [vmem:[#allocation5 + $0x90c] ss:$24 sps:$4 sm:$0xff]  }
 0x1f5   : > { %5694 = vmatprep.subr.bf16.mxu0 %v7930_v22  ;;  %v8008_v47 = vld [vmem:[#allocation5 + $0x914] ss:$24 sps:$4 sm:$0xff]   ;;  %v8003_v22 = vld [vmem:[#allocation5 + $0x908] ss:$24 sps:$4 sm:$0xff]  }
 0x1f7   : > { %5367 = vmatpush1.bf16.msra.mxu1 %v7925_v51  ;;  %v8006_v51 = vld [vmem:[#allocation5 + $0x910] ss:$24 sps:$4 sm:$0xff]  }
 0x1f8   : > { %5695 = vmatpush1.bf16.msra.mxu0 %v7928_v52  ;;  %5368 = vmatprep.subr.bf16.mxu1 %v7933_v54  ;;  %v8011_v52 = vld [vmem:[#allocation5 + $0x93c] ss:$24 sps:$4 sm:$0xff]  }
 0x1f9   : > { %5696 = vmatprep.subr.bf16.mxu0 %v7936_v55  ;;  %v8014_v54 = vld [vmem:[#allocation5 + $0x944] ss:$24 sps:$4 sm:$0xff]   ;;  %v8009_v55 = vld [vmem:[#allocation5 + $0x938] ss:$24 sps:$4 sm:$0xff]  }
 0x1fb   : > { %5369 = vmatpush1.bf16.msra.mxu1 %v7931_v56  ;;  %v8012_v56 = vld [vmem:[#allocation5 + $0x940] ss:$24 sps:$4 sm:$0xff]  }
 0x1fc   : > { %5697 = vmatpush1.bf16.msra.mxu0 %v7934_v28  ;;  %5370 = vmatprep.subr.bf16.mxu1 %v7939_v57  ;;  %v8017_v28 = vld [vmem:[#allocation5 + $0x96c] ss:$24 sps:$4 sm:$0xff]  }
 0x1fd   : > { %5698 = vmatprep.subr.bf16.mxu0 %v7942_v58  ;;  %v8020_v57 = vld [vmem:[#allocation5 + $0x974] ss:$24 sps:$4 sm:$0xff]   ;;  %v1080_v58 = vlaneseq }
 0x1ff   : > { %5371 = vmatpush1.bf16.msra.mxu1 %v7937_v59  ;;  %v8015_v59 = vld [vmem:[#allocation5 + $0x968] ss:$24 sps:$4 sm:$0xff]  }
 0x200   : > { %5699 = vmatpush1.bf16.msra.mxu0 %v7940_v60  ;;  %5372 = vmatprep.subr.bf16.mxu1 %v7945_v61  ;;  %v8018_v60 = vld [vmem:[#allocation5 + $0x970] ss:$24 sps:$4 sm:$0xff]   ;;  %v8026_v61 = vld [vmem:[#allocation5 + $0x9a4] ss:$24 sps:$4 sm:$0xff]  }
 0x201   : > { %5700 = vmatprep.subr.bf16.mxu0 %v7948_v62  ;;  %v8021_v62 = vld [vmem:[#allocation5 + $0x998] ss:$24 sps:$4 sm:$0xff]  }
 0x203   : > { %5373 = vmatpush1.bf16.msra.mxu1 %v7943_v63  ;;  %v8024_v63 = vld [vmem:[#allocation5 + $0x9a0] ss:$24 sps:$4 sm:$0xff]  }
 0x204   : > { %5701 = vmatpush1.bf16.msra.mxu0 %v7946_v2  ;;  %5374 = vmatprep.subr.bf16.mxu1 %v7951_v3  ;;  %v8939_v2 = vshrl.u32 %v1080_v58, 7  ;;  %v1058_v3 = vld [vmem:[#allocation7] ss:$8 sm:$0xf]  ;;  %v8071_v58 = vld [vmem:[#allocation5 + $0xb1c] ss:$24 sps:$4 sm:$0xff]  }
 0x205   : > { %5702 = vmatprep.subr.bf16.mxu0 %v7954_v4  ;;  %v1059_v4 = vld [vmem:[#allocation7] ss:$8 sm:$0x30] }
 0x207   : > { %5375 = vmatpush1.bf16.msra.mxu1 %v7949_v5  ;;  %v8032_v5 = vld [vmem:[#allocation5 + $0x9d4] ss:$24 sps:$4 sm:$0xff]  }
 0x208   : > { %5703 = vmatpush1.bf16.msra.mxu0 %v7952_v6  ;;  %5376 = vmatprep.subr.bf16.mxu1 %v7957_v7  ;;  %v8941_v6 = vor.u32 %v1059_v4, %v1058_v3  ;;  %v8944_v7 = vsub.s32 0, %v8939_v2  ;;  %v8078_v3 = vld [vmem:[#allocation5 + $0xb50] ss:$24 sps:$4 sm:$0xff]   ;;  %v8083_v4 = vld [vmem:[#allocation5 + $0xb7c] ss:$24 sps:$4 sm:$0xff]  }
 0x209   : > { %5704 = vmatprep.subr.bf16.mxu0 %v7960_v8  ;;  %v8027_v8 = vld [vmem:[#allocation5 + $0x9c8] ss:$24 sps:$4 sm:$0xff]  }
 0x20b   : > { %5377 = vmatpush1.bf16.msra.mxu1 %v7955_v9  ;;  %v8030_v9 = vld [vmem:[#allocation5 + $0x9d0] ss:$24 sps:$4 sm:$0xff]  }
 0x20c   : > { %5705 = vmatpush1.bf16.msra.mxu0 %v7958_v12  ;;  %5378 = vmatprep.subr.bf16.mxu1 %v7963_v13  ;;  %v8947_v12 = vsub.s32 1, %v8939_v2  ;;  %v8035_v13 = vld [vmem:[#allocation5 + $0x9fc] ss:$24 sps:$4 sm:$0xff]  }
 0x20d   : > { %5706 = vmatprep.subr.bf16.mxu0 %v7966_v14  ;;  %v8038_v14 = vld [vmem:[#allocation5 + $0xa04] ss:$24 sps:$4 sm:$0xff]  }
 0x20f   : > { %5379 = vmatpush1.bf16.msra.mxu1 %v7961_v15  ;;  %v1083_v15 = vrot.slane %v8941_v6, %v8944_v7 }
 0x210   : > { %5707 = vmatpush1.bf16.msra.mxu0 %v7964_v16  ;;  %5380 = vmatprep.subr.bf16.mxu1 %v7969_v17  ;;  %v1087_v16 = vrot.slane %v8941_v6, %v8947_v12  ;;  %v8033_v17 = vld [vmem:[#allocation5 + $0x9f8] ss:$24 sps:$4 sm:$0xff]  }
 0x211   : > { %5708 = vmatprep.subr.bf16.mxu0 %v7972_v18  ;;  %v8036_v18 = vld [vmem:[#allocation5 + $0xa00] ss:$24 sps:$4 sm:$0xff]  }
 0x213   : > { %5381 = vmatpush1.bf16.msra.mxu1 %v7967_v19  ;;  %v8041_v19 = vld [vmem:[#allocation5 + $0xa2c] ss:$24 sps:$4 sm:$0xff]  }
 0x214   : > { %5709 = vmatpush1.bf16.msra.mxu0 %v7970_v20  ;;  %5382 = vmatprep.subr.bf16.mxu1 %v7975_v21  ;;  %v8044_v20 = vld [vmem:[#allocation5 + $0xa34] ss:$24 sps:$4 sm:$0xff]  }
 0x215   : > { %5710 = vmatprep.subr.bf16.mxu0 %v7978_v48 }
 0x217   : > { %5383 = vmatpush1.bf16.msra.mxu1 %v7973_v24 }
 0x218   : > { %5711 = vmatpush1.bf16.msra.mxu0 %v7976_v25  ;;  %5384 = vmatprep.subr.bf16.mxu1 %v7981_v26 }
 0x219   : > { %5712 = vmatprep.subr.bf16.mxu0 %v7984_v27 }
 0x21b   : > { %5385 = vmatpush1.bf16.msra.mxu1 %v7979_v29 }
 0x21c   : > { %5713 = vmatpush1.bf16.msra.mxu0 %v7982_v30  ;;  %5386 = vmatprep.subr.bf16.mxu1 %v7987_v31  ;;  %v8039_v31 = vld [vmem:[#allocation5 + $0xa28] ss:$24 sps:$4 sm:$0xff]  }
 0x21d   : > { %5714 = vmatprep.subr.bf16.mxu0 %v7990_v10  ;;  %v8042_v10 = vld [vmem:[#allocation5 + $0xa30] ss:$24 sps:$4 sm:$0xff]  }
 0x21f   : > { %5387 = vmatpush1.bf16.msra.mxu1 %v7985_v32 }
 0x220   : > { %5715 = vmatpush1.bf16.msra.mxu0 %v7988_v34  ;;  %5388 = vmatprep.subr.bf16.mxu1 %v7993_v35 }
 0x221   : > { %5716 = vmatprep.subr.bf16.mxu0 %v7996_v37  ;;  %v8047_v37 = vld [vmem:[#allocation5 + $0xa5c] ss:$24 sps:$4 sm:$0xff]  }
 0x223   : > { %5389 = vmatpush1.bf16.msra.mxu1 %v7991_v38  ;;  %v8050_v38 = vld [vmem:[#allocation5 + $0xa64] ss:$24 sps:$4 sm:$0xff]  }
 0x224   : > { %5717 = vmatpush1.bf16.msra.mxu0 %v7994_v36  ;;  %5390 = vmatprep.subr.bf16.mxu1 %v7999_v39  ;;  %v8045_v39 = vld [vmem:[#allocation5 + $0xa58] ss:$24 sps:$4 sm:$0xff]  }
 0x225   : > { %5718 = vmatprep.subr.bf16.mxu0 %v8002_v40  ;;  %v8048_v40 = vld [vmem:[#allocation5 + $0xa60] ss:$24 sps:$4 sm:$0xff]  }
 0x227   : > { %5391 = vmatpush1.bf16.msra.mxu1 %v7997_v44  ;;  %v8053_v44 = vld [vmem:[#allocation5 + $0xa8c] ss:$24 sps:$4 sm:$0xff]  }
 0x228   : > { %5719 = vmatpush1.bf16.msra.mxu0 %v8000_v45  ;;  %5401 = vmatprep.subr.bf16.mxu1 %v8005_v46  ;;  %v8056_v45 = vld [vmem:[#allocation5 + $0xa94] ss:$24 sps:$4 sm:$0xff]   ;;  %v8051_v46 = vld [vmem:[#allocation5 + $0xa88] ss:$24 sps:$4 sm:$0xff]  }
 0x229   : > { %5729 = vmatprep.subr.bf16.mxu0 %v8008_v47  ;;  %v8054_v47 = vld [vmem:[#allocation5 + $0xa90] ss:$24 sps:$4 sm:$0xff]  }
 0x22a   : > { %5393 = vmatmul.mubr.bf16.vlgmr.msra.gmra.mrb[4].mxu1 %v8903_v42 }
 0x22b   : > { %5721 = vmatmul.mubr.bf16.vlgmr.msra.gmra.mrb[4].mxu0 %v8903_v42  ;;  %5402 = vmatpush1.bf16.msra.mxu1 %v8003_v22  ;;  %v8023_v42 = vld [vmem:[#allocation5 + $0x99c] ss:$24 sps:$4 sm:$0xff]  }
 0x22c   : > { %5730 = vmatpush1.bf16.msra.mxu0 %v8006_v51  ;;  %5403 = vmatprep.subr.bf16.mxu1 %v8011_v52  ;;  %v8059_v22 = vld [vmem:[#allocation5 + $0xabc] ss:$24 sps:$4 sm:$0xff]   ;;  %v8057_v52 = vld [vmem:[#allocation5 + $0xab8] ss:$24 sps:$4 sm:$0xff]  }
 0x22d   : > { %5731 = vmatprep.subr.bf16.mxu0 %v8014_v54  ;;  %5433 = vmatprep.mubr.bf16.mxu1 %v8909_v49  ;;  %v8062_v51 = vld [vmem:[#allocation5 + $0xac4] ss:$24 sps:$4 sm:$0xff]   ;;  %v8060_v54 = vld [vmem:[#allocation5 + $0xac0] ss:$24 sps:$4 sm:$0xff]  }
 0x22e   : > { %5761 = vmatprep.mubr.bf16.mxu0 %v8909_v49  ;;  %v8029_v49 = vld [vmem:[#allocation5 + $0x9cc] ss:$24 sps:$4 sm:$0xff]  }
 0x22f   : > { %5404 = vmatpush1.bf16.msra.mxu1 %v8009_v55  ;;  %v8065_v55 = vld [vmem:[#allocation5 + $0xaec] ss:$24 sps:$4 sm:$0xff]  }
 0x230   : > { %5732 = vmatpush1.bf16.msra.mxu0 %v8012_v56  ;;  %5405 = vmatprep.subr.bf16.mxu1 %v8017_v28  ;;  %v8068_v56 = vld [vmem:[#allocation5 + $0xaf4] ss:$24 sps:$4 sm:$0xff]   ;;  %v8063_v28 = vld [vmem:[#allocation5 + $0xae8] ss:$24 sps:$4 sm:$0xff]  }
 0x231   : > { %5733 = vmatprep.subr.bf16.mxu0 %v8020_v57  ;;  %v8066_v57 = vld [vmem:[#allocation5 + $0xaf0] ss:$24 sps:$4 sm:$0xff]  }
 0x233   : > { %5406 = vmatpush1.bf16.msra.mxu1 %v8015_v59  ;;  %v8074_v59 = vld [vmem:[#allocation5 + $0xb24] ss:$24 sps:$4 sm:$0xff]  }
 0x234   : > { %5734 = vmatpush1.bf16.msra.mxu0 %v8018_v60  ;;  %5407 = vmatprep.subr.bf16.mxu1 %v8023_v42  ;;  %v8069_v60 = vld [vmem:[#allocation5 + $0xb18] ss:$24 sps:$4 sm:$0xff]  }
 0x235   : > { %5735 = vmatprep.subr.bf16.mxu0 %v8026_v61  ;;  %v8072_v42 = vld [vmem:[#allocation5 + $0xb20] ss:$24 sps:$4 sm:$0xff]   ;;  %v8077_v61 = vld [vmem:[#allocation5 + $0xb4c] ss:$24 sps:$4 sm:$0xff]  }
 0x237   : > { %5408 = vmatpush1.bf16.msra.mxu1 %v8021_v62  ;;  %v8080_v62 = vld [vmem:[#allocation5 + $0xb54] ss:$24 sps:$4 sm:$0xff]  }
 0x238   : > { %5736 = vmatpush1.bf16.msra.mxu0 %v8024_v63  ;;  %5409 = vmatprep.subr.bf16.mxu1 %v8029_v49  ;;  %v8075_v63 = vld [vmem:[#allocation5 + $0xb48] ss:$24 sps:$4 sm:$0xff]   ;;  %v8086_v49 = vld [vmem:[#allocation5 + $0xb84] ss:$24 sps:$4 sm:$0xff]  }
 0x239   : > { %5737 = vmatprep.subr.bf16.mxu0 %v8032_v5  ;;  %v8081_v5 = vld [vmem:[#allocation5 + $0xb78] ss:$24 sps:$4 sm:$0xff]  }
 0x23b   : > { %5410 = vmatpush1.bf16.msra.mxu1 %v8027_v8  ;;  %v8084_v8 = vld [vmem:[#allocation5 + $0xb80] ss:$24 sps:$4 sm:$0xff]  }
 0x23c   : > { %5738 = vmatpush1.bf16.msra.mxu0 %v8030_v9  ;;  %5411 = vmatprep.subr.bf16.mxu1 %v8035_v13  ;;  %v8089_v9 = vld [vmem:[#allocation5 + $0xbac] ss:$24 sps:$4 sm:$0xff]  }
 0x23d   : > { %5739 = vmatprep.subr.bf16.mxu0 %v8038_v14  ;;  %v5107_v21 = vpop.f32.mrb[0].mxu1  ;;  %v8092_v13 = vld [vmem:[#allocation5 + $0xbb4] ss:$24 sps:$4 sm:$0xff]   ;;  %v8087_v14 = vld [vmem:[#allocation5 + $0xba8] ss:$24 sps:$4 sm:$0xff]  }
 0x23e   : > { %v5271_v48 = vpop.f32.mrb[0].mxu0  ;;  %v7163_v24 = vadd.f32 %v5107_v21, %v1083_v15  ;;  %v5109_v25 = vpop.f32.mrb[1].mxu1  ;;  %v8090_v15 = vld [vmem:[#allocation5 + $0xbb0] ss:$24 sps:$4 sm:$0xff]   ;;  %v8104_v21 = vld [vmem:[#allocation5 + $0xc14] ss:$24 sps:$4 sm:$0xff]  }
 0x23f   : > { %v5273_v26 = vpop.f32.mrb[1].mxu0  ;;  %v7165_v27 = vadd.f32 %v5109_v25, %v1087_v16  ;;  %v5111_v29 = vpop.f32.mrb[2].mxu1  ;;  %5412 = vmatpush1.bf16.msra.mxu1 %v8033_v17  ;;  %v8095_v16 = vld [vmem:[#allocation5 + $0xbdc] ss:$24 sps:$4 sm:$0xff]  }
 0x240   : > { %v5275_v30 = vpop.f32.mrb[2].mxu0  ;;  %5740 = vmatpush1.bf16.msra.mxu0 %v8036_v18  ;;  %v8953_v32 = vadd.f32 %v7163_v24, %v5271_v48  ;;  %v5112_v34 = vpop.f32.mrb[3].mxu1  ;;  %5413 = vmatprep.subr.bf16.mxu1 %v8041_v19  ;;  %v8098_v17 = vld [vmem:[#allocation5 + $0xbe4] ss:$24 sps:$4 sm:$0xff]   ;;  %v8093_v18 = vld [vmem:[#allocation5 + $0xbd8] ss:$24 sps:$4 sm:$0xff]  }
 0x241   : > { %v5276_v35 = vpop.f32.mrb[3].mxu0  ;;  %5741 = vmatprep.subr.bf16.mxu0 %v8044_v20  ;;  %v8955_v36 = vadd.f32 %v7165_v27, %v5273_v26  ;;  %v8096_v19 = vld [vmem:[#allocation5 + $0xbe0] ss:$24 sps:$4 sm:$0xff]   ;;  %v8101_v20 = vld [vmem:[#allocation5 + $0xc0c] ss:$24 sps:$4 sm:$0xff]  }
 0x242   : > { %v8099_v48 = vld [vmem:[#allocation5 + $0xc08] ss:$24 sps:$4 sm:$0xff]   ;;  %v8107_v25 = vld [vmem:[#allocation5 + $0xc3c] ss:$24 sps:$4 sm:$0xff]   ;;  %v8105_v27 = vld [vmem:[#allocation5 + $0xc38] ss:$24 sps:$4 sm:$0xff]  }
 0x243   : > { %5414 = vmatpush1.bf16.msra.mxu1 %v8039_v31  ;;  %v8102_v24 = vld [vmem:[#allocation5 + $0xc10] ss:$24 sps:$4 sm:$0xff]   ;;  %v8110_v26 = vld [vmem:[#allocation5 + $0xc44] ss:$24 sps:$4 sm:$0xff]   ;;  %v8108_v29 = vld [vmem:[#allocation5 + $0xc40] ss:$24 sps:$4 sm:$0xff]  }
 0x244   : > { %5742 = vmatpush1.bf16.msra.mxu0 %v8042_v10  ;;  %5415 = vmatprep.subr.bf16.mxu1 %v8047_v37  ;;  %v8113_v30 = vld [vmem:[#allocation5 + $0xc6c] ss:$24 sps:$4 sm:$0xff]   ;;  %v8111_v10 = vld [vmem:[#allocation5 + $0xc68] ss:$24 sps:$4 sm:$0xff]   ;;  %v8119_v35 = vld [vmem:[#allocation5 + $0xc9c] ss:$24 sps:$4 sm:$0xff]  }
 0x245   : > { %5743 = vmatprep.subr.bf16.mxu0 %v8050_v38  ;;  %v8116_v31 = vld [vmem:[#allocation5 + $0xc74] ss:$24 sps:$4 sm:$0xff]   ;;  %v8114_v34 = vld [vmem:[#allocation5 + $0xc70] ss:$24 sps:$4 sm:$0xff]   ;;  %v8120_v38 = vld [vmem:[#allocation5 + $0xca0] ss:$24 sps:$4 sm:$0xff]  }
 0x246   : > { %v8117_v37 = vld [vmem:[#allocation5 + $0xc98] ss:$24 sps:$4 sm:$0xff]  }
 0x247   : > { %5416 = vmatpush1.bf16.msra.mxu1 %v8045_v39  ;;  %v8125_v39 = vld [vmem:[#allocation5 + $0xccc] ss:$24 sps:$4 sm:$0xff]  }
 0x248   : > { %5744 = vmatpush1.bf16.msra.mxu0 %v8048_v40  ;;  %5417 = vmatprep.subr.bf16.mxu1 %v8053_v44  ;;  %v8128_v40 = vld [vmem:[#allocation5 + $0xcd4] ss:$24 sps:$4 sm:$0xff]   ;;  %v8123_v44 = vld [vmem:[#allocation5 + $0xcc8] ss:$24 sps:$4 sm:$0xff]  }
 0x249   : > { %5745 = vmatprep.subr.bf16.mxu0 %v8056_v45  ;;  %v8131_v45 = vld [vmem:[#allocation5 + $0xcfc] ss:$24 sps:$4 sm:$0xff]  }
 0x24b   : > { %5418 = vmatpush1.bf16.msra.mxu1 %v8051_v46  ;;  %v8134_v46 = vld [vmem:[#allocation5 + $0xd04] ss:$24 sps:$4 sm:$0xff]  }
 0x24c   : > { %5746 = vmatpush1.bf16.msra.mxu0 %v8054_v47  ;;  %5419 = vmatprep.subr.bf16.mxu1 %v8059_v22  ;;  %v8129_v47 = vld [vmem:[#allocation5 + $0xcf8] ss:$24 sps:$4 sm:$0xff]  }
 0x24d   : > { %5747 = vmatprep.subr.bf16.mxu0 %v8062_v51  ;;  %v8132_v22 = vld [vmem:[#allocation5 + $0xd00] ss:$24 sps:$4 sm:$0xff]   ;;  %v8137_v51 = vld [vmem:[#allocation5 + $0xd2c] ss:$24 sps:$4 sm:$0xff]  }
 0x24f   : > { %5420 = vmatpush1.bf16.msra.mxu1 %v8057_v52  ;;  %v8140_v52 = vld [vmem:[#allocation5 + $0xd34] ss:$24 sps:$4 sm:$0xff]  }
 0x250   : > { %5748 = vmatpush1.bf16.msra.mxu0 %v8060_v54  ;;  %5421 = vmatprep.subr.bf16.mxu1 %v8065_v55  ;;  %v8135_v54 = vld [vmem:[#allocation5 + $0xd28] ss:$24 sps:$4 sm:$0xff]  }
 0x251   : > { %5749 = vmatprep.subr.bf16.mxu0 %v8068_v56  ;;  %v8138_v55 = vld [vmem:[#allocation5 + $0xd30] ss:$24 sps:$4 sm:$0xff]   ;;  %v8143_v56 = vld [vmem:[#allocation5 + $0xd5c] ss:$24 sps:$4 sm:$0xff]  }
 0x253   : > { %5422 = vmatpush1.bf16.msra.mxu1 %v8063_v28  ;;  %v8146_v28 = vld [vmem:[#allocation5 + $0xd64] ss:$24 sps:$4 sm:$0xff]  }
 0x254   : > { %5750 = vmatpush1.bf16.msra.mxu0 %v8066_v57  ;;  %5423 = vmatprep.subr.bf16.mxu1 %v8071_v58  ;;  %v8141_v57 = vld [vmem:[#allocation5 + $0xd58] ss:$24 sps:$4 sm:$0xff]  }
 0x255   : > { %5751 = vmatprep.subr.bf16.mxu0 %v8074_v59  ;;  %v8144_v58 = vld [vmem:[#allocation5 + $0xd60] ss:$24 sps:$4 sm:$0xff]   ;;  %v8149_v59 = vld [vmem:[#allocation5 + $0xd8c] ss:$24 sps:$4 sm:$0xff]  }
 0x257   : > { %5424 = vmatpush1.bf16.msra.mxu1 %v8069_v60  ;;  %v8152_v60 = vld [vmem:[#allocation5 + $0xd94] ss:$24 sps:$4 sm:$0xff]  }
 0x258   : > { %5752 = vmatpush1.bf16.msra.mxu0 %v8072_v42  ;;  %5425 = vmatprep.subr.bf16.mxu1 %v8077_v61  ;;  %v8147_v42 = vld [vmem:[#allocation5 + $0xd88] ss:$24 sps:$4 sm:$0xff]  }
 0x259   : > { %5753 = vmatprep.subr.bf16.mxu0 %v8080_v62  ;;  %v8150_v61 = vld [vmem:[#allocation5 + $0xd90] ss:$24 sps:$4 sm:$0xff]   ;;  %v8155_v62 = vld [vmem:[#allocation5 + $0xdbc] ss:$24 sps:$4 sm:$0xff]  }
 0x25b   : > { %5426 = vmatpush1.bf16.msra.mxu1 %v8075_v63  ;;  %v8158_v63 = vld [vmem:[#allocation5 + $0xdc4] ss:$24 sps:$4 sm:$0xff]  }
 0x25c   : > { %5754 = vmatpush1.bf16.msra.mxu0 %v8078_v3  ;;  %5427 = vmatprep.subr.bf16.mxu1 %v8083_v4  ;;  %v8153_v3 = vld [vmem:[#allocation5 + $0xdb8] ss:$24 sps:$4 sm:$0xff]  }
 0x25d   : > { %5755 = vmatprep.subr.bf16.mxu0 %v8086_v49  ;;  %v8156_v4 = vld [vmem:[#allocation5 + $0xdc0] ss:$24 sps:$4 sm:$0xff]   ;;  %v8161_v49 = vld [vmem:[#allocation5 + $0xdec] ss:$24 sps:$4 sm:$0xff]  }
 0x25f   : > { %5428 = vmatpush1.bf16.msra.mxu1 %v8081_v5  ;;  %v8164_v5 = vld [vmem:[#allocation5 + $0xdf4] ss:$24 sps:$4 sm:$0xff]  }
 0x260   : > { %5756 = vmatpush1.bf16.msra.mxu0 %v8084_v8  ;;  %5429 = vmatprep.subr.bf16.mxu1 %v8089_v9  ;;  %v8159_v8 = vld [vmem:[#allocation5 + $0xde8] ss:$24 sps:$4 sm:$0xff]  }
 0x261   : > { %5757 = vmatprep.subr.bf16.mxu0 %v8092_v13  ;;  %v8162_v9 = vld [vmem:[#allocation5 + $0xdf0] ss:$24 sps:$4 sm:$0xff]   ;;  %v8167_v13 = vld [vmem:[#allocation5 + $0xe1c] ss:$24 sps:$4 sm:$0xff]  }
 0x263   : > { %5430 = vmatpush1.bf16.msra.mxu1 %v8087_v14  ;;  %v8170_v14 = vld [vmem:[#allocation5 + $0xe24] ss:$24 sps:$4 sm:$0xff]  }
 0x264   : > { %5758 = vmatpush1.bf16.msra.mxu0 %v8090_v15  ;;  %5431 = vmatprep.subr.bf16.mxu1 %v8095_v16  ;;  %v8165_v15 = vld [vmem:[#allocation5 + $0xe18] ss:$24 sps:$4 sm:$0xff]  }
 0x265   : > { %5759 = vmatprep.subr.bf16.mxu0 %v8098_v17  ;;  %v8168_v16 = vld [vmem:[#allocation5 + $0xe20] ss:$24 sps:$4 sm:$0xff]   ;;  %v8173_v17 = vld [vmem:[#allocation5 + $0xe4c] ss:$24 sps:$4 sm:$0xff]  }
 0x267   : > { %5432 = vmatpush1.bf16.msra.mxu1 %v8093_v18  ;;  %v8176_v18 = vld [vmem:[#allocation5 + $0xe54] ss:$24 sps:$4 sm:$0xff]  }
 0x268   : > { %5760 = vmatpush1.bf16.msra.mxu0 %v8096_v19  ;;  %5442 = vmatprep.subr.bf16.mxu1 %v8101_v20  ;;  %v8171_v19 = vld [vmem:[#allocation5 + $0xe48] ss:$24 sps:$4 sm:$0xff]  }
 0x269   : > { %5770 = vmatprep.subr.bf16.mxu0 %v8104_v21  ;;  %v8174_v20 = vld [vmem:[#allocation5 + $0xe50] ss:$24 sps:$4 sm:$0xff]   ;;  %v8179_v21 = vld [vmem:[#allocation5 + $0xe7c] ss:$24 sps:$4 sm:$0xff]  }
 0x26a   : > { %5434 = vmatmul.mubr.bf16.vlgmr.msra.gmra.mrb[4].mxu1 %v8919_v0 }
 0x26b   : > { %5762 = vmatmul.mubr.bf16.vlgmr.msra.gmra.mrb[4].mxu0 %v8919_v0  ;;  %5443 = vmatpush1.bf16.msra.mxu1 %v8099_v48  ;;  %v8122_v0 = vld [vmem:[#allocation5 + $0xca4] ss:$24 sps:$4 sm:$0xff]  }
 0x26c   : > { %5771 = vmatpush1.bf16.msra.mxu0 %v8102_v24  ;;  %5444 = vmatprep.subr.bf16.mxu1 %v8107_v25  ;;  %v8182_v48 = vld [vmem:[#allocation5 + $0xe84] ss:$24 sps:$4 sm:$0xff]   ;;  %v8177_v24 = vld [vmem:[#allocation5 + $0xe78] ss:$24 sps:$4 sm:$0xff]  }
 0x26d   : > { %5772 = vmatprep.subr.bf16.mxu0 %v8110_v26  ;;  %5474 = vmatprep.mubr.bf16.mxu1 %v8865_v53  ;;  %v8180_v25 = vld [vmem:[#allocation5 + $0xe80] ss:$24 sps:$4 sm:$0xff]   ;;  %v8185_v26 = vld [vmem:[#allocation5 + $0xeac] ss:$24 sps:$4 sm:$0xff]  }
 0x26e   : > { %5802 = vmatprep.mubr.bf16.mxu0 %v8865_v53  ;;  %v8126_v53 = vld [vmem:[#allocation5 + $0xcd0] ss:$24 sps:$4 sm:$0xff]  }
 0x26f   : > { %5445 = vmatpush1.bf16.msra.mxu1 %v8105_v27  ;;  %v8188_v27 = vld [vmem:[#allocation5 + $0xeb4] ss:$24 sps:$4 sm:$0xff]  }
 0x270   : > { %5773 = vmatpush1.bf16.msra.mxu0 %v8108_v29  ;;  %5446 = vmatprep.subr.bf16.mxu1 %v8113_v30  ;;  %v8183_v29 = vld [vmem:[#allocation5 + $0xea8] ss:$24 sps:$4 sm:$0xff]  }
 0x271   : > { %5774 = vmatprep.subr.bf16.mxu0 %v8116_v31  ;;  %v8186_v30 = vld [vmem:[#allocation5 + $0xeb0] ss:$24 sps:$4 sm:$0xff]   ;;  %v8191_v31 = vld [vmem:[#allocation5 + $0xedc] ss:$24 sps:$4 sm:$0xff]  }
 0x273   : > { %5447 = vmatpush1.bf16.msra.mxu1 %v8111_v10  ;;  %v8194_v10 = vld [vmem:[#allocation5 + $0xee4] ss:$24 sps:$4 sm:$0xff]  }
 0x274   : > { %5775 = vmatpush1.bf16.msra.mxu0 %v8114_v34  ;;  %5448 = vmatprep.subr.bf16.mxu1 %v8119_v35  ;;  %v8189_v34 = vld [vmem:[#allocation5 + $0xed8] ss:$24 sps:$4 sm:$0xff]  }
 0x275   : > { %5776 = vmatprep.subr.bf16.mxu0 %v8122_v0  ;;  %v8192_v35 = vld [vmem:[#allocation5 + $0xee0] ss:$24 sps:$4 sm:$0xff]   ;;  %v8197_v0 = vld [vmem:[#allocation5 + $0xf0c] ss:$24 sps:$4 sm:$0xff]  }
 0x277   : > { %5449 = vmatpush1.bf16.msra.mxu1 %v8117_v37  ;;  %v8200_v37 = vld [vmem:[#allocation5 + $0xf14] ss:$24 sps:$4 sm:$0xff]  }
 0x278   : > { %5777 = vmatpush1.bf16.msra.mxu0 %v8120_v38  ;;  %5450 = vmatprep.subr.bf16.mxu1 %v8125_v39  ;;  %v8195_v38 = vld [vmem:[#allocation5 + $0xf08] ss:$24 sps:$4 sm:$0xff]  }
 0x279   : > { %5778 = vmatprep.subr.bf16.mxu0 %v8128_v40  ;;  %v8198_v39 = vld [vmem:[#allocation5 + $0xf10] ss:$24 sps:$4 sm:$0xff]   ;;  %v8203_v40 = vld [vmem:[#allocation5 + $0xf3c] ss:$24 sps:$4 sm:$0xff]  }
 0x27b   : > { %5451 = vmatpush1.bf16.msra.mxu1 %v8123_v44  ;;  %v8206_v44 = vld [vmem:[#allocation5 + $0xf44] ss:$24 sps:$4 sm:$0xff]  }
 0x27c   : > { %5779 = vmatpush1.bf16.msra.mxu0 %v8126_v53  ;;  %5452 = vmatprep.subr.bf16.mxu1 %v8131_v45  ;;  %v8201_v53 = vld [vmem:[#allocation5 + $0xf38] ss:$24 sps:$4 sm:$0xff]  }
 0x27d   : > { %5780 = vmatprep.subr.bf16.mxu0 %v8134_v46  ;;  %v8204_v45 = vld [vmem:[#allocation5 + $0xf40] ss:$24 sps:$4 sm:$0xff]   ;;  %v8209_v46 = vld [vmem:[#allocation5 + $0xf6c] ss:$24 sps:$4 sm:$0xff]  }
 0x27f   : > { %5453 = vmatpush1.bf16.msra.mxu1 %v8129_v47  ;;  %v8212_v47 = vld [vmem:[#allocation5 + $0xf74] ss:$24 sps:$4 sm:$0xff]  }
 0x280   : > { %5781 = vmatpush1.bf16.msra.mxu0 %v8132_v22  ;;  %5454 = vmatprep.subr.bf16.mxu1 %v8137_v51  ;;  %v8207_v22 = vld [vmem:[#allocation5 + $0xf68] ss:$24 sps:$4 sm:$0xff]  }
 0x281   : > { %5782 = vmatprep.subr.bf16.mxu0 %v8140_v52  ;;  %v8210_v51 = vld [vmem:[#allocation5 + $0xf70] ss:$24 sps:$4 sm:$0xff]   ;;  %v8215_v52 = vld [vmem:[#allocation5 + $0xf9c] ss:$24 sps:$4 sm:$0xff]  }
 0x283   : > { %5455 = vmatpush1.bf16.msra.mxu1 %v8135_v54  ;;  %v8213_v54 = vld [vmem:[#allocation5 + $0xf98] ss:$24 sps:$4 sm:$0xff]  }
 0x284   : > { %5783 = vmatpush1.bf16.msra.mxu0 %v8138_v55  ;;  %5456 = vmatprep.subr.bf16.mxu1 %v8143_v56  ;;  %v8216_v55 = vld [vmem:[#allocation5 + $0xfa0] ss:$24 sps:$4 sm:$0xff]   ;;  %v8221_v56 = vld [vmem:[#allocation5 + $0xfcc] ss:$24 sps:$4 sm:$0xff]  }
 0x285   : > { %5784 = vmatprep.subr.bf16.mxu0 %v8146_v28  ;;  %v8224_v28 = vld [vmem:[#allocation5 + $0xfd4] ss:$24 sps:$4 sm:$0xff]  }
 0x287   : > { %5457 = vmatpush1.bf16.msra.mxu1 %v8141_v57  ;;  %v8219_v57 = vld [vmem:[#allocation5 + $0xfc8] ss:$24 sps:$4 sm:$0xff]  }
 0x288   : > { %5785 = vmatpush1.bf16.msra.mxu0 %v8144_v58  ;;  %5458 = vmatprep.subr.bf16.mxu1 %v8149_v59  ;;  %v8227_v58 = vld [vmem:[#allocation5 + $0xffc] ss:$24 sps:$4 sm:$0xff]  }
 0x289   : > { %5786 = vmatprep.subr.bf16.mxu0 %v8152_v60  ;;  %v8230_v59 = vld [vmem:[#allocation5 + $0x1004] ss:$24 sps:$4 sm:$0xff]   ;;  %v8225_v60 = vld [vmem:[#allocation5 + $0xff8] ss:$24 sps:$4 sm:$0xff]  }
 0x28b   : > { %5459 = vmatpush1.bf16.msra.mxu1 %v8147_v42  ;;  %v8228_v42 = vld [vmem:[#allocation5 + $0x1000] ss:$24 sps:$4 sm:$0xff]  }
 0x28c   : > { %5787 = vmatpush1.bf16.msra.mxu0 %v8150_v61  ;;  %5460 = vmatprep.subr.bf16.mxu1 %v8155_v62  ;;  %v8233_v61 = vld [vmem:[#allocation5 + $0x102c] ss:$24 sps:$4 sm:$0xff]  }
 0x28d   : > { %5788 = vmatprep.subr.bf16.mxu0 %v8158_v63  ;;  %v8236_v62 = vld [vmem:[#allocation5 + $0x1034] ss:$24 sps:$4 sm:$0xff]   ;;  %v8231_v63 = vld [vmem:[#allocation5 + $0x1028] ss:$24 sps:$4 sm:$0xff]  }
 0x28f   : > { %5461 = vmatpush1.bf16.msra.mxu1 %v8153_v3  ;;  %v8234_v3 = vld [vmem:[#allocation5 + $0x1030] ss:$24 sps:$4 sm:$0xff]  }
 0x290   : > { %5789 = vmatpush1.bf16.msra.mxu0 %v8156_v4  ;;  %5462 = vmatprep.subr.bf16.mxu1 %v8161_v49  ;;  %v8239_v4 = vld [vmem:[#allocation5 + $0x105c] ss:$24 sps:$4 sm:$0xff]  }
 0x291   : > { %5790 = vmatprep.subr.bf16.mxu0 %v8164_v5  ;;  %v8242_v49 = vld [vmem:[#allocation5 + $0x1064] ss:$24 sps:$4 sm:$0xff]   ;;  %v8237_v5 = vld [vmem:[#allocation5 + $0x1058] ss:$24 sps:$4 sm:$0xff]  }
 0x293   : > { %5463 = vmatpush1.bf16.msra.mxu1 %v8159_v8  ;;  %v8240_v8 = vld [vmem:[#allocation5 + $0x1060] ss:$24 sps:$4 sm:$0xff]  }
 0x294   : > { %5791 = vmatpush1.bf16.msra.mxu0 %v8162_v9  ;;  %5464 = vmatprep.subr.bf16.mxu1 %v8167_v13  ;;  %v8245_v9 = vld [vmem:[#allocation5 + $0x108c] ss:$24 sps:$4 sm:$0xff]  }
 0x295   : > { %5792 = vmatprep.subr.bf16.mxu0 %v8170_v14  ;;  %v8248_v13 = vld [vmem:[#allocation5 + $0x1094] ss:$24 sps:$4 sm:$0xff]   ;;  %v8243_v14 = vld [vmem:[#allocation5 + $0x1088] ss:$24 sps:$4 sm:$0xff]  }
 0x297   : > { %5465 = vmatpush1.bf16.msra.mxu1 %v8165_v15  ;;  %v8246_v15 = vld [vmem:[#allocation5 + $0x1090] ss:$24 sps:$4 sm:$0xff]  }
 0x298   : > { %5793 = vmatpush1.bf16.msra.mxu0 %v8168_v16  ;;  %5466 = vmatprep.subr.bf16.mxu1 %v8173_v17  ;;  %v8251_v16 = vld [vmem:[#allocation5 + $0x10bc] ss:$24 sps:$4 sm:$0xff]  }
 0x299   : > { %5794 = vmatprep.subr.bf16.mxu0 %v8176_v18  ;;  %v8254_v17 = vld [vmem:[#allocation5 + $0x10c4] ss:$24 sps:$4 sm:$0xff]   ;;  %v8249_v18 = vld [vmem:[#allocation5 + $0x10b8] ss:$24 sps:$4 sm:$0xff]  }
 0x29b   : > { %5467 = vmatpush1.bf16.msra.mxu1 %v8171_v19  ;;  %v8252_v19 = vld [vmem:[#allocation5 + $0x10c0] ss:$24 sps:$4 sm:$0xff]  }
 0x29c   : > { %5795 = vmatpush1.bf16.msra.mxu0 %v8174_v20  ;;  %5468 = vmatprep.subr.bf16.mxu1 %v8179_v21  ;;  %v8257_v20 = vld [vmem:[#allocation5 + $0x10ec] ss:$24 sps:$4 sm:$0xff]  }
 0x29d   : > { %5796 = vmatprep.subr.bf16.mxu0 %v8182_v48  ;;  %v8260_v21 = vld [vmem:[#allocation5 + $0x10f4] ss:$24 sps:$4 sm:$0xff]   ;;  %v8255_v48 = vld [vmem:[#allocation5 + $0x10e8] ss:$24 sps:$4 sm:$0xff]  }
 0x29f   : > { %5469 = vmatpush1.bf16.msra.mxu1 %v8177_v24  ;;  %v8258_v24 = vld [vmem:[#allocation5 + $0x10f0] ss:$24 sps:$4 sm:$0xff]  }
 0x2a0   : > { %5797 = vmatpush1.bf16.msra.mxu0 %v8180_v25  ;;  %5470 = vmatprep.subr.bf16.mxu1 %v8185_v26  ;;  %v8263_v25 = vld [vmem:[#allocation5 + $0x111c] ss:$24 sps:$4 sm:$0xff]  }
 0x2a1   : > { %5798 = vmatprep.subr.bf16.mxu0 %v8188_v27  ;;  %v8266_v26 = vld [vmem:[#allocation5 + $0x1124] ss:$24 sps:$4 sm:$0xff]   ;;  %v8261_v27 = vld [vmem:[#allocation5 + $0x1118] ss:$24 sps:$4 sm:$0xff]  }
 0x2a3   : > { %5471 = vmatpush1.bf16.msra.mxu1 %v8183_v29  ;;  %v8264_v29 = vld [vmem:[#allocation5 + $0x1120] ss:$24 sps:$4 sm:$0xff]  }
 0x2a4   : > { %5799 = vmatpush1.bf16.msra.mxu0 %v8186_v30  ;;  %5472 = vmatprep.subr.bf16.mxu1 %v8191_v31  ;;  %v8269_v30 = vld [vmem:[#allocation5 + $0x114c] ss:$24 sps:$4 sm:$0xff]  }
 0x2a5   : > { %5800 = vmatprep.subr.bf16.mxu0 %v8194_v10  ;;  %v8272_v31 = vld [vmem:[#allocation5 + $0x1154] ss:$24 sps:$4 sm:$0xff]   ;;  %v8267_v10 = vld [vmem:[#allocation5 + $0x1148] ss:$24 sps:$4 sm:$0xff]  }
 0x2a7   : > { %5473 = vmatpush1.bf16.msra.mxu1 %v8189_v34  ;;  %v8270_v34 = vld [vmem:[#allocation5 + $0x1150] ss:$24 sps:$4 sm:$0xff]  }
 0x2a8   : > { %5801 = vmatpush1.bf16.msra.mxu0 %v8192_v35  ;;  %5483 = vmatprep.subr.bf16.mxu1 %v8197_v0  ;;  %v8275_v35 = vld [vmem:[#allocation5 + $0x117c] ss:$24 sps:$4 sm:$0xff]  }
 0x2a9   : > { %5811 = vmatprep.subr.bf16.mxu0 %v8200_v37  ;;  %v8278_v0 = vld [vmem:[#allocation5 + $0x1184] ss:$24 sps:$4 sm:$0xff]   ;;  %v8273_v37 = vld [vmem:[#allocation5 + $0x1178] ss:$24 sps:$4 sm:$0xff]  }
 0x2aa   : > { %5475 = vmatmul.mubr.bf16.vlgmr.msra.gmra.mrb[4].mxu1 %v8873_v11 }
 0x2ab   : > { %5803 = vmatmul.mubr.bf16.vlgmr.msra.gmra.mrb[4].mxu0 %v8873_v11  ;;  %5484 = vmatpush1.bf16.msra.mxu1 %v8195_v38  ;;  %v8218_v11 = vld [vmem:[#allocation5 + $0xfa4] ss:$24 sps:$4 sm:$0xff]   ;;  %v8276_v38 = vld [vmem:[#allocation5 + $0x1180] ss:$24 sps:$4 sm:$0xff]  }
 0x2ac   : > { %5812 = vmatpush1.bf16.msra.mxu0 %v8198_v39  ;;  %5485 = vmatprep.subr.bf16.mxu1 %v8203_v40  ;;  %v8281_v39 = vld [vmem:[#allocation5 + $0x11ac] ss:$24 sps:$4 sm:$0xff]  }
 0x2ad   : > { %5813 = vmatprep.subr.bf16.mxu0 %v8206_v44  ;;  %5515 = vmatprep.mubr.bf16.mxu1 %v8881_v41  ;;  %v8284_v40 = vld [vmem:[#allocation5 + $0x11b4] ss:$24 sps:$4 sm:$0xff]   ;;  %v8279_v44 = vld [vmem:[#allocation5 + $0x11a8] ss:$24 sps:$4 sm:$0xff]  }
 0x2ae   : > { %5843 = vmatprep.mubr.bf16.mxu0 %v8881_v41  ;;  %v8222_v41 = vld [vmem:[#allocation5 + $0xfd0] ss:$24 sps:$4 sm:$0xff]  }
 0x2af   : > { %5486 = vmatpush1.bf16.msra.mxu1 %v8201_v53  ;;  %v8282_v53 = vld [vmem:[#allocation5 + $0x11b0] ss:$24 sps:$4 sm:$0xff]  }
 0x2b0   : > { %5814 = vmatpush1.bf16.msra.mxu0 %v8204_v45  ;;  %5487 = vmatprep.subr.bf16.mxu1 %v8209_v46  ;;  %v8287_v45 = vld [vmem:[#allocation5 + $0x11dc] ss:$24 sps:$4 sm:$0xff]  }
 0x2b1   : > { %5815 = vmatprep.subr.bf16.mxu0 %v8212_v47  ;;  %v8290_v46 = vld [vmem:[#allocation5 + $0x11e4] ss:$24 sps:$4 sm:$0xff]   ;;  %v8285_v47 = vld [vmem:[#allocation5 + $0x11d8] ss:$24 sps:$4 sm:$0xff]  }
 0x2b3   : > { %5488 = vmatpush1.bf16.msra.mxu1 %v8207_v22  ;;  %v8288_v22 = vld [vmem:[#allocation5 + $0x11e0] ss:$24 sps:$4 sm:$0xff]  }
 0x2b4   : > { %5816 = vmatpush1.bf16.msra.mxu0 %v8210_v51  ;;  %5489 = vmatprep.subr.bf16.mxu1 %v8215_v52  ;;  %v8293_v51 = vld [vmem:[#allocation5 + $0x120c] ss:$24 sps:$4 sm:$0xff]  }
 0x2b5   : > { %5817 = vmatprep.subr.bf16.mxu0 %v8218_v11  ;;  %v8296_v52 = vld [vmem:[#allocation5 + $0x1214] ss:$24 sps:$4 sm:$0xff]   ;;  %v8291_v11 = vld [vmem:[#allocation5 + $0x1208] ss:$24 sps:$4 sm:$0xff]  }
 0x2b7   : > { %5490 = vmatpush1.bf16.msra.mxu1 %v8213_v54  ;;  %v8294_v54 = vld [vmem:[#allocation5 + $0x1210] ss:$24 sps:$4 sm:$0xff]  }
 0x2b8   : > { %5818 = vmatpush1.bf16.msra.mxu0 %v8216_v55  ;;  %5491 = vmatprep.subr.bf16.mxu1 %v8221_v56  ;;  %v8299_v55 = vld [vmem:[#allocation5 + $0x123c] ss:$24 sps:$4 sm:$0xff]  }
 0x2b9   : > { %5819 = vmatprep.subr.bf16.mxu0 %v8224_v28  ;;  %v8302_v56 = vld [vmem:[#allocation5 + $0x1244] ss:$24 sps:$4 sm:$0xff]   ;;  %v8297_v28 = vld [vmem:[#allocation5 + $0x1238] ss:$24 sps:$4 sm:$0xff]  }
 0x2bb   : > { %5492 = vmatpush1.bf16.msra.mxu1 %v8219_v57  ;;  %v8300_v57 = vld [vmem:[#allocation5 + $0x1240] ss:$24 sps:$4 sm:$0xff]  }
 0x2bc   : > { %5820 = vmatpush1.bf16.msra.mxu0 %v8222_v41  ;;  %5493 = vmatprep.subr.bf16.mxu1 %v8227_v58  ;;  %v8305_v41 = vld [vmem:[#allocation5 + $0x126c] ss:$24 sps:$4 sm:$0xff]  }
 0x2bd   : > { %5821 = vmatprep.subr.bf16.mxu0 %v8230_v59  ;;  %v8308_v58 = vld [vmem:[#allocation5 + $0x1274] ss:$24 sps:$4 sm:$0xff]   ;;  %v8303_v59 = vld [vmem:[#allocation5 + $0x1268] ss:$24 sps:$4 sm:$0xff]  }
 0x2bf   : > { %5494 = vmatpush1.bf16.msra.mxu1 %v8225_v60  ;;  %v8306_v60 = vld [vmem:[#allocation5 + $0x1270] ss:$24 sps:$4 sm:$0xff]  }
 0x2c0   : > { %5822 = vmatpush1.bf16.msra.mxu0 %v8228_v42  ;;  %5495 = vmatprep.subr.bf16.mxu1 %v8233_v61  ;;  %v8311_v42 = vld [vmem:[#allocation5 + $0x129c] ss:$24 sps:$4 sm:$0xff]   ;;  %v8309_v61 = vld [vmem:[#allocation5 + $0x1298] ss:$24 sps:$4 sm:$0xff]  }
 0x2c1   : > { %5823 = vmatprep.subr.bf16.mxu0 %v8236_v62  ;;  %v8312_v62 = vld [vmem:[#allocation5 + $0x12a0] ss:$24 sps:$4 sm:$0xff]  }
 0x2c3   : > { %5496 = vmatpush1.bf16.msra.mxu1 %v8231_v63  ;;  %v8317_v63 = vld [vmem:[#allocation5 + $0x12cc] ss:$24 sps:$4 sm:$0xff]  }
 0x2c4   : > { %5824 = vmatpush1.bf16.msra.mxu0 %v8234_v3  ;;  %5497 = vmatprep.subr.bf16.mxu1 %v8239_v4  ;;  %v8320_v3 = vld [vmem:[#allocation5 + $0x12d4] ss:$24 sps:$4 sm:$0xff]   ;;  %v8315_v4 = vld [vmem:[#allocation5 + $0x12c8] ss:$24 sps:$4 sm:$0xff]  }
 0x2c5   : > { %5825 = vmatprep.subr.bf16.mxu0 %v8242_v49  ;;  %v8323_v49 = vld [vmem:[#allocation5 + $0x12fc] ss:$24 sps:$4 sm:$0xff]  }
 0x2c7   : > { %5498 = vmatpush1.bf16.msra.mxu1 %v8237_v5  ;;  %v8326_v5 = vld [vmem:[#allocation5 + $0x1304] ss:$24 sps:$4 sm:$0xff]  }
 0x2c8   : > { %5826 = vmatpush1.bf16.msra.mxu0 %v8240_v8  ;;  %5499 = vmatprep.subr.bf16.mxu1 %v8245_v9  ;;  %v8321_v8 = vld [vmem:[#allocation5 + $0x12f8] ss:$24 sps:$4 sm:$0xff]  }
 0x2c9   : > { %5827 = vmatprep.subr.bf16.mxu0 %v8248_v13  ;;  %v8324_v9 = vld [vmem:[#allocation5 + $0x1300] ss:$24 sps:$4 sm:$0xff]   ;;  %v8329_v13 = vld [vmem:[#allocation5 + $0x132c] ss:$24 sps:$4 sm:$0xff]  }
 0x2cb   : > { %5500 = vmatpush1.bf16.msra.mxu1 %v8243_v14  ;;  %v8332_v14 = vld [vmem:[#allocation5 + $0x1334] ss:$24 sps:$4 sm:$0xff]  }
 0x2cc   : > { %5828 = vmatpush1.bf16.msra.mxu0 %v8246_v15  ;;  %5501 = vmatprep.subr.bf16.mxu1 %v8251_v16  ;;  %v8327_v15 = vld [vmem:[#allocation5 + $0x1328] ss:$24 sps:$4 sm:$0xff]  }
 0x2cd   : > { %5829 = vmatprep.subr.bf16.mxu0 %v8254_v17  ;;  %v8330_v16 = vld [vmem:[#allocation5 + $0x1330] ss:$24 sps:$4 sm:$0xff]   ;;  %v8335_v17 = vld [vmem:[#allocation5 + $0x135c] ss:$24 sps:$4 sm:$0xff]  }
 0x2cf   : > { %5502 = vmatpush1.bf16.msra.mxu1 %v8249_v18  ;;  %v8338_v18 = vld [vmem:[#allocation5 + $0x1364] ss:$24 sps:$4 sm:$0xff]  }
 0x2d0   : > { %5830 = vmatpush1.bf16.msra.mxu0 %v8252_v19  ;;  %5503 = vmatprep.subr.bf16.mxu1 %v8257_v20  ;;  %v8333_v19 = vld [vmem:[#allocation5 + $0x1358] ss:$24 sps:$4 sm:$0xff]  }
 0x2d1   : > { %5831 = vmatprep.subr.bf16.mxu0 %v8260_v21  ;;  %v8336_v20 = vld [vmem:[#allocation5 + $0x1360] ss:$24 sps:$4 sm:$0xff]   ;;  %v8341_v21 = vld [vmem:[#allocation5 + $0x138c] ss:$24 sps:$4 sm:$0xff]  }
 0x2d3   : > { %5504 = vmatpush1.bf16.msra.mxu1 %v8255_v48  ;;  %v8344_v48 = vld [vmem:[#allocation5 + $0x1394] ss:$24 sps:$4 sm:$0xff]  }
 0x2d4   : > { %5832 = vmatpush1.bf16.msra.mxu0 %v8258_v24  ;;  %5505 = vmatprep.subr.bf16.mxu1 %v8263_v25  ;;  %v8339_v24 = vld [vmem:[#allocation5 + $0x1388] ss:$24 sps:$4 sm:$0xff]  }
 0x2d5   : > { %5833 = vmatprep.subr.bf16.mxu0 %v8266_v26  ;;  %v8342_v25 = vld [vmem:[#allocation5 + $0x1390] ss:$24 sps:$4 sm:$0xff]   ;;  %v8347_v26 = vld [vmem:[#allocation5 + $0x13bc] ss:$24 sps:$4 sm:$0xff]  }
 0x2d7   : > { %5506 = vmatpush1.bf16.msra.mxu1 %v8261_v27  ;;  %v8350_v27 = vld [vmem:[#allocation5 + $0x13c4] ss:$24 sps:$4 sm:$0xff]  }
 0x2d8   : > { %5834 = vmatpush1.bf16.msra.mxu0 %v8264_v29  ;;  %5507 = vmatprep.subr.bf16.mxu1 %v8269_v30  ;;  %v8345_v29 = vld [vmem:[#allocation5 + $0x13b8] ss:$24 sps:$4 sm:$0xff]  }
 0x2d9   : > { %5835 = vmatprep.subr.bf16.mxu0 %v8272_v31  ;;  %v8348_v30 = vld [vmem:[#allocation5 + $0x13c0] ss:$24 sps:$4 sm:$0xff]   ;;  %v8353_v31 = vld [vmem:[#allocation5 + $0x13ec] ss:$24 sps:$4 sm:$0xff]  }
 0x2db   : > { %5508 = vmatpush1.bf16.msra.mxu1 %v8267_v10  ;;  %v8356_v10 = vld [vmem:[#allocation5 + $0x13f4] ss:$24 sps:$4 sm:$0xff]  }
 0x2dc   : > { %5836 = vmatpush1.bf16.msra.mxu0 %v8270_v34  ;;  %5509 = vmatprep.subr.bf16.mxu1 %v8275_v35  ;;  %v8351_v34 = vld [vmem:[#allocation5 + $0x13e8] ss:$24 sps:$4 sm:$0xff]  }
 0x2dd   : > { %5837 = vmatprep.subr.bf16.mxu0 %v8278_v0  ;;  %v8354_v35 = vld [vmem:[#allocation5 + $0x13f0] ss:$24 sps:$4 sm:$0xff]   ;;  %v8359_v0 = vld [vmem:[#allocation5 + $0x141c] ss:$24 sps:$4 sm:$0xff]  }
 0x2df   : > { %5510 = vmatpush1.bf16.msra.mxu1 %v8273_v37  ;;  %v8362_v37 = vld [vmem:[#allocation5 + $0x1424] ss:$24 sps:$4 sm:$0xff]  }
 0x2e0   : > { %5838 = vmatpush1.bf16.msra.mxu0 %v8276_v38  ;;  %5511 = vmatprep.subr.bf16.mxu1 %v8281_v39  ;;  %v8357_v38 = vld [vmem:[#allocation5 + $0x1418] ss:$24 sps:$4 sm:$0xff]  }
 0x2e1   : > { %5839 = vmatprep.subr.bf16.mxu0 %v8284_v40  ;;  %v8360_v39 = vld [vmem:[#allocation5 + $0x1420] ss:$24 sps:$4 sm:$0xff]   ;;  %v8365_v40 = vld [vmem:[#allocation5 + $0x144c] ss:$24 sps:$4 sm:$0xff]  }
 0x2e3   : > { %5512 = vmatpush1.bf16.msra.mxu1 %v8279_v44  ;;  %v8368_v44 = vld [vmem:[#allocation5 + $0x1454] ss:$24 sps:$4 sm:$0xff]  }
 0x2e4   : > { %5840 = vmatpush1.bf16.msra.mxu0 %v8282_v53  ;;  %5513 = vmatprep.subr.bf16.mxu1 %v8287_v45  ;;  %v8363_v53 = vld [vmem:[#allocation5 + $0x1448] ss:$24 sps:$4 sm:$0xff]  }
 0x2e5   : > { %5841 = vmatprep.subr.bf16.mxu0 %v8290_v46  ;;  %v8366_v45 = vld [vmem:[#allocation5 + $0x1450] ss:$24 sps:$4 sm:$0xff]   ;;  %v8371_v46 = vld [vmem:[#allocation5 + $0x147c] ss:$24 sps:$4 sm:$0xff]  }
 0x2e7   : > { %5514 = vmatpush1.bf16.msra.mxu1 %v8285_v47  ;;  %v8374_v47 = vld [vmem:[#allocation5 + $0x1484] ss:$24 sps:$4 sm:$0xff]  }
 0x2e8   : > { %5842 = vmatpush1.bf16.msra.mxu0 %v8288_v22  ;;  %5524 = vmatprep.subr.bf16.mxu1 %v8293_v51  ;;  %v8369_v22 = vld [vmem:[#allocation5 + $0x1478] ss:$24 sps:$4 sm:$0xff]  }
 0x2e9   : > { %5852 = vmatprep.subr.bf16.mxu0 %v8296_v52  ;;  %v8372_v51 = vld [vmem:[#allocation5 + $0x1480] ss:$24 sps:$4 sm:$0xff]   ;;  %v8377_v52 = vld [vmem:[#allocation5 + $0x14ac] ss:$24 sps:$4 sm:$0xff]  }
 0x2ea   : > { %5516 = vmatmul.mubr.bf16.vlgmr.msra.gmra.mrb[4].mxu1 %v8889_v23 }
 0x2eb   : > { %5844 = vmatmul.mubr.bf16.vlgmr.msra.gmra.mrb[4].mxu0 %v8889_v23  ;;  %5525 = vmatpush1.bf16.msra.mxu1 %v8291_v11  ;;  %v8314_v23 = vld [vmem:[#allocation5 + $0x12a4] ss:$24 sps:$4 sm:$0xff]   ;;  %v8380_v11 = vld [vmem:[#allocation5 + $0x14b4] ss:$24 sps:$4 sm:$0xff]  }
 0x2ec   : > { %5853 = vmatpush1.bf16.msra.mxu0 %v8294_v54  ;;  %5526 = vmatprep.subr.bf16.mxu1 %v8299_v55  ;;  %v8375_v54 = vld [vmem:[#allocation5 + $0x14a8] ss:$24 sps:$4 sm:$0xff]  }
 0x2ed   : > { %5854 = vmatprep.subr.bf16.mxu0 %v8302_v56  ;;  %5556 = vmatprep.mubr.bf16.mxu1 %v8897_v33  ;;  %v8378_v55 = vld [vmem:[#allocation5 + $0x14b0] ss:$24 sps:$4 sm:$0xff]   ;;  %v8383_v56 = vld [vmem:[#allocation5 + $0x14dc] ss:$24 sps:$4 sm:$0xff]  }
 0x2ee   : > { %5884 = vmatprep.mubr.bf16.mxu0 %v8897_v33  ;;  %v8318_v33 = vld [vmem:[#allocation5 + $0x12d0] ss:$24 sps:$4 sm:$0xff]  }
 0x2ef   : > { %5527 = vmatpush1.bf16.msra.mxu1 %v8297_v28  ;;  %v8386_v28 = vld [vmem:[#allocation5 + $0x14e4] ss:$24 sps:$4 sm:$0xff]  }
 0x2f0   : > { %5855 = vmatpush1.bf16.msra.mxu0 %v8300_v57  ;;  %5528 = vmatprep.subr.bf16.mxu1 %v8305_v41  ;;  %v8381_v57 = vld [vmem:[#allocation5 + $0x14d8] ss:$24 sps:$4 sm:$0xff]  }
 0x2f1   : > { %5856 = vmatprep.subr.bf16.mxu0 %v8308_v58  ;;  %v8384_v41 = vld [vmem:[#allocation5 + $0x14e0] ss:$24 sps:$4 sm:$0xff]   ;;  %v8389_v58 = vld [vmem:[#allocation5 + $0x150c] ss:$24 sps:$4 sm:$0xff]  }
 0x2f3   : > { %5529 = vmatpush1.bf16.msra.mxu1 %v8303_v59  ;;  %v8392_v59 = vld [vmem:[#allocation5 + $0x1514] ss:$24 sps:$4 sm:$0xff]  }
 0x2f4   : > { %5857 = vmatpush1.bf16.msra.mxu0 %v8306_v60  ;;  %5530 = vmatprep.subr.bf16.mxu1 %v8311_v42  ;;  %v8387_v60 = vld [vmem:[#allocation5 + $0x1508] ss:$24 sps:$4 sm:$0xff]  }
 0x2f5   : > { %5858 = vmatprep.subr.bf16.mxu0 %v8314_v23  ;;  %v8390_v42 = vld [vmem:[#allocation5 + $0x1510] ss:$24 sps:$4 sm:$0xff]   ;;  %v8395_v23 = vld [vmem:[#allocation5 + $0x153c] ss:$24 sps:$4 sm:$0xff]  }
 0x2f7   : > { %5531 = vmatpush1.bf16.msra.mxu1 %v8309_v61  ;;  %v8398_v61 = vld [vmem:[#allocation5 + $0x1544] ss:$24 sps:$4 sm:$0xff]  }
 0x2f8   : > { %5859 = vmatpush1.bf16.msra.mxu0 %v8312_v62  ;;  %5532 = vmatprep.subr.bf16.mxu1 %v8317_v63  ;;  %v8393_v62 = vld [vmem:[#allocation5 + $0x1538] ss:$24 sps:$4 sm:$0xff]  }
 0x2f9   : > { %5860 = vmatprep.subr.bf16.mxu0 %v8320_v3  ;;  %v8396_v63 = vld [vmem:[#allocation5 + $0x1540] ss:$24 sps:$4 sm:$0xff]   ;;  %v8401_v3 = vld [vmem:[#allocation5 + $0x156c] ss:$24 sps:$4 sm:$0xff]  }
 0x2fb   : > { %5533 = vmatpush1.bf16.msra.mxu1 %v8315_v4  ;;  %v8404_v4 = vld [vmem:[#allocation5 + $0x1574] ss:$24 sps:$4 sm:$0xff]  }
 0x2fc   : > { %5861 = vmatpush1.bf16.msra.mxu0 %v8318_v33  ;;  %5534 = vmatprep.subr.bf16.mxu1 %v8323_v49  ;;  %v8399_v33 = vld [vmem:[#allocation5 + $0x1568] ss:$24 sps:$4 sm:$0xff]  }
 0x2fd   : > { %5862 = vmatprep.subr.bf16.mxu0 %v8326_v5  ;;  %v8402_v49 = vld [vmem:[#allocation5 + $0x1570] ss:$24 sps:$4 sm:$0xff]   ;;  %v8407_v5 = vld [vmem:[#allocation5 + $0x159c] ss:$24 sps:$4 sm:$0xff]  }
 0x2ff   : > { %5535 = vmatpush1.bf16.msra.mxu1 %v8321_v8  ;;  %v8405_v8 = vld [vmem:[#allocation5 + $0x1598] ss:$24 sps:$4 sm:$0xff]  }
 0x300   : > { %5863 = vmatpush1.bf16.msra.mxu0 %v8324_v9  ;;  %5536 = vmatprep.subr.bf16.mxu1 %v8329_v13  ;;  %v8408_v9 = vld [vmem:[#allocation5 + $0x15a0] ss:$24 sps:$4 sm:$0xff]   ;;  %v8413_v13 = vld [vmem:[#allocation5 + $0x15cc] ss:$24 sps:$4 sm:$0xff]  }
 0x301   : > { %5864 = vmatprep.subr.bf16.mxu0 %v8332_v14  ;;  %v8416_v14 = vld [vmem:[#allocation5 + $0x15d4] ss:$24 sps:$4 sm:$0xff]  }
 0x303   : > { %5537 = vmatpush1.bf16.msra.mxu1 %v8327_v15  ;;  %v8411_v15 = vld [vmem:[#allocation5 + $0x15c8] ss:$24 sps:$4 sm:$0xff]  }
 0x304   : > { %5865 = vmatpush1.bf16.msra.mxu0 %v8330_v16  ;;  %5538 = vmatprep.subr.bf16.mxu1 %v8335_v17  ;;  %v8419_v16 = vld [vmem:[#allocation5 + $0x15fc] ss:$24 sps:$4 sm:$0xff]  }
 0x305   : > { %5866 = vmatprep.subr.bf16.mxu0 %v8338_v18  ;;  %v8422_v17 = vld [vmem:[#allocation5 + $0x1604] ss:$24 sps:$4 sm:$0xff]   ;;  %v8417_v18 = vld [vmem:[#allocation5 + $0x15f8] ss:$24 sps:$4 sm:$0xff]  }
 0x307   : > { %5539 = vmatpush1.bf16.msra.mxu1 %v8333_v19  ;;  %v8420_v19 = vld [vmem:[#allocation5 + $0x1600] ss:$24 sps:$4 sm:$0xff]  }
 0x308   : > { %5867 = vmatpush1.bf16.msra.mxu0 %v8336_v20  ;;  %5540 = vmatprep.subr.bf16.mxu1 %v8341_v21  ;;  %v8425_v20 = vld [vmem:[#allocation5 + $0x162c] ss:$24 sps:$4 sm:$0xff]  }
 0x309   : > { %5868 = vmatprep.subr.bf16.mxu0 %v8344_v48  ;;  %v8428_v21 = vld [vmem:[#allocation5 + $0x1634] ss:$24 sps:$4 sm:$0xff]   ;;  %v8423_v48 = vld [vmem:[#allocation5 + $0x1628] ss:$24 sps:$4 sm:$0xff]  }
 0x30b   : > { %5541 = vmatpush1.bf16.msra.mxu1 %v8339_v24  ;;  %v8426_v24 = vld [vmem:[#allocation5 + $0x1630] ss:$24 sps:$4 sm:$0xff]  }
 0x30c   : > { %5869 = vmatpush1.bf16.msra.mxu0 %v8342_v25  ;;  %5542 = vmatprep.subr.bf16.mxu1 %v8347_v26  ;;  %v8431_v25 = vld [vmem:[#allocation5 + $0x165c] ss:$24 sps:$4 sm:$0xff]  }
 0x30d   : > { %5870 = vmatprep.subr.bf16.mxu0 %v8350_v27  ;;  %v8434_v26 = vld [vmem:[#allocation5 + $0x1664] ss:$24 sps:$4 sm:$0xff]   ;;  %v8429_v27 = vld [vmem:[#allocation5 + $0x1658] ss:$24 sps:$4 sm:$0xff]  }
 0x30f   : > { %5543 = vmatpush1.bf16.msra.mxu1 %v8345_v29  ;;  %v8432_v29 = vld [vmem:[#allocation5 + $0x1660] ss:$24 sps:$4 sm:$0xff]  }
 0x310   : > { %5871 = vmatpush1.bf16.msra.mxu0 %v8348_v30  ;;  %5544 = vmatprep.subr.bf16.mxu1 %v8353_v31  ;;  %v8437_v30 = vld [vmem:[#allocation5 + $0x168c] ss:$24 sps:$4 sm:$0xff]  }
 0x311   : > { %5872 = vmatprep.subr.bf16.mxu0 %v8356_v10  ;;  %v8440_v31 = vld [vmem:[#allocation5 + $0x1694] ss:$24 sps:$4 sm:$0xff]   ;;  %v8435_v10 = vld [vmem:[#allocation5 + $0x1688] ss:$24 sps:$4 sm:$0xff]  }
 0x313   : > { %5545 = vmatpush1.bf16.msra.mxu1 %v8351_v34  ;;  %v8438_v34 = vld [vmem:[#allocation5 + $0x1690] ss:$24 sps:$4 sm:$0xff]  }
 0x314   : > { %5873 = vmatpush1.bf16.msra.mxu0 %v8354_v35  ;;  %5546 = vmatprep.subr.bf16.mxu1 %v8359_v0  ;;  %v8443_v35 = vld [vmem:[#allocation5 + $0x16bc] ss:$24 sps:$4 sm:$0xff]  }
 0x315   : > { %5874 = vmatprep.subr.bf16.mxu0 %v8362_v37  ;;  %v8446_v0 = vld [vmem:[#allocation5 + $0x16c4] ss:$24 sps:$4 sm:$0xff]   ;;  %v8441_v37 = vld [vmem:[#allocation5 + $0x16b8] ss:$24 sps:$4 sm:$0xff]  }
 0x317   : > { %5547 = vmatpush1.bf16.msra.mxu1 %v8357_v38  ;;  %v8444_v38 = vld [vmem:[#allocation5 + $0x16c0] ss:$24 sps:$4 sm:$0xff]  }
 0x318   : > { %5875 = vmatpush1.bf16.msra.mxu0 %v8360_v39  ;;  %5548 = vmatprep.subr.bf16.mxu1 %v8365_v40  ;;  %v8449_v39 = vld [vmem:[#allocation5 + $0x16ec] ss:$24 sps:$4 sm:$0xff]  }
 0x319   : > { %5876 = vmatprep.subr.bf16.mxu0 %v8368_v44  ;;  %v8452_v40 = vld [vmem:[#allocation5 + $0x16f4] ss:$24 sps:$4 sm:$0xff]   ;;  %v8447_v44 = vld [vmem:[#allocation5 + $0x16e8] ss:$24 sps:$4 sm:$0xff]  }
 0x31b   : > { %5549 = vmatpush1.bf16.msra.mxu1 %v8363_v53  ;;  %v8450_v53 = vld [vmem:[#allocation5 + $0x16f0] ss:$24 sps:$4 sm:$0xff]  }
 0x31c   : > { %5877 = vmatpush1.bf16.msra.mxu0 %v8366_v45  ;;  %5550 = vmatprep.subr.bf16.mxu1 %v8371_v46  ;;  %v8455_v45 = vld [vmem:[#allocation5 + $0x171c] ss:$24 sps:$4 sm:$0xff]  }
 0x31d   : > { %5878 = vmatprep.subr.bf16.mxu0 %v8374_v47  ;;  %v8458_v46 = vld [vmem:[#allocation5 + $0x1724] ss:$24 sps:$4 sm:$0xff]   ;;  %v8453_v47 = vld [vmem:[#allocation5 + $0x1718] ss:$24 sps:$4 sm:$0xff]  }
 0x31f   : > { %5551 = vmatpush1.bf16.msra.mxu1 %v8369_v22  ;;  %v8456_v22 = vld [vmem:[#allocation5 + $0x1720] ss:$24 sps:$4 sm:$0xff]  }
 0x320   : > { %5879 = vmatpush1.bf16.msra.mxu0 %v8372_v51  ;;  %5552 = vmatprep.subr.bf16.mxu1 %v8377_v52  ;;  %v8461_v51 = vld [vmem:[#allocation5 + $0x174c] ss:$24 sps:$4 sm:$0xff]  }
 0x321   : > { %5880 = vmatprep.subr.bf16.mxu0 %v8380_v11  ;;  %v8464_v52 = vld [vmem:[#allocation5 + $0x1754] ss:$24 sps:$4 sm:$0xff]   ;;  %v8459_v11 = vld [vmem:[#allocation5 + $0x1748] ss:$24 sps:$4 sm:$0xff]  }
 0x323   : > { %5553 = vmatpush1.bf16.msra.mxu1 %v8375_v54  ;;  %v8462_v54 = vld [vmem:[#allocation5 + $0x1750] ss:$24 sps:$4 sm:$0xff]  }
 0x324   : > { %5881 = vmatpush1.bf16.msra.mxu0 %v8378_v55  ;;  %5554 = vmatprep.subr.bf16.mxu1 %v8383_v56  ;;  %v8467_v55 = vld [vmem:[#allocation5 + $0x177c] ss:$24 sps:$4 sm:$0xff]  }
 0x325   : > { %5882 = vmatprep.subr.bf16.mxu0 %v8386_v28  ;;  %v8470_v56 = vld [vmem:[#allocation5 + $0x1784] ss:$24 sps:$4 sm:$0xff]   ;;  %v8465_v28 = vld [vmem:[#allocation5 + $0x1778] ss:$24 sps:$4 sm:$0xff]  }
 0x327   : > { %5555 = vmatpush1.bf16.msra.mxu1 %v8381_v57  ;;  %v8468_v57 = vld [vmem:[#allocation5 + $0x1780] ss:$24 sps:$4 sm:$0xff]  }
 0x328   : > { %5883 = vmatpush1.bf16.msra.mxu0 %v8384_v41  ;;  %5565 = vmatprep.subr.bf16.mxu1 %v8389_v58  ;;  %v8473_v41 = vld [vmem:[#allocation5 + $0x17ac] ss:$24 sps:$4 sm:$0xff]  }
 0x329   : > { %5893 = vmatprep.subr.bf16.mxu0 %v8392_v59  ;;  %v8476_v58 = vld [vmem:[#allocation5 + $0x17b4] ss:$24 sps:$4 sm:$0xff]   ;;  %v8471_v59 = vld [vmem:[#allocation5 + $0x17a8] ss:$24 sps:$4 sm:$0xff]  }
 0x32a   : > { %5557 = vmatmul.mubr.bf16.vlgmr.msra.gmra.mrb[4].mxu1 %v8905_v43 }
 0x32b   : > { %5885 = vmatmul.mubr.bf16.vlgmr.msra.gmra.mrb[4].mxu0 %v8905_v43  ;;  %5566 = vmatpush1.bf16.msra.mxu1 %v8387_v60  ;;  %v8410_v43 = vld [vmem:[#allocation5 + $0x15a4] ss:$24 sps:$4 sm:$0xff]   ;;  %v8474_v60 = vld [vmem:[#allocation5 + $0x17b0] ss:$24 sps:$4 sm:$0xff]  }
 0x32c   : > { %5894 = vmatpush1.bf16.msra.mxu0 %v8390_v42  ;;  %5567 = vmatprep.subr.bf16.mxu1 %v8395_v23  ;;  %v8479_v42 = vld [vmem:[#allocation5 + $0x17dc] ss:$24 sps:$4 sm:$0xff]  }
 0x32d   : > { %5895 = vmatprep.subr.bf16.mxu0 %v8398_v61  ;;  %5597 = vmatprep.mubr.bf16.mxu1 %v8911_v50  ;;  %v8482_v23 = vld [vmem:[#allocation5 + $0x17e4] ss:$24 sps:$4 sm:$0xff]   ;;  %v8477_v61 = vld [vmem:[#allocation5 + $0x17d8] ss:$24 sps:$4 sm:$0xff]  }
 0x32e   : > { %5925 = vmatprep.mubr.bf16.mxu0 %v8911_v50  ;;  %v8414_v50 = vld [vmem:[#allocation5 + $0x15d0] ss:$24 sps:$4 sm:$0xff]  }
 0x32f   : > { %5568 = vmatpush1.bf16.msra.mxu1 %v8393_v62  ;;  %v8480_v62 = vld [vmem:[#allocation5 + $0x17e0] ss:$24 sps:$4 sm:$0xff]  }
 0x330   : > { %5896 = vmatpush1.bf16.msra.mxu0 %v8396_v63  ;;  %5569 = vmatprep.subr.bf16.mxu1 %v8401_v3  ;;  %v8976_v63 = vsub.s32 2, %v8939_v2  ;;  %v8979_v3 = vsub.s32 3, %v8939_v2 }
 0x331   : > { %5897 = vmatprep.subr.bf16.mxu0 %v8404_v4  ;;  %v8982_v4 = vsub.s32 4, %v8939_v2 }
 0x333   : > { %5570 = vmatpush1.bf16.msra.mxu1 %v8399_v33  ;;  %v1091_v33 = vrot.slane %v8941_v6, %v8976_v63 }
 0x334   : > { %5898 = vmatpush1.bf16.msra.mxu0 %v8402_v49  ;;  %5571 = vmatprep.subr.bf16.mxu1 %v8407_v5  ;;  %v8987_v49 = vsub.s32 5, %v8939_v2  ;;  %v1095_v5 = vrot.slane %v8941_v6, %v8979_v3 }
 0x335   : > { %5899 = vmatprep.subr.bf16.mxu0 %v8410_v43  ;;  %v5935_v43 = vmax.f32 %v8955_v36, 0.0 }
 0x337   : > { %5572 = vmatpush1.bf16.msra.mxu1 %v8405_v8  ;;  %v1099_v8 = vrot.slane %v8941_v6, %v8982_v4 }
 0x338   : > { %5900 = vmatpush1.bf16.msra.mxu0 %v8408_v9  ;;  %5573 = vmatprep.subr.bf16.mxu1 %v8413_v13 }
 0x339   : > { %5901 = vmatprep.subr.bf16.mxu0 %v8416_v14 }
 0x33b   : > { %5574 = vmatpush1.bf16.msra.mxu1 %v8411_v15 }
 0x33c   : > { %5902 = vmatpush1.bf16.msra.mxu0 %v8414_v50  ;;  %5575 = vmatprep.subr.bf16.mxu1 %v8419_v16  ;;  %v1103_v50 = vrot.slane %v8941_v6, %v8987_v49  ;;  %v8648_v6 = vmov 0  }
 0x33d   : > { %5903 = vmatprep.subr.bf16.mxu0 %v8422_v17  ;;  %7326 = vset.pattern.permute.xlu1 %v8648_v6 }
 0x33f   : > { %5576 = vmatpush1.bf16.msra.mxu1 %v8417_v18 }
 0x340   : > { %5904 = vmatpush1.bf16.msra.mxu0 %v8420_v19  ;;  %5577 = vmatprep.subr.bf16.mxu1 %v8425_v20 }
 0x341   : > { %5905 = vmatprep.subr.bf16.mxu0 %v8428_v21 }
 0x343   : > { %5578 = vmatpush1.bf16.msra.mxu1 %v8423_v48 }
 0x344   : > { %5906 = vmatpush1.bf16.msra.mxu0 %v8426_v24  ;;  %5579 = vmatprep.subr.bf16.mxu1 %v8431_v25 }
 0x345   : > { %5907 = vmatprep.subr.bf16.mxu0 %v8434_v26 }
 0x347   : > { %5580 = vmatpush1.bf16.msra.mxu1 %v8429_v27 }
 0x348   : > { %5908 = vmatpush1.bf16.msra.mxu0 %v8432_v29  ;;  %5581 = vmatprep.subr.bf16.mxu1 %v8437_v30 }
 0x349   : > { %5909 = vmatprep.subr.bf16.mxu0 %v8440_v31 }
 0x34b   : > { %5582 = vmatpush1.bf16.msra.mxu1 %v8435_v10 }
 0x34c   : > { %5910 = vmatpush1.bf16.msra.mxu0 %v8438_v34  ;;  %5583 = vmatprep.subr.bf16.mxu1 %v8443_v35  ;;  %v8649_v34 = vmov 2   ;;  %v6051_v35 = vld [vmem:[%s257_s5] sm:$0xff] }
 0x34d   : > { %5911 = vmatprep.subr.bf16.mxu0 %v8446_v0  ;;  %7328 = vset.pattern.permute.xlu0 %v8649_v34  ;;  %v8650_v0 = vmov 1  }
 0x34e   : > { %6054 = vperm.xlu1 %7326, %v6051_v35  }
 0x34f   : > { %5584 = vmatpush1.bf16.msra.mxu1 %v8441_v37  ;;  %v8651_v37 = vmov 3  }
 0x350   : > { %5912 = vmatpush1.bf16.msra.mxu0 %v8444_v38  ;;  %5585 = vmatprep.subr.bf16.mxu1 %v8449_v39 }
 0x351   : > { %5913 = vmatprep.subr.bf16.mxu0 %v8452_v40 }
 0x352   : > { %7327 = vset.pattern.permute.xlu1 %v8650_v0 }
 0x353   : > { %5586 = vmatpush1.bf16.msra.mxu1 %v8447_v44  ;;  %6125 = vperm.xlu1 %7327, %v6051_v35  }
 0x354   : > { %5914 = vmatpush1.bf16.msra.mxu0 %v8450_v53  ;;  %5587 = vmatprep.subr.bf16.mxu1 %v8455_v45 }
 0x355   : > { %5915 = vmatprep.subr.bf16.mxu0 %v8458_v46 }
 0x357   : > { %5588 = vmatpush1.bf16.msra.mxu1 %v8453_v47  ;;  %7329 = vset.pattern.permute.xlu1 %v8651_v37 }
 0x358   : > { %5916 = vmatpush1.bf16.msra.mxu0 %v8456_v22  ;;  %5589 = vmatprep.subr.bf16.mxu1 %v8461_v51 }
 0x359   : > { %5917 = vmatprep.subr.bf16.mxu0 %v8464_v52  ;;  %6205 = vperm.xlu1 %7329, %v6051_v35  }
 0x35b   : > { %5590 = vmatpush1.bf16.msra.mxu1 %v8459_v11 }
 0x35c   : > { %5918 = vmatpush1.bf16.msra.mxu0 %v8462_v54  ;;  %5591 = vmatprep.subr.bf16.mxu1 %v8467_v55 }
 0x35d   : > { %5919 = vmatprep.subr.bf16.mxu0 %v8470_v56 }
 0x35f   : > { %5592 = vmatpush1.bf16.msra.mxu1 %v8465_v28 }
 0x360   : > { %5920 = vmatpush1.bf16.msra.mxu0 %v8468_v57  ;;  %5593 = vmatprep.subr.bf16.mxu1 %v8473_v41 }
 0x361   : > { %5921 = vmatprep.subr.bf16.mxu0 %v8476_v58 }
 0x363   : > { %5594 = vmatpush1.bf16.msra.mxu1 %v8471_v59  ;;  %v1062_v59 = vld [vmem:[#allocation7 + $0x1] ss:$8 sm:$0xf] }
 0x364   : > { %5922 = vmatpush1.bf16.msra.mxu0 %v8474_v60  ;;  %5595 = vmatprep.subr.bf16.mxu1 %v8479_v42  ;;  %v1063_v60 = vld [vmem:[#allocation7 + $0x1] ss:$8 sm:$0x30]  ;;  %v9026_v42 = vld [vmem:[#allocation7] sm:$0xf0] }
 0x365   : > { %5923 = vmatprep.subr.bf16.mxu0 %v8482_v23  ;;  %v9028_v23 = vld [vmem:[#allocation7 + $0x8] sm:$0xf0] }
 0x367   : > { %5596 = vmatpush1.bf16.msra.mxu1 %v8477_v61  ;;  %v1066_v61 = vld [vmem:[#allocation7 + $0x2] ss:$8 sm:$0xf] }
 0x368   : > { %5924 = vmatpush1.bf16.msra.mxu0 %v8480_v62  ;;  %v1067_v62 = vld [vmem:[#allocation7 + $0x2] ss:$8 sm:$0x30] }
 0x36a   : > { %5598 = vmatmul.mubr.bf16.vlgmr.msra.gmra.mrb[4].mxu1 %v8921_v1 }
 0x36b   : > { %5926 = vmatmul.mubr.bf16.vlgmr.msra.gmra.mrb[4].mxu0 %v8921_v1  ;;  %v5934_v1 = vmax.f32 %v8953_v32, 0.0 }
 0x36d   : > { %v5940_v20 = vadd.f32 %v5935_v43, %v5934_v1 }
 0x43d   : > { %v5599_v9 = vpop.f32.mrb[4].mxu1 }
 0x43e   : > { %v5927_v13 = vpop.f32.mrb[4].mxu0  ;;  %v7167_v14 = vadd.f32 %v5599_v9, %v1091_v33  ;;  %v5601_v15 = vpop.f32.mrb[5].mxu1  ;;  %v9030_v33 = vld [vmem:[#allocation7 + $0x10] sm:$0xf0]  ;;  %v9036_v9 = vld [vmem:[#allocation7 + $0x28] sm:$0xf0] }
 0x43f   : > { %v5929_v16 = vpop.f32.mrb[5].mxu0  ;;  %v7168_v17 = vadd.f32 %v5601_v15, %v1095_v5  ;;  %v5603_v18 = vpop.f32.mrb[6].mxu1  ;;  %v7169_v32 = vadd.f32 %v5927_v13, %v1099_v8  ;;  %v9034_v8 = vld [vmem:[#allocation7 + $0x20] sm:$0xf0]  ;;  %v6060_v13 = vrot.slane %v9026_v42, %v8982_v4  ;;  %v9042_v15 = vor.u32 %v1067_v62, %v1066_v61 }
 0x440   : > { %v5931_v19 = vpop.f32.mrb[6].mxu0  ;;  %v5936_v21 = vmax.f32 %v7167_v14, 0.0  ;;  %v5604_v48 = vpop.f32.mrb[7].mxu1  ;;  %v7170_v26 = vadd.f32 %v5929_v16, %v1103_v50  ;;  %v6064_v14 = vrot.slane %v9028_v23, %v8982_v4  ;;  %v6068_v50 = vrot.slane %v9030_v33, %v8982_v4 }
 0x441   : > { %v5932_v36 = vpop.f32.mrb[7].mxu0  ;;  %v5937_v24 = vmax.f32 %v7168_v17, 0.0  ;;  %v5938_v27 = vmax.f32 %v7169_v32, 0.0  ;;  %v6055_v5 = vpop.permute.xlu1 %6054  ;;  %v6076_v17 = vrot.slane %v9034_v8, %v8982_v4  ;;  %v6080_v18 = vrot.slane %v9036_v9, %v8982_v4 }
 0x442   : > { %v5941_v25 = vadd.f32 %v5940_v20, %v5936_v21  ;;  %v5939_v30 = vmax.f32 %v7170_v26, 0.0  ;;  %v6081_v19 = vmul.f32 %v6060_v13, %v6055_v5  ;;  %v6082_v20 = vmul.f32 %v6064_v14, %v6055_v5 }
 0x443   : > { %v5981_v48 = vrot.slane %v9042_v15, %v8944_v7  ;;  %v6131_v36 = vrot.slane %v9026_v42, %v8987_v49 }
 0x444   : > { %v5942_v29 = vadd.f32 %v5941_v25, %v5937_v24 }
 0x445   : > { %v6126_v26 = vpop.permute.xlu1 %6125 }
 0x446   : > { %v5943_v31 = vadd.f32 %v5942_v29, %v5938_v27  ;;  %v6139_v29 = vrot.slane %v9030_v33, %v8987_v49 }
 0x448   : > { %v5944_v10 = vadd.f32 %v5943_v31, %v5939_v30  ;;  %v6085_v31 = vmul.f32 %v6076_v17, %v6055_v5 }
 0x44a   : > { %5945 = vadd.xlane.f32.xlu0 %v5944_v10  ;;  %v6086_v10 = vmul.f32 %v6080_v18, %v6055_v5 }
 0x4d7   : > { %v5946_v38 = vpop.xlane.xlu0 %5945 }
 0x4d8   : > { %v5948_v39 = vmul.f32 0.0013020834, %v5946_v38 }
 0x4da   : > { %v9002_v40 = vsub.f32 %v5934_v1, %v5948_v39  ;;  %v9004_v44 = vsub.f32 %v5935_v43, %v5948_v39  ;;  %v9006_v53 = vsub.f32 %v5936_v21, %v5948_v39  ;;  %v9008_v45 = vsub.f32 %v5937_v24, %v5948_v39  ;;  %v9032_v43 = vld [vmem:[#allocation7 + $0x18] sm:$0xf0] }
 0x4db   : > { %v9014_v22 = vsub.f32 %v5938_v27, %v5948_v39  ;;  %v9018_v11 = vsub.f32 %v5939_v30, %v5948_v39  ;;  %v1064_v1 = vor.u32 %v1063_v60, %v1062_v59  ;;  %v6072_v16 = vrot.slane %v9032_v43, %v8982_v4 }
 0x4dc   : > { %v5955_v46 = vmul.f32 %v9002_v40, %v9002_v40  ;;  %v5956_v47 = vmul.f32 %v9004_v44, %v9004_v44  ;;  %v5957_v51 = vmul.f32 %v9006_v53, %v9006_v53  ;;  %v5958_v54 = vmul.f32 %v9008_v45, %v9008_v45 }
 0x4dd   : > { %v5959_v56 = vmul.f32 %v9014_v22, %v9014_v22  ;;  %v5960_v57 = vmul.f32 %v9018_v11, %v9018_v11  ;;  %v6091_v21 = vrot.slane %v1064_v1, %v8944_v7  ;;  %v6095_v32 = vrot.slane %v1064_v1, %v8947_v12 }
 0x4de   : > { %v5961_v52 = vadd.f32 %v5956_v47, %v5955_v46  ;;  %v6083_v24 = vmul.f32 %v6068_v50, %v6055_v5  ;;  %v6099_v25 = vrot.slane %v1064_v1, %v8976_v63  ;;  %v6135_v27 = vrot.slane %v9028_v23, %v8987_v49 }
 0x4df   : > { %v6084_v30 = vmul.f32 %v6072_v16, %v6055_v5  ;;  %v6103_v6 = vrot.slane %v1064_v1, %v8979_v3  ;;  %v6107_v34 = vrot.slane %v1064_v1, %v8982_v4  ;;  %v6118_v0 = vadd.f32 %v6091_v21, %v6081_v19  ;;  %v1070_v19 = vld [vmem:[#allocation7 + $0x3] ss:$8 sm:$0xf] }
 0x4e0   : > { %v5962_v55 = vadd.f32 %v5961_v52, %v5957_v51  ;;  %v6143_v38 = vrot.slane %v9032_v43, %v8987_v49  ;;  %v6147_v39 = vrot.slane %v9034_v8, %v8987_v49  ;;  %v6151_v46 = vrot.slane %v9036_v9, %v8987_v49 }
 0x4e1   : > { %v6152_v47 = vmul.f32 %v6131_v36, %v6126_v26  ;;  %v6120_v51 = vadd.f32 %v6099_v25, %v6083_v24  ;;  %v6153_v52 = vmul.f32 %v6135_v27, %v6126_v26  ;;  %v6121_v60 = vadd.f32 %v6103_v6, %v6084_v30  ;;  %v6206_v27 = vpop.permute.xlu1 %6205 }
 0x4e2   : > { %v5963_v28 = vadd.f32 %v5962_v55, %v5958_v54  ;;  %v6154_v54 = vmul.f32 %v6139_v29, %v6126_v26  ;;  %v6170_v55 = vsub.s32 6, %v8939_v2  ;;  %v6122_v61 = vadd.f32 %v6107_v34, %v6085_v31 }
 0x4e3   : > { %v6155_v5 = vmul.f32 %v6143_v38, %v6126_v26  ;;  %v6157_v13 = vmul.f32 %v6151_v46, %v6126_v26  ;;  %v6158_v14 = vadd.f32 %v6152_v47, %v6118_v0 }
 0x4e4   : > { %v5964_v41 = vadd.f32 %v5963_v28, %v5959_v56  ;;  %v5985_v56 = vrot.slane %v9042_v15, %v8947_v12  ;;  %v5989_v28 = vrot.slane %v9042_v15, %v8976_v63  ;;  %v6160_v17 = vadd.f32 %v6154_v54, %v6120_v51 }
 0x4e5   : > { %v6171_v18 = vrot.slane %v9026_v42, %v6170_v55  ;;  %v6175_v24 = vrot.slane %v9028_v23, %v6170_v55  ;;  %v6179_v25 = vrot.slane %v9030_v33, %v6170_v55  ;;  %v6187_v29 = vrot.slane %v9034_v8, %v6170_v55 }
 0x4e6   : > { %v5965_v58 = vadd.f32 %v5964_v41, %v5960_v57  ;;  %v5993_v57 = vrot.slane %v9042_v15, %v8979_v3  ;;  %v6191_v30 = vrot.slane %v9036_v9, %v6170_v55 }
 0x4e8   : > { %5966 = vadd.xlane.f32.xlu0 %v5965_v58  ;;  %v6210_v58 = vsub.s32 7, %v8939_v2 }
 0x4ea   : > { %v6211_v21 = vrot.slane %v9026_v42, %v6210_v58  ;;  %v6219_v2 = vrot.slane %v9030_v33, %v6210_v58  ;;  %v6223_v36 = vrot.slane %v9032_v43, %v6210_v58  ;;  %v6227_v42 = vrot.slane %v9034_v8, %v6210_v58 }
 0x4eb   : > { %v6231_v31 = vrot.slane %v9036_v9, %v6210_v58 }
 0x4ec   : > { %v6234_v38 = vmul.f32 %v6219_v2, %v6206_v27  ;;  %v6235_v33 = vmul.f32 %v6223_v36, %v6206_v27  ;;  %v6236_v54 = vmul.f32 %v6227_v42, %v6206_v27 }
 0x4ed   : > { %v6237_v8 = vmul.f32 %v6231_v31, %v6206_v27 }
 0x4fe   : > { %6165 = vperm.xlu0 %7328, %v6051_v35   ;;  %v6111_v35 = vrot.slane %v1064_v1, %v8987_v49  ;;  %v6156_v1 = vmul.f32 %v6147_v39, %v6126_v26  ;;  %v6183_v26 = vrot.slane %v9032_v43, %v6170_v55 }
 0x500   : > { %v6123_v62 = vadd.f32 %v6111_v35, %v6086_v10  ;;  %v6161_v10 = vadd.f32 %v6155_v5, %v6121_v60  ;;  %v6162_v6 = vadd.f32 %v6156_v1, %v6122_v61  ;;  %v5997_v61 = vrot.slane %v9042_v15, %v8982_v4 }
 0x502   : > { %7330 = vset.pattern.permute.xlu0 %v8651_v37  ;;  %v6119_v37 = vadd.f32 %v6095_v32, %v6082_v20  ;;  %v1071_v20 = vld [vmem:[#allocation7 + $0x3] ss:$8 sm:$0x30]  ;;  %v6215_v32 = vrot.slane %v9028_v23, %v6210_v58  ;;  %v6163_v34 = vadd.f32 %v6157_v13, %v6123_v62  ;;  %v6001_v62 = vrot.slane %v9042_v15, %v8987_v49 }
 0x503   : > { %v1072_v35 = vor.u32 %v1071_v20, %v1070_v19 }
 0x504   : > { %v6159_v16 = vadd.f32 %v6153_v52, %v6119_v37  ;;  %v6232_v37 = vmul.f32 %v6211_v21, %v6206_v27  ;;  %v6233_v23 = vmul.f32 %v6215_v32, %v6206_v27 }
 0x505   : > { %v6018_v5 = vrot.slane %v1072_v35, %v8944_v7  ;;  %v6022_v1 = vrot.slane %v1072_v35, %v8947_v12 }
 0x575   : > { %v5967_v41 = vpop.xlane.xlu0 %5966 }
 0x576   : > { %v5968_v59 = vmul.f32 0.0013020834, %v5967_v41 }
 0x578   : > { %v5969_v50 = vadd.f32 1e-12, %v5968_v59 }
 0x57a   : > { %8483 = vrsqrt.f32 %v5969_v50 }
 0x57d   : > { %v6166_v0 = vpop.permute.xlu0 %6165 }
 0x57e   : > { %v6192_v39 = vmul.f32 %v6171_v18, %v6166_v0  ;;  %v6193_v43 = vmul.f32 %v6175_v24, %v6166_v0  ;;  %v6194_v46 = vmul.f32 %v6179_v25, %v6166_v0  ;;  %v6195_v47 = vmul.f32 %v6183_v26, %v6166_v0 }
 0x57f   : > { %v6196_v51 = vmul.f32 %v6187_v29, %v6166_v0  ;;  %v6197_v52 = vmul.f32 %v6191_v30, %v6166_v0  ;;  %v6038_v18 = vrot.slane %v1072_v35, %v8987_v49 }
 0x580   : > { %v6198_v55 = vadd.f32 %v6192_v39, %v6158_v14  ;;  %v6199_v9 = vadd.f32 %v6193_v43, %v6159_v16  ;;  %v6200_v41 = vadd.f32 %v6194_v46, %v6160_v17  ;;  %v6201_v58 = vadd.f32 %v6195_v47, %v6161_v10 }
 0x581   : > { %v6202_v59 = vadd.f32 %v6196_v51, %v6162_v6  ;;  %v6203_v60 = vadd.f32 %v6197_v52, %v6163_v34  ;;  %v6026_v14 = vrot.slane %v1072_v35, %v8976_v63  ;;  %v6030_v16 = vrot.slane %v1072_v35, %v8979_v3 }
 0x582   : > { %v6238_v13 = vadd.f32 %v6232_v37, %v6198_v55  ;;  %v6239_v50 = vadd.f32 %v6233_v23, %v6199_v9  ;;  %v6034_v17 = vrot.slane %v1072_v35, %v8982_v4  ;;  %v6240_v20 = vadd.f32 %v6234_v38, %v6200_v41 }
 0x583   : > { %v6241_v21 = vadd.f32 %v6235_v33, %v6201_v58  ;;  %v6242_v32 = vadd.f32 %v6236_v54, %v6202_v59  ;;  %v6243_v2 = vadd.f32 %v6237_v8, %v6203_v60 }
 0x584   : > { %v8484_v19 = vpop.eup %8483  ;;  %v6244_v49 = vmax.f32 %v6238_v13, 0.0  ;;  %v6245_v29 = vmax.f32 %v6239_v50, 0.0 }
 0x585   : > { %v5971_v36 = vmul.f32 %v8484_v19, %v9002_v40  ;;  %v5972_v24 = vmul.f32 %v8484_v19, %v9004_v44  ;;  %v5973_v25 = vmul.f32 %v8484_v19, %v9006_v53  ;;  %v5974_v26 = vmul.f32 %v8484_v19, %v9008_v45 }
 0x586   : > { %v5975_v27 = vmul.f32 %v8484_v19, %v9014_v22  ;;  %v5976_v4 = vmul.f32 %v8484_v19, %v9018_v11  ;;  %v6246_v11 = vmax.f32 %v6240_v20, 0.0  ;;  %v6247_v42 = vmax.f32 %v6241_v21, 0.0 }
 0x587   : > { %v6008_v30 = vmul.f32 %v5981_v48, %v5971_v36  ;;  %v6009_v40 = vmul.f32 %v5985_v56, %v5972_v24  ;;  %v6010_v44 = vmul.f32 %v5989_v28, %v5973_v25  ;;  %v6011_v53 = vmul.f32 %v5993_v57, %v5974_v26 }
 0x588   : > { %v6012_v45 = vmul.f32 %v5997_v61, %v5975_v27  ;;  %v6013_v22 = vmul.f32 %v6001_v62, %v5976_v4  ;;  %v6248_v63 = vmax.f32 %v6242_v32, 0.0  ;;  %v6249_v28 = vmax.f32 %v6243_v2, 0.0 }
 0x589   : > { %v6045_v31 = vadd.f32 %v6018_v5, %v6008_v30  ;;  %v6046_v7 = vadd.f32 %v6022_v1, %v6009_v40  ;;  %v6047_v48 = vadd.f32 %v6026_v14, %v6010_v44  ;;  %v6048_v10 = vadd.f32 %v6030_v16, %v6011_v53 }
 0x58a   : > { %v6049_v12 = vadd.f32 %v6034_v17, %v6012_v45  ;;  %v6050_v56 = vadd.f32 %v6038_v18, %v6013_v22 }
 0x58b   : > { %v6250_v6 = vadd.f32 %v6244_v49, %v6045_v31  ;;  %v6251_v3 = vadd.f32 %v6245_v29, %v6046_v7  ;;  %v6252_v15 = vadd.f32 %v6246_v11, %v6047_v48  ;;  %v6253_v57 = vadd.f32 %v6247_v42, %v6048_v10 }
 0x58c   : > { %v6254_v34 = vadd.f32 %v6248_v63, %v6049_v12  ;;  %v6255_v35 = vadd.f32 %v6249_v28, %v6050_v56 }
 0x58d   : > { %6256 = vst [vmem:[%s253_s10] sm:$0xff] %v6250_v6  ;;  %6257 = vst [vmem:[%s253_s10 + $0x8] sm:$0xff] %v6251_v3 }
 0x58e   : > { %6258 = vst [vmem:[%s253_s10 + $0x10] sm:$0xff] %v6252_v15  ;;  %6259 = vst [vmem:[%s253_s10 + $0x18] sm:$0xff] %v6253_v57 }
 0x58f   : > { %6260 = vst [vmem:[%s253_s10 + $0x20] sm:$0xff] %v6254_v34  ;;  %6261 = vst [vmem:[%s253_s10 + $0x28] sm:$0xff] %v6255_v35 }
 0x590   : > { %8584 = shalt.err (!%p8581_p13)
}
 0x591   : > { %s8585_s29 = scalar_lea.hbm %s9127_s28, 768  ;;  %s8589_s27 = scalar_lea.hbm %s9175_s4, 1536 }
 0x592   : > { %p8586_p6 = scmp.ne.s32.totalorder %s9127_s28, %s8585_s29  ;;  %p8590_p5 = scmp.lt.u32.totalorder %s9127_s28, %s9175_s4 }
 0x593   : > { %p8591_p8 = scmp.lt.u32.totalorder %s8589_s27, %s8585_s29  ;;  %p8593_p0 = scmp.lt.u32.totalorder %s8585_s29, %s9127_s28 }
 0x594   : > { %p8587_p10 = pnand %p8586_p6, %p9189_p1 }
 0x595   : > { %p8592_p11 = por %p8591_p8, %p8590_p5 }
 0x596   : > { %p8588_p4 = pneg %p8587_p10 }
 0x597   : > { %p8594_p3 = por %p8593_p0, %p8592_p11 }
 0x599   : > { %p8595_p7 = pnand %p8594_p3, %p8588_p4 }
 0x59b   : > { %8598 = shalt.err (!%p8595_p7)
}
 0x59c   : > { %7263 = dma.vmem_to_hbm [thread:$0]  (%p9189_p1), %s9129_s14, 768, %s9127_s28, %s6263_s20  }
 0x59d PF: > { %s6289_s6 = sand.u32 1, %s8629_s15   ;;  %p9190_p9 = scmp.ne.s32.totalorder %s9180_s22, 0 }
 0x59e   : > { %p9191_p12 = scmp.ge.s32.totalorder %s8641_s18, 2  ;;  %s6290_s26 = scalar_lea.sflag [#allocation4], %s6289_s6 }
 0x5a0   : > { %p7277_p2 = pnand %p9191_p12, %p9190_p9 }
 0x5a2   : > { %8624 = dma.done.wait (!%p7277_p2), %s6290_s26, 768  }
 0x5a3   : > { %8626 = vsyncadd (!%p7277_p2), %s6290_s26, 4294966528  ;;  %p18_p13 = scmp.ge.s32.totalorder %s8788_s9, 4   ;;  %s9192_s15 = smov %s8633_s16 }
 0x5a4   : > { %s9193_s16 = smov %s8637_s17  ;;  %s9194_s17 = smov %s8804_s12 }
 0x5a5   : > { %s9195_s18 = smov %s8788_s9  ;;  %20 = sbr.rel (!%p18_p13) target bundleno = 6 (0x6), region = 95 }
 0x5ac   :  { %6295 = vsyncpa [#allocation3], 1 }
 0x5ad   :  { %6297 = vsyncpa [#allocation3 + $0x1], 1 }
 0x5ae   :  { %6298 = vsyncpa [#allocation6], 1 }
 0x5af   :  { %6299 = vsyncpa [#allocation4], 1 }
 0x5b0   :  { %6301 = vsyncpa [#allocation4 + $0x1], 1 }

</bundles_post_ra>
